<compile_context>
chip_gen: v7x
topology: tpu7x:2x2x1
jax: 0.10.0
libtpu: 0.0.40
codegen_flags: <defaults>
</compile_context>

<pallas_src>
import jax
import jax.numpy as jnp
from jax.experimental import pallas as pl
from jax.experimental.pallas import tpu as pltpu


def se_gate_mul_kernel(s_ref, w_ref, b_ref, x_ref, o_ref):
    # s_ref: [C_in, 1], w_ref: [Cb, C_in], b_ref: [Cb, 1], x_ref: [Cb, HW]
    # MXU col-vec matmul with f32 accumulation: [Cb, C_in] @ [C_in, 1] -> [Cb, 1]
    gate = jnp.dot(w_ref[...], s_ref[...], preferred_element_type=jnp.float32)
    gate = gate + b_ref[...].astype(jnp.float32)
    gate = jax.nn.sigmoid(gate)                       # EUP path, f32, [Cb, 1]
    # Broadcast the [Cb, 1] gate along the lane (flattened-spatial) axis.
    o_ref[...] = (x_ref[...] * gate).astype(o_ref.dtype)


def _num_cout_blocks(c_out):
    # Use a 2-way "parallel" grid only where there are 2 TensorCores per chip
    # (v7x); elsewhere (v5e/v6e: 1 TC) grid steps only add ~0.35 us overhead.
    try:
        kind = jax.devices()[0].device_kind.lower()
    except Exception:  # pragma: no cover - defensive fallback
        kind = ""
    if "v7" in kind and c_out % 16 == 0:
        return 2
    return 1


def _se_excite_impl(x631, x628, weight, bias):
    n, c_in = x631.shape[0], x631.shape[1]
    _, c_out, h, w = x628.shape
    hw = h * w
    assert n == 1, "kernel written for batch 1 (as in the reference module)"

    # Free, contiguous reshapes: no transposes, no copies, native dtypes kept.
    s = x631.reshape(c_in, 1)                      # [C_in, 1]
    wmat = weight.reshape(c_out, c_in)             # [C_out, C_in] (no transpose)
    b = bias.reshape(c_out, 1)                     # [C_out, 1]
    xflat = x628.reshape(c_out, hw)                # [C_out, HW]
    # TODO(synk): optionally carry the weight in bf16 at parameter-load time
    # (halves the largest remaining input read); kept f32 here so the kernel
    # matches the f32 reference at 1e-5 tolerance on all generations.

    num_blocks = _num_cout_blocks(c_out)
    block_rows = c_out // num_blocks               # 1824 or 912 (multiple of 8)

    bytes_accessed = (
        s.size * jnp.dtype(x631.dtype).itemsize
        + wmat.size * jnp.dtype(weight.dtype).itemsize
        + b.size * jnp.dtype(bias.dtype).itemsize
        + 2 * xflat.size * jnp.dtype(x628.dtype).itemsize  # x read + out write
    )

    out = pl.pallas_call(
        se_gate_mul_kernel,
        out_shape=jax.ShapeDtypeStruct((c_out, hw), x628.dtype),
        grid=(num_blocks,),
        in_specs=[
            pl.BlockSpec((c_in, 1), lambda i: (0, 0)),            # s (whole)
            pl.BlockSpec((block_rows, c_in), lambda i: (i, 0)),    # W
            pl.BlockSpec((block_rows, 1), lambda i: (i, 0)),       # b
            pl.BlockSpec((block_rows, hw), lambda i: (i, 0)),      # x
        ],
        out_specs=pl.BlockSpec((block_rows, hw), lambda i: (i, 0)),
        # The [C_out, HW] activation slab is dead after this op -> reuse it
        # (x628 is donated to the jit, so the alias is realized in place).
        input_output_aliases={3: 0},
        compiler_params=pltpu.CompilerParams(
            dimension_semantics=("parallel",)),
        cost_estimate=pl.CostEstimate(
            flops=2 * c_in * c_out + c_out + hw * c_out,
            transcendentals=c_out,
            bytes_accessed=bytes_accessed,
        ),
    )(s, wmat, b, xflat)

    return out.reshape(n, c_out, h, w)


# x628 is consumed (gated) by this op and has no other users -> donate it so
# the input_output_aliases reuse is real (no defensive XLA copy).
se_excite = jax.jit(_se_excite_impl, donate_argnums=(1,))


def reference(x631, x628, weight, bias):
    # Plain-JAX reference: 1x1 conv on 1x1 spatial == mat-vec, then sigmoid*mul.
    c_out, c_in = weight.shape[0], weight.shape[1]
    s = x631.reshape(c_in).astype(jnp.float32)
    g = jax.nn.sigmoid(weight.reshape(c_out, c_in).astype(jnp.float32) @ s
                       + bias.astype(jnp.float32))
    return x628.astype(jnp.float32) * g.reshape(1, c_out, 1, 1)


if __name__ == "__main__":
    key = jax.random.PRNGKey(0)
    k1, k2, k3, k4 = jax.random.split(key, 4)

    C_IN, C_OUT, H, W = 76, 1824, 7, 7

    x631 = jax.random.normal(k1, (1, C_IN, 1, 1), dtype=jnp.float32)
    x628 = jax.random.normal(k2, (1, C_OUT, H, W), dtype=jnp.float32)

    # Deterministic synthetic parameters (Conv2d(76, 1824, kernel_size=1)).
    fan_in = C_IN
    bound = 1.0 / (fan_in ** 0.5)
    weight = jax.random.uniform(k3, (C_OUT, C_IN, 1, 1),
                                minval=-bound, maxval=bound, dtype=jnp.float32)
    bias = jax.random.uniform(k4, (C_OUT,),
                              minval=-bound, maxval=bound, dtype=jnp.float32)

    x_dtype = x628.dtype

    # Compute the reference BEFORE the kernel call: x628 is donated to the jit.
    ref = jax.block_until_ready(reference(x631, x628, weight, bias))

    out = se_excite(x631, x628, weight, bias)
    out = jax.block_until_ready(out)

    assert out.shape == (1, C_OUT, H, W)
    assert out.dtype == x_dtype
    assert jnp.allclose(out.astype(jnp.float32), ref, atol=1e-5, rtol=1e-5), \
        "mismatch vs reference"

    print("KERNEL_OK")
</pallas_src>

<mosaic_0001>
module attributes {stable_mosaic.version = 11 : i64} {
  func.func @se_gate_mul_kernel(%arg0: i32, %arg1: memref<76x1xf32, #tpu.memory_space<vmem>>, %arg2: memref<1824x76xf32, #tpu.memory_space<vmem>>, %arg3: memref<1824x1xf32, #tpu.memory_space<vmem>>, %arg4: memref<1824x49xf32, #tpu.memory_space<vmem>>, %arg5: memref<1824x49xf32, #tpu.memory_space<vmem>>) attributes {dimension_semantics = [#tpu.dimension_semantics<parallel>], iteration_bounds = array<i64: 1>, scalar_prefetch = 0 : i64, scratch_operands = 0 : i64, tpu.core_type = #tpu.core_type<tc>, window_params = [{pipeline_mode = #tpu.pipeline_mode<synchronous>, transform_indices = @transform_0, window_bounds = array<i64: 76, 1>}, {transform_indices = @transform_1, window_bounds = array<i64: 1824, 76>}, {transform_indices = @transform_2, window_bounds = array<i64: 1824, 1>}, {transform_indices = @transform_3, window_bounds = array<i64: 1824, 49>}, {transform_indices = @transform_4, window_bounds = array<i64: 1824, 49>}]} {
    %c0 = arith.constant 0 : index
    %c0_0 = arith.constant 0 : index
    %0 = vector.load %arg2[%c0, %c0_0] : memref<1824x76xf32, #tpu.memory_space<vmem>>, vector<1824x76xf32>
    %c0_1 = arith.constant 0 : index
    %c0_2 = arith.constant 0 : index
    %1 = vector.load %arg1[%c0_1, %c0_2] : memref<76x1xf32, #tpu.memory_space<vmem>>, vector<76x1xf32>
    %cst = arith.constant dense<0.000000e+00> : vector<1824x1xf32>
    %2 = tpu.matmul %0, %1, %cst {dimension_numbers = #tpu.dot_dimension_numbers<[1], [0], [0], [1], [0, 0, 1, 1], [], []>} : vector<1824x76xf32>, vector<76x1xf32>, vector<1824x1xf32> -> vector<1824x1xf32>
    %c0_3 = arith.constant 0 : index
    %c0_4 = arith.constant 0 : index
    %3 = vector.load %arg3[%c0_3, %c0_4] : memref<1824x1xf32, #tpu.memory_space<vmem>>, vector<1824x1xf32>
    %4 = arith.addf %2, %3 : vector<1824x1xf32>
    %5 = arith.negf %4 : vector<1824x1xf32>
    %6 = math.exp %5 : vector<1824x1xf32>
    %cst_5 = arith.constant 1.000000e+00 : f32
    %7 = vector.broadcast %cst_5 : f32 to vector<1824x1xf32>
    %8 = arith.addf %7, %6 : vector<1824x1xf32>
    %9 = arith.divf %7, %8 : vector<1824x1xf32>
    %c0_6 = arith.constant 0 : index
    %c0_7 = arith.constant 0 : index
    %10 = vector.load %arg4[%c0_6, %c0_7] : memref<1824x49xf32, #tpu.memory_space<vmem>>, vector<1824x49xf32>
    %11 = vector.broadcast %9 : vector<1824x1xf32> to vector<1824x49xf32>
    %12 = arith.mulf %10, %11 : vector<1824x49xf32>
    %c0_8 = arith.constant 0 : index
    %c0_9 = arith.constant 0 : index
    %13 = vector.load %arg5[%c0_8, %c0_9] : memref<1824x49xf32, #tpu.memory_space<vmem>>, vector<1824x49xf32>
    tpu.vector_store %arg5[%c0_8, %c0_9], %12 {strides = array<i32>} : memref<1824x49xf32, #tpu.memory_space<vmem>>, vector<1824x49xf32>,
    return
  }
  func.func @transform_0(%arg0: i32) -> (i32, i32) {
    %c0_i32 = arith.constant 0 : i32
    %c0_i32_0 = arith.constant 0 : i32
    %c0_i32_1 = arith.constant 0 : i32
    return %c0_i32, %c0_i32_0 : i32, i32
  }
  func.func @transform_1(%arg0: i32) -> (i32, i32) {
    %c0_i32 = arith.constant 0 : i32
    %c0_i32_0 = arith.constant 0 : i32
    return %arg0, %c0_i32 : i32, i32
  }
  func.func @transform_2(%arg0: i32) -> (i32, i32) {
    %c0_i32 = arith.constant 0 : i32
    %c0_i32_0 = arith.constant 0 : i32
    return %arg0, %c0_i32 : i32, i32
  }
  func.func @transform_3(%arg0: i32) -> (i32, i32) {
    %c0_i32 = arith.constant 0 : i32
    %c0_i32_0 = arith.constant 0 : i32
    return %arg0, %c0_i32 : i32, i32
  }
  func.func @transform_4(%arg0: i32) -> (i32, i32) {
    %c0_i32 = arith.constant 0 : i32
    %c0_i32_0 = arith.constant 0 : i32
    return %arg0, %c0_i32 : i32, i32
  }
}

</mosaic_0001>

<bundles_post_ra>
// kernel: _se_excite_impl.1
= control target key start
LH: loop header
LB: loop body
LE: loop exit
PB: predicated region body
PF: predicated region fallthrough
CT: control target
= control target key end

     0   :  { %vm483_vm0 = vcmask 621568   ;;  %vm1168_vm1 = vcmask 1043456   ;;  %vm7579_vm2 = vmmov 1   ;;  %vm5341_vm4 = vcmask 400384   ;;  %s11623_s0 = inlined_call_operand.vmem [shape: f32[76,1], index: 0, kind: input, shape index: {}]   ;;  %s11624_s1 = inlined_call_operand.vmem [shape: f32[1824,76], index: 1, kind: input, shape index: {}]   ;;  %s11625_s2 = inlined_call_operand.vmem [shape: f32[1824,1], index: 2, kind: input, shape index: {}]   ;;  %s11626_s3 = inlined_call_operand.vmem [shape: f32[1824,49], index: 3, kind: input, shape index: {}, may-alias: {3,4}]   ;;  %s11627_s4 = inlined_call_operand.vmem [shape: f32[1824,49], index: 4, kind: output, shape index: {}, may-alias: {3,4}]  }
   0x1   :  { %v245_v0 = vld [vmem:[%s11623_s0] sm:$0xff]  ;;  %v246_v1 = vld [vmem:[%s11623_s0 + $0x8] sm:$0xff]  ;;  %v247_v2 = vld [vmem:[%s11623_s0 + $0x10] sm:$0xff] }
   0x2   :  { %v6631_v3 = vpack.c.bf16 %v246_v1, %v245_v0  ;;  %v248_v4 = vld [vmem:[%s11623_s0 + $0x18] sm:$0xff]  ;;  %v249_v6 = vld [vmem:[%s11623_s0 + $0x20] sm:$0xff]  ;;  %v250_v7 = vld [vmem:[%s11623_s0 + $0x28] sm:$0xff] }
   0x3   :  { %v6635_v5 = vpack.c.bf16 %v248_v4, %v247_v2  ;;  %v17_v8 = vld [vmem:[%s11624_s1] sm:$0xff]  ;;  %v131_v9 = vld [vmem:[%s11624_s1 + $0x390] sm:$0xff]  ;;  %v6639_v10 = vpack.c.bf16 %v250_v7, %v249_v6  ;;  %v252_v12 = vld [vmem:[%s11623_s0 + $0x38] sm:$0xff] }
   0x4   :  { %6632 = vmatprep.subr.bf16.mxu0 %v6631_v3  ;;  %6653 = vmatprep.subr.bf16.mxu1 %v6631_v3  ;;  %v251_v11 = vld [vmem:[%s11623_s0 + $0x30] sm:$0xff]  ;;  %v253_v14 = vld [vmem:[%s11623_s0 + $0x40] sm:$0xff]  ;;  %v254_v15 = vld [vmem:[%s11623_s0 + $0x48] sm:$0xf] }
   0x5   :  { %6634 = vmatpush3.bf16.msra.mxu0 %v6631_v3  ;;  %6658 = vmatpush3.bf16.msra.mxu1 %v6631_v3  ;;  %v6643_v13 = vpack.c.bf16 %v252_v12, %v251_v11  ;;  %v6647_v16 = vpack.c.bf16 %v254_v15, %v253_v14  ;;  %vm6648_vm3 = vmpackc.low %vm1168_vm1, %vm7579_vm2  ;;  %v18_v17 = vld [vmem:[%s11624_s1 + $0x8] sm:$0xff]  ;;  %v132_v18 = vld [vmem:[%s11624_s1 + $0x398] sm:$0xff] }
   0x6   :  { %6636 = vmatprep.subr.bf16.mxu0 %v6635_v5  ;;  %6654 = vmatprep.subr.bf16.mxu1 %v6635_v5  ;;  %v19_v19 = vld [vmem:[%s11624_s1 + $0x10] sm:$0xff]  ;;  %v133_v20 = vld [vmem:[%s11624_s1 + $0x3a0] sm:$0xff]  ;;  %v20_v21 = vld [vmem:[%s11624_s1 + $0x18] sm:$0xff] }
   0x7   :  { %6289 = vmatprep.mubr.msk.f32.mxu0 %vm483_vm0, %v17_v8  ;;  %6460 = vmatprep.mubr.msk.f32.mxu1 %vm483_vm0, %v131_v9  ;;  %v134_v22 = vld [vmem:[%s11624_s1 + $0x3a8] sm:$0xff]  ;;  %v21_v23 = vld [vmem:[%s11624_s1 + $0x20] sm:$0xff]  ;;  %v135_v24 = vld [vmem:[%s11624_s1 + $0x3b0] sm:$0xff] }
   0x8   :  { %v22_v25 = vld [vmem:[%s11624_s1 + $0x28] sm:$0xff]  ;;  %v136_v26 = vld [vmem:[%s11624_s1 + $0x3b8] sm:$0xff]  ;;  %v23_v27 = vld [vmem:[%s11624_s1 + $0x30] sm:$0xff] }
   0x9   :  { %6638 = vmatpush3.bf16.msra.mxu0 %v6635_v5  ;;  %6659 = vmatpush3.bf16.msra.mxu1 %v6635_v5  ;;  %v137_v28 = vld [vmem:[%s11624_s1 + $0x3c0] sm:$0xff]  ;;  %v24_v29 = vld [vmem:[%s11624_s1 + $0x38] sm:$0xff]  ;;  %v138_v30 = vld [vmem:[%s11624_s1 + $0x3c8] sm:$0xff] }
   0xa   :  { %6640 = vmatprep.subr.bf16.mxu0 %v6639_v10  ;;  %6655 = vmatprep.subr.bf16.mxu1 %v6639_v10  ;;  %v25_v31 = vld [vmem:[%s11624_s1 + $0x40] sm:$0xff]  ;;  %v139_v32 = vld [vmem:[%s11624_s1 + $0x3d0] sm:$0xff]  ;;  %v26_v33 = vld [vmem:[%s11624_s1 + $0x48] sm:$0xff] }
   0xb   :  { %v140_v34 = vld [vmem:[%s11624_s1 + $0x3d8] sm:$0xff]  ;;  %v27_v35 = vld [vmem:[%s11624_s1 + $0x50] sm:$0xff]  ;;  %v141_v36 = vld [vmem:[%s11624_s1 + $0x3e0] sm:$0xff] }
   0xc   :  { %v28_v37 = vld [vmem:[%s11624_s1 + $0x58] sm:$0xff]  ;;  %v142_v38 = vld [vmem:[%s11624_s1 + $0x3e8] sm:$0xff]  ;;  %v29_v39 = vld [vmem:[%s11624_s1 + $0x60] sm:$0xff] }
   0xd   :  { %6642 = vmatpush3.bf16.msra.mxu0 %v6639_v10  ;;  %6660 = vmatpush3.bf16.msra.mxu1 %v6639_v10  ;;  %v143_v40 = vld [vmem:[%s11624_s1 + $0x3f0] sm:$0xff]  ;;  %v30_v41 = vld [vmem:[%s11624_s1 + $0x68] sm:$0xff]  ;;  %v144_v42 = vld [vmem:[%s11624_s1 + $0x3f8] sm:$0xff] }
   0xe   :  { %6644 = vmatprep.subr.bf16.mxu0 %v6643_v13  ;;  %6656 = vmatprep.subr.bf16.mxu1 %v6643_v13  ;;  %v31_v43 = vld [vmem:[%s11624_s1 + $0x70] sm:$0xff]  ;;  %v145_v44 = vld [vmem:[%s11624_s1 + $0x400] sm:$0xff]  ;;  %v32_v45 = vld [vmem:[%s11624_s1 + $0x78] sm:$0xff] }
   0xf   :  { %v146_v46 = vld [vmem:[%s11624_s1 + $0x408] sm:$0xff]  ;;  %v33_v47 = vld [vmem:[%s11624_s1 + $0x80] sm:$0xff]  ;;  %v147_v48 = vld [vmem:[%s11624_s1 + $0x410] sm:$0xff] }
  0x10   :  { %v34_v49 = vld [vmem:[%s11624_s1 + $0x88] sm:$0xff]  ;;  %v148_v50 = vld [vmem:[%s11624_s1 + $0x418] sm:$0xff]  ;;  %v35_v51 = vld [vmem:[%s11624_s1 + $0x90] sm:$0xff] }
  0x11   :  { %6646 = vmatpush3.bf16.msra.mxu0 %v6643_v13  ;;  %6661 = vmatpush3.bf16.msra.mxu1 %v6643_v13  ;;  %v149_v52 = vld [vmem:[%s11624_s1 + $0x420] sm:$0xff]  ;;  %v36_v53 = vld [vmem:[%s11624_s1 + $0x98] sm:$0xff]  ;;  %v150_v54 = vld [vmem:[%s11624_s1 + $0x428] sm:$0xff] }
  0x12   :  { %6649 = vmatprep.subr.msk.bf16.mxu0 %vm6648_vm3, %v6647_v16  ;;  %6657 = vmatprep.subr.msk.bf16.mxu1 %vm6648_vm3, %v6647_v16  ;;  %v37_v55 = vld [vmem:[%s11624_s1 + $0xa0] sm:$0xff]  ;;  %v151_v56 = vld [vmem:[%s11624_s1 + $0x430] sm:$0xff]  ;;  %v38_v57 = vld [vmem:[%s11624_s1 + $0xa8] sm:$0xff] }
  0x13   :  { %v152_v58 = vld [vmem:[%s11624_s1 + $0x438] sm:$0xff]  ;;  %v39_v59 = vld [vmem:[%s11624_s1 + $0xb0] sm:$0xff]  ;;  %v153_v60 = vld [vmem:[%s11624_s1 + $0x440] sm:$0xff] }
  0x14   :  { %v40_v61 = vld [vmem:[%s11624_s1 + $0xb8] sm:$0xff]  ;;  %v154_v62 = vld [vmem:[%s11624_s1 + $0x448] sm:$0xff]  ;;  %v41_v63 = vld [vmem:[%s11624_s1 + $0xc0] sm:$0xff] }
  0x15   :  { %6652 = vmatpush3.bf16.msk.msra.mxu0 %vm6648_vm3, %v6647_v16  ;;  %6662 = vmatpush3.bf16.msk.msra.mxu1 %vm6648_vm3, %v6647_v16  ;;  %v155_v0 = vld [vmem:[%s11624_s1 + $0x450] sm:$0xff]  ;;  %v42_v1 = vld [vmem:[%s11624_s1 + $0xc8] sm:$0xff]  ;;  %v156_v2 = vld [vmem:[%s11624_s1 + $0x458] sm:$0xff] }
  0x16   :  { %v43_v3 = vld [vmem:[%s11624_s1 + $0xd0] sm:$0xff]  ;;  %v157_v4 = vld [vmem:[%s11624_s1 + $0x460] sm:$0xff]  ;;  %v44_v5 = vld [vmem:[%s11624_s1 + $0xd8] sm:$0xff] }
  0x17   :  { %v158_v6 = vld [vmem:[%s11624_s1 + $0x468] sm:$0xff]  ;;  %v45_v7 = vld [vmem:[%s11624_s1 + $0xe0] sm:$0xff]  ;;  %v159_v8 = vld [vmem:[%s11624_s1 + $0x470] sm:$0xff] }
  0x18   :  { %6290 = vmatmul.mubr.msk.f32.vlgmr.msra.gmra.mrb[0].mxu0 %vm483_vm0, %v18_v17  ;;  %6461 = vmatmul.mubr.msk.f32.vlgmr.msra.gmra.mrb[0].mxu1 %vm483_vm0, %v132_v18  ;;  %v46_v9 = vld [vmem:[%s11624_s1 + $0xe8] sm:$0xff]  ;;  %v160_v10 = vld [vmem:[%s11624_s1 + $0x478] sm:$0xff]  ;;  %v47_v11 = vld [vmem:[%s11624_s1 + $0xf0] sm:$0xff] }
  0x19   :  { %6292 = vmatprep.mubr.msk.f32.mxu0 %vm483_vm0, %v19_v19  ;;  %6463 = vmatprep.mubr.msk.f32.mxu1 %vm483_vm0, %v133_v20  ;;  %v161_v12 = vld [vmem:[%s11624_s1 + $0x480] sm:$0xff]  ;;  %v48_v13 = vld [vmem:[%s11624_s1 + $0xf8] sm:$0xff]  ;;  %v162_v14 = vld [vmem:[%s11624_s1 + $0x488] sm:$0xff] }
  0x1a   :  { %v49_v15 = vld [vmem:[%s11624_s1 + $0x100] sm:$0xff]  ;;  %v163_v16 = vld [vmem:[%s11624_s1 + $0x490] sm:$0xff]  ;;  %v50_v17 = vld [vmem:[%s11624_s1 + $0x108] sm:$0xff] }
  0x1b   :  { %v164_v18 = vld [vmem:[%s11624_s1 + $0x498] sm:$0xff]  ;;  %v51_v19 = vld [vmem:[%s11624_s1 + $0x110] sm:$0xff]  ;;  %v165_v20 = vld [vmem:[%s11624_s1 + $0x4a0] sm:$0xff] }
  0x1c   :  { %6293 = vmatmul.mubr.msk.f32.gmra.mrb[2].mxu0 %vm483_vm0, %v20_v21  ;;  %6464 = vmatmul.mubr.msk.f32.gmra.mrb[2].mxu1 %vm483_vm0, %v134_v22  ;;  %v52_v21 = vld [vmem:[%s11624_s1 + $0x118] sm:$0xff]  ;;  %v166_v22 = vld [vmem:[%s11624_s1 + $0x4a8] sm:$0xff] }
  0x1d   :  { %6295 = vmatprep.mubr.msk.f32.mxu0 %vm483_vm0, %v21_v23  ;;  %6466 = vmatprep.mubr.msk.f32.mxu1 %vm483_vm0, %v135_v24  ;;  %v53_v23 = vld [vmem:[%s11624_s1 + $0x120] sm:$0xff]  ;;  %v167_v24 = vld [vmem:[%s11624_s1 + $0x4b0] sm:$0xff] }
  0x20   :  { %6296 = vmatmul.mubr.msk.f32.gmra.mrb[4].mxu0 %vm483_vm0, %v22_v25  ;;  %6467 = vmatmul.mubr.msk.f32.gmra.mrb[4].mxu1 %vm483_vm0, %v136_v26  ;;  %v54_v25 = vld [vmem:[%s11624_s1 + $0x128] sm:$0xff]  ;;  %v168_v26 = vld [vmem:[%s11624_s1 + $0x4b8] sm:$0xff] }
  0x21   :  { %6298 = vmatprep.mubr.msk.f32.mxu0 %vm483_vm0, %v23_v27  ;;  %6469 = vmatprep.mubr.msk.f32.mxu1 %vm483_vm0, %v137_v28  ;;  %v55_v27 = vld [vmem:[%s11624_s1 + $0x130] sm:$0xff]  ;;  %v169_v28 = vld [vmem:[%s11624_s1 + $0x4c0] sm:$0xff] }
  0x24   :  { %6299 = vmatmul.mubr.msk.f32.gmra.mrb[6].mxu0 %vm483_vm0, %v24_v29  ;;  %6470 = vmatmul.mubr.msk.f32.gmra.mrb[6].mxu1 %vm483_vm0, %v138_v30  ;;  %v56_v29 = vld [vmem:[%s11624_s1 + $0x138] sm:$0xff]  ;;  %v170_v30 = vld [vmem:[%s11624_s1 + $0x4c8] sm:$0xff] }
  0x25   :  { %6301 = vmatprep.mubr.msk.f32.mxu0 %vm483_vm0, %v25_v31  ;;  %6472 = vmatprep.mubr.msk.f32.mxu1 %vm483_vm0, %v139_v32  ;;  %v57_v31 = vld [vmem:[%s11624_s1 + $0x140] sm:$0xff]  ;;  %v171_v32 = vld [vmem:[%s11624_s1 + $0x4d0] sm:$0xff] }
  0x28   :  { %6302 = vmatmul.mubr.msk.f32.gmra.mrb[8].mxu0 %vm483_vm0, %v26_v33  ;;  %6473 = vmatmul.mubr.msk.f32.gmra.mrb[8].mxu1 %vm483_vm0, %v140_v34  ;;  %v58_v33 = vld [vmem:[%s11624_s1 + $0x148] sm:$0xff]  ;;  %v172_v34 = vld [vmem:[%s11624_s1 + $0x4d8] sm:$0xff] }
  0x29   :  { %6304 = vmatprep.mubr.msk.f32.mxu0 %vm483_vm0, %v27_v35  ;;  %6475 = vmatprep.mubr.msk.f32.mxu1 %vm483_vm0, %v141_v36  ;;  %v59_v35 = vld [vmem:[%s11624_s1 + $0x150] sm:$0xff]  ;;  %v173_v36 = vld [vmem:[%s11624_s1 + $0x4e0] sm:$0xff] }
  0x2c   :  { %6305 = vmatmul.mubr.msk.f32.gmra.mrb[10].mxu0 %vm483_vm0, %v28_v37  ;;  %6476 = vmatmul.mubr.msk.f32.gmra.mrb[10].mxu1 %vm483_vm0, %v142_v38  ;;  %v60_v37 = vld [vmem:[%s11624_s1 + $0x158] sm:$0xff]  ;;  %v174_v38 = vld [vmem:[%s11624_s1 + $0x4e8] sm:$0xff] }
  0x2d   :  { %6307 = vmatprep.mubr.msk.f32.mxu0 %vm483_vm0, %v29_v39  ;;  %6478 = vmatprep.mubr.msk.f32.mxu1 %vm483_vm0, %v143_v40  ;;  %v61_v39 = vld [vmem:[%s11624_s1 + $0x160] sm:$0xff]  ;;  %v175_v40 = vld [vmem:[%s11624_s1 + $0x4f0] sm:$0xff] }
  0x30   :  { %6308 = vmatmul.mubr.msk.f32.gmra.mrb[12].mxu0 %vm483_vm0, %v30_v41  ;;  %6479 = vmatmul.mubr.msk.f32.gmra.mrb[12].mxu1 %vm483_vm0, %v144_v42  ;;  %v62_v41 = vld [vmem:[%s11624_s1 + $0x168] sm:$0xff]  ;;  %v176_v42 = vld [vmem:[%s11624_s1 + $0x4f8] sm:$0xff] }
  0x31   :  { %6310 = vmatprep.mubr.msk.f32.mxu0 %vm483_vm0, %v31_v43  ;;  %6481 = vmatprep.mubr.msk.f32.mxu1 %vm483_vm0, %v145_v44  ;;  %v63_v43 = vld [vmem:[%s11624_s1 + $0x170] sm:$0xff]  ;;  %v177_v44 = vld [vmem:[%s11624_s1 + $0x500] sm:$0xff] }
  0x34   :  { %6311 = vmatmul.mubr.msk.f32.gmra.mrb[14].mxu0 %vm483_vm0, %v32_v45  ;;  %6482 = vmatmul.mubr.msk.f32.gmra.mrb[14].mxu1 %vm483_vm0, %v146_v46  ;;  %v64_v45 = vld [vmem:[%s11624_s1 + $0x178] sm:$0xff]  ;;  %v178_v46 = vld [vmem:[%s11624_s1 + $0x508] sm:$0xff] }
  0x35   :  { %6313 = vmatprep.mubr.msk.f32.mxu0 %vm483_vm0, %v33_v47  ;;  %6484 = vmatprep.mubr.msk.f32.mxu1 %vm483_vm0, %v147_v48  ;;  %v65_v47 = vld [vmem:[%s11624_s1 + $0x180] sm:$0xff]  ;;  %v179_v48 = vld [vmem:[%s11624_s1 + $0x510] sm:$0xff] }
  0x38   :  { %6314 = vmatmul.mubr.msk.f32.gmra.mrb[16].mxu0 %vm483_vm0, %v34_v49  ;;  %6485 = vmatmul.mubr.msk.f32.gmra.mrb[16].mxu1 %vm483_vm0, %v148_v50  ;;  %v66_v49 = vld [vmem:[%s11624_s1 + $0x188] sm:$0xff]  ;;  %v180_v50 = vld [vmem:[%s11624_s1 + $0x518] sm:$0xff] }
  0x39   :  { %6316 = vmatprep.mubr.msk.f32.mxu0 %vm483_vm0, %v35_v51  ;;  %6487 = vmatprep.mubr.msk.f32.mxu1 %vm483_vm0, %v149_v52  ;;  %v67_v51 = vld [vmem:[%s11624_s1 + $0x190] sm:$0xff]  ;;  %v181_v52 = vld [vmem:[%s11624_s1 + $0x520] sm:$0xff] }
  0x3c   :  { %6317 = vmatmul.mubr.msk.f32.gmra.mrb[18].mxu0 %vm483_vm0, %v36_v53  ;;  %6488 = vmatmul.mubr.msk.f32.gmra.mrb[18].mxu1 %vm483_vm0, %v150_v54  ;;  %v68_v53 = vld [vmem:[%s11624_s1 + $0x198] sm:$0xff]  ;;  %v182_v54 = vld [vmem:[%s11624_s1 + $0x528] sm:$0xff] }
  0x3d   :  { %6319 = vmatprep.mubr.msk.f32.mxu0 %vm483_vm0, %v37_v55  ;;  %6490 = vmatprep.mubr.msk.f32.mxu1 %vm483_vm0, %v151_v56  ;;  %v69_v55 = vld [vmem:[%s11624_s1 + $0x1a0] sm:$0xff]  ;;  %v183_v56 = vld [vmem:[%s11624_s1 + $0x530] sm:$0xff] }
  0x40   :  { %6320 = vmatmul.mubr.msk.f32.gmra.mrb[20].mxu0 %vm483_vm0, %v38_v57  ;;  %6491 = vmatmul.mubr.msk.f32.gmra.mrb[20].mxu1 %vm483_vm0, %v152_v58  ;;  %v70_v57 = vld [vmem:[%s11624_s1 + $0x1a8] sm:$0xff]  ;;  %v184_v58 = vld [vmem:[%s11624_s1 + $0x538] sm:$0xff] }
  0x41   :  { %6322 = vmatprep.mubr.msk.f32.mxu0 %vm483_vm0, %v39_v59  ;;  %6493 = vmatprep.mubr.msk.f32.mxu1 %vm483_vm0, %v153_v60  ;;  %v71_v59 = vld [vmem:[%s11624_s1 + $0x1b0] sm:$0xff]  ;;  %v185_v60 = vld [vmem:[%s11624_s1 + $0x540] sm:$0xff] }
  0x44   :  { %6323 = vmatmul.mubr.msk.f32.gmra.mrb[22].mxu0 %vm483_vm0, %v40_v61  ;;  %6494 = vmatmul.mubr.msk.f32.gmra.mrb[22].mxu1 %vm483_vm0, %v154_v62  ;;  %v72_v61 = vld [vmem:[%s11624_s1 + $0x1b8] sm:$0xff]  ;;  %v186_v62 = vld [vmem:[%s11624_s1 + $0x548] sm:$0xff] }
  0x45   :  { %6325 = vmatprep.mubr.msk.f32.mxu0 %vm483_vm0, %v41_v63  ;;  %6496 = vmatprep.mubr.msk.f32.mxu1 %vm483_vm0, %v155_v0  ;;  %v73_v63 = vld [vmem:[%s11624_s1 + $0x1c0] sm:$0xff]  ;;  %v187_v0 = vld [vmem:[%s11624_s1 + $0x550] sm:$0xff] }
  0x48   :  { %6326 = vmatmul.mubr.msk.f32.gmra.mrb[24].mxu0 %vm483_vm0, %v42_v1  ;;  %6497 = vmatmul.mubr.msk.f32.gmra.mrb[24].mxu1 %vm483_vm0, %v156_v2  ;;  %v74_v1 = vld [vmem:[%s11624_s1 + $0x1c8] sm:$0xff]  ;;  %v188_v2 = vld [vmem:[%s11624_s1 + $0x558] sm:$0xff] }
  0x49   :  { %6328 = vmatprep.mubr.msk.f32.mxu0 %vm483_vm0, %v43_v3  ;;  %6499 = vmatprep.mubr.msk.f32.mxu1 %vm483_vm0, %v157_v4  ;;  %v75_v3 = vld [vmem:[%s11624_s1 + $0x1d0] sm:$0xff]  ;;  %v189_v4 = vld [vmem:[%s11624_s1 + $0x560] sm:$0xff] }
  0x4c   :  { %6329 = vmatmul.mubr.msk.f32.gmra.mrb[26].mxu0 %vm483_vm0, %v44_v5  ;;  %6500 = vmatmul.mubr.msk.f32.gmra.mrb[26].mxu1 %vm483_vm0, %v158_v6  ;;  %v76_v5 = vld [vmem:[%s11624_s1 + $0x1d8] sm:$0xff]  ;;  %v190_v6 = vld [vmem:[%s11624_s1 + $0x568] sm:$0xff] }
  0x4d   :  { %6331 = vmatprep.mubr.msk.f32.mxu0 %vm483_vm0, %v45_v7  ;;  %6502 = vmatprep.mubr.msk.f32.mxu1 %vm483_vm0, %v159_v8  ;;  %v77_v7 = vld [vmem:[%s11624_s1 + $0x1e0] sm:$0xff]  ;;  %v7580_v8 = vmov 0  }
  0x4e   :  { %6666 = vset.pattern.permute.xlu1 %v7580_v8  ;;  %6665 = vset.pattern.permute.xlu0 %v7580_v8  ;;  %v258_v8 = vld [vmem:[%s11625_s2 + $0x18] sm:$0xff] }
  0x50   :  { %6332 = vmatmul.mubr.msk.f32.gmra.mrb[28].mxu0 %vm483_vm0, %v46_v9  ;;  %6503 = vmatmul.mubr.msk.f32.gmra.mrb[28].mxu1 %vm483_vm0, %v160_v10  ;;  %v191_v9 = vld [vmem:[%s11624_s1 + $0x570] sm:$0xff]  ;;  %v78_v10 = vld [vmem:[%s11624_s1 + $0x1e8] sm:$0xff] }
  0x51   :  { %6334 = vmatprep.mubr.msk.f32.mxu0 %vm483_vm0, %v47_v11  ;;  %6505 = vmatprep.mubr.msk.f32.mxu1 %vm483_vm0, %v161_v12  ;;  %v192_v11 = vld [vmem:[%s11624_s1 + $0x578] sm:$0xff]  ;;  %v79_v12 = vld [vmem:[%s11624_s1 + $0x1f0] sm:$0xff] }
  0x54   :  { %6335 = vmatmul.mubr.msk.f32.gmra.mrb[30].mxu0 %vm483_vm0, %v48_v13  ;;  %6506 = vmatmul.mubr.msk.f32.gmra.mrb[30].mxu1 %vm483_vm0, %v162_v14  ;;  %v80_v13 = vld [vmem:[%s11624_s1 + $0x1f8] sm:$0xff]  ;;  %v193_v14 = vld [vmem:[%s11624_s1 + $0x580] sm:$0xff] }
  0x55   :  { %6337 = vmatprep.mubr.msk.f32.mxu0 %vm483_vm0, %v49_v15  ;;  %6508 = vmatprep.mubr.msk.f32.mxu1 %vm483_vm0, %v163_v16  ;;  %v194_v15 = vld [vmem:[%s11624_s1 + $0x588] sm:$0xff]  ;;  %v81_v16 = vld [vmem:[%s11624_s1 + $0x200] sm:$0xff] }
  0x58   :  { %6338 = vmatmul.mubr.msk.f32.gmra.mrb[32].mxu0 %vm483_vm0, %v50_v17  ;;  %6509 = vmatmul.mubr.msk.f32.gmra.mrb[32].mxu1 %vm483_vm0, %v164_v18  ;;  %v82_v17 = vld [vmem:[%s11624_s1 + $0x208] sm:$0xff]  ;;  %v195_v18 = vld [vmem:[%s11624_s1 + $0x590] sm:$0xff] }
  0x59   :  { %6340 = vmatprep.mubr.msk.f32.mxu0 %vm483_vm0, %v51_v19  ;;  %6511 = vmatprep.mubr.msk.f32.mxu1 %vm483_vm0, %v165_v20  ;;  %v196_v19 = vld [vmem:[%s11624_s1 + $0x598] sm:$0xff]  ;;  %v83_v20 = vld [vmem:[%s11624_s1 + $0x210] sm:$0xff] }
  0x5c   :  { %6341 = vmatmul.mubr.msk.f32.gmra.mrb[34].mxu0 %vm483_vm0, %v52_v21  ;;  %6512 = vmatmul.mubr.msk.f32.gmra.mrb[34].mxu1 %vm483_vm0, %v166_v22  ;;  %v84_v21 = vld [vmem:[%s11624_s1 + $0x218] sm:$0xff]  ;;  %v197_v22 = vld [vmem:[%s11624_s1 + $0x5a0] sm:$0xff] }
  0x5d   :  { %6343 = vmatprep.mubr.msk.f32.mxu0 %vm483_vm0, %v53_v23  ;;  %6514 = vmatprep.mubr.msk.f32.mxu1 %vm483_vm0, %v167_v24  ;;  %v198_v23 = vld [vmem:[%s11624_s1 + $0x5a8] sm:$0xff]  ;;  %v85_v24 = vld [vmem:[%s11624_s1 + $0x220] sm:$0xff] }
  0x60   :  { %6344 = vmatmul.mubr.msk.f32.gmra.mrb[36].mxu0 %vm483_vm0, %v54_v25  ;;  %6515 = vmatmul.mubr.msk.f32.gmra.mrb[36].mxu1 %vm483_vm0, %v168_v26  ;;  %v86_v25 = vld [vmem:[%s11624_s1 + $0x228] sm:$0xff]  ;;  %v199_v26 = vld [vmem:[%s11624_s1 + $0x5b0] sm:$0xff] }
  0x61   :  { %6346 = vmatprep.mubr.msk.f32.mxu0 %vm483_vm0, %v55_v27  ;;  %6517 = vmatprep.mubr.msk.f32.mxu1 %vm483_vm0, %v169_v28  ;;  %v200_v27 = vld [vmem:[%s11624_s1 + $0x5b8] sm:$0xff]  ;;  %v87_v28 = vld [vmem:[%s11624_s1 + $0x230] sm:$0xff] }
  0x64   :  { %6347 = vmatmul.mubr.msk.f32.gmra.mrb[38].mxu0 %vm483_vm0, %v56_v29  ;;  %6518 = vmatmul.mubr.msk.f32.gmra.mrb[38].mxu1 %vm483_vm0, %v170_v30  ;;  %v88_v29 = vld [vmem:[%s11624_s1 + $0x238] sm:$0xff]  ;;  %v201_v30 = vld [vmem:[%s11624_s1 + $0x5c0] sm:$0xff] }
  0x65   :  { %6349 = vmatprep.mubr.msk.f32.mxu0 %vm483_vm0, %v57_v31  ;;  %6520 = vmatprep.mubr.msk.f32.mxu1 %vm483_vm0, %v171_v32  ;;  %v202_v31 = vld [vmem:[%s11624_s1 + $0x5c8] sm:$0xff]  ;;  %v89_v32 = vld [vmem:[%s11624_s1 + $0x240] sm:$0xff] }
  0x68   :  { %6350 = vmatmul.mubr.msk.f32.gmra.mrb[40].mxu0 %vm483_vm0, %v58_v33  ;;  %6521 = vmatmul.mubr.msk.f32.gmra.mrb[40].mxu1 %vm483_vm0, %v172_v34  ;;  %v90_v33 = vld [vmem:[%s11624_s1 + $0x248] sm:$0xff]  ;;  %v203_v34 = vld [vmem:[%s11624_s1 + $0x5d0] sm:$0xff] }
  0x69   :  { %6352 = vmatprep.mubr.msk.f32.mxu0 %vm483_vm0, %v59_v35  ;;  %6523 = vmatprep.mubr.msk.f32.mxu1 %vm483_vm0, %v173_v36  ;;  %v204_v35 = vld [vmem:[%s11624_s1 + $0x5d8] sm:$0xff]  ;;  %v91_v36 = vld [vmem:[%s11624_s1 + $0x250] sm:$0xff] }
  0x6c   :  { %6353 = vmatmul.mubr.msk.f32.gmra.mrb[42].mxu0 %vm483_vm0, %v60_v37  ;;  %6524 = vmatmul.mubr.msk.f32.gmra.mrb[42].mxu1 %vm483_vm0, %v174_v38  ;;  %v92_v37 = vld [vmem:[%s11624_s1 + $0x258] sm:$0xff]  ;;  %v205_v38 = vld [vmem:[%s11624_s1 + $0x5e0] sm:$0xff] }
  0x6d   :  { %6355 = vmatprep.mubr.msk.f32.mxu0 %vm483_vm0, %v61_v39  ;;  %6526 = vmatprep.mubr.msk.f32.mxu1 %vm483_vm0, %v175_v40  ;;  %v206_v39 = vld [vmem:[%s11624_s1 + $0x5e8] sm:$0xff]  ;;  %v93_v40 = vld [vmem:[%s11624_s1 + $0x260] sm:$0xff] }
  0x70   :  { %6356 = vmatmul.mubr.msk.f32.gmra.mrb[44].mxu0 %vm483_vm0, %v62_v41  ;;  %6527 = vmatmul.mubr.msk.f32.gmra.mrb[44].mxu1 %vm483_vm0, %v176_v42  ;;  %v94_v41 = vld [vmem:[%s11624_s1 + $0x268] sm:$0xff]  ;;  %v207_v42 = vld [vmem:[%s11624_s1 + $0x5f0] sm:$0xff] }
  0x71   :  { %6358 = vmatprep.mubr.msk.f32.mxu0 %vm483_vm0, %v63_v43  ;;  %6529 = vmatprep.mubr.msk.f32.mxu1 %vm483_vm0, %v177_v44  ;;  %v208_v43 = vld [vmem:[%s11624_s1 + $0x5f8] sm:$0xff]  ;;  %v95_v44 = vld [vmem:[%s11624_s1 + $0x270] sm:$0xff] }
  0x74   :  { %6359 = vmatmul.mubr.msk.f32.gmra.mrb[46].mxu0 %vm483_vm0, %v64_v45  ;;  %6530 = vmatmul.mubr.msk.f32.gmra.mrb[46].mxu1 %vm483_vm0, %v178_v46  ;;  %v96_v45 = vld [vmem:[%s11624_s1 + $0x278] sm:$0xff]  ;;  %v209_v46 = vld [vmem:[%s11624_s1 + $0x600] sm:$0xff] }
  0x75   :  { %6361 = vmatprep.mubr.msk.f32.mxu0 %vm483_vm0, %v65_v47  ;;  %6532 = vmatprep.mubr.msk.f32.mxu1 %vm483_vm0, %v179_v48  ;;  %v210_v47 = vld [vmem:[%s11624_s1 + $0x608] sm:$0xff]  ;;  %v97_v48 = vld [vmem:[%s11624_s1 + $0x280] sm:$0xff] }
  0x78   :  { %6362 = vmatmul.mubr.msk.f32.gmra.mrb[48].mxu0 %vm483_vm0, %v66_v49  ;;  %6533 = vmatmul.mubr.msk.f32.gmra.mrb[48].mxu1 %vm483_vm0, %v180_v50  ;;  %v98_v49 = vld [vmem:[%s11624_s1 + $0x288] sm:$0xff]  ;;  %v211_v50 = vld [vmem:[%s11624_s1 + $0x610] sm:$0xff] }
  0x79   :  { %6364 = vmatprep.mubr.msk.f32.mxu0 %vm483_vm0, %v67_v51  ;;  %6535 = vmatprep.mubr.msk.f32.mxu1 %vm483_vm0, %v181_v52  ;;  %v212_v51 = vld [vmem:[%s11624_s1 + $0x618] sm:$0xff]  ;;  %v99_v52 = vld [vmem:[%s11624_s1 + $0x290] sm:$0xff] }
  0x7c   :  { %6365 = vmatmul.mubr.msk.f32.gmra.mrb[50].mxu0 %vm483_vm0, %v68_v53  ;;  %6536 = vmatmul.mubr.msk.f32.gmra.mrb[50].mxu1 %vm483_vm0, %v182_v54  ;;  %v100_v53 = vld [vmem:[%s11624_s1 + $0x298] sm:$0xff]  ;;  %v213_v54 = vld [vmem:[%s11624_s1 + $0x620] sm:$0xff] }
  0x7d   :  { %6367 = vmatprep.mubr.msk.f32.mxu0 %vm483_vm0, %v69_v55  ;;  %6538 = vmatprep.mubr.msk.f32.mxu1 %vm483_vm0, %v183_v56  ;;  %v214_v55 = vld [vmem:[%s11624_s1 + $0x628] sm:$0xff]  ;;  %v101_v56 = vld [vmem:[%s11624_s1 + $0x2a0] sm:$0xff] }
  0x80   :  { %6368 = vmatmul.mubr.msk.f32.gmra.mrb[52].mxu0 %vm483_vm0, %v70_v57  ;;  %6539 = vmatmul.mubr.msk.f32.gmra.mrb[52].mxu1 %vm483_vm0, %v184_v58  ;;  %v102_v57 = vld [vmem:[%s11624_s1 + $0x2a8] sm:$0xff] }
  0x81   :  { %6370 = vmatprep.mubr.msk.f32.mxu0 %vm483_vm0, %v71_v59  ;;  %6541 = vmatprep.mubr.msk.f32.mxu1 %vm483_vm0, %v185_v60  ;;  %v256_v58 = vld [vmem:[%s11625_s2 + $0x8] sm:$0xff]  ;;  %v370_v59 = vld [vmem:[%s11625_s2 + $0x398] sm:$0xff]  ;;  %v255_v60 = vld [vmem:[%s11625_s2] sm:$0xff] }
  0x84   :  { %6371 = vmatmul.mubr.msk.f32.gmra.mrb[54].mxu0 %vm483_vm0, %v72_v61  ;;  %6542 = vmatmul.mubr.msk.f32.gmra.mrb[54].mxu1 %vm483_vm0, %v186_v62  ;;  %v369_v61 = vld [vmem:[%s11625_s2 + $0x390] sm:$0xff] }
  0x85   :  { %6373 = vmatprep.mubr.msk.f32.mxu0 %vm483_vm0, %v73_v63  ;;  %6544 = vmatprep.mubr.msk.f32.mxu1 %vm483_vm0, %v187_v0  ;;  %v215_v0 = vld [vmem:[%s11624_s1 + $0x630] sm:$0xff] }
  0x88   :  { %6374 = vmatmul.mubr.msk.f32.gmra.mrb[56].mxu0 %vm483_vm0, %v74_v1  ;;  %6545 = vmatmul.mubr.msk.f32.gmra.mrb[56].mxu1 %vm483_vm0, %v188_v2 }
  0x89   :  { %6376 = vmatprep.mubr.msk.f32.mxu0 %vm483_vm0, %v75_v3  ;;  %6547 = vmatprep.mubr.msk.f32.mxu1 %vm483_vm0, %v189_v4 }
  0x8c   :  { %6377 = vmatmul.mubr.msk.f32.gmra.mrb[58].mxu0 %vm483_vm0, %v76_v5  ;;  %6548 = vmatmul.mubr.msk.f32.gmra.mrb[58].mxu1 %vm483_vm0, %v190_v6  ;;  %v216_v5 = vld [vmem:[%s11624_s1 + $0x638] sm:$0xff] }
  0x8d   :  { %6379 = vmatprep.mubr.msk.f32.mxu0 %vm483_vm0, %v77_v7  ;;  %6550 = vmatprep.mubr.msk.f32.mxu1 %vm483_vm0, %v191_v9  ;;  %v372_v9 = vld [vmem:[%s11625_s2 + $0x3a8] sm:$0xff] }
  0x90   :  { %6380 = vmatmul.mubr.msk.f32.gmra.mrb[60].mxu0 %vm483_vm0, %v78_v10  ;;  %6551 = vmatmul.mubr.msk.f32.gmra.mrb[60].mxu1 %vm483_vm0, %v192_v11 }
  0x91   :  { %6382 = vmatprep.mubr.msk.f32.mxu0 %vm483_vm0, %v79_v12  ;;  %6553 = vmatprep.mubr.msk.f32.mxu1 %vm483_vm0, %v193_v14  ;;  %v257_v12 = vld [vmem:[%s11625_s2 + $0x10] sm:$0xff] }
  0x94   :  { %6383 = vmatmul.mubr.msk.f32.gmra.mrb[62].mxu0 %vm483_vm0, %v80_v13  ;;  %6554 = vmatmul.mubr.msk.f32.gmra.mrb[62].mxu1 %vm483_vm0, %v194_v15  ;;  %v371_v13 = vld [vmem:[%s11625_s2 + $0x3a0] sm:$0xff] }
  0x95   :  { %6385 = vmatprep.mubr.msk.f32.mxu0 %vm483_vm0, %v81_v16  ;;  %6556 = vmatprep.mubr.msk.f32.mxu1 %vm483_vm0, %v195_v18 }
  0x98   :  { %6386 = vmatmul.mubr.msk.f32.gmra.mrb[64].mxu0 %vm483_vm0, %v82_v17  ;;  %6557 = vmatmul.mubr.msk.f32.gmra.mrb[64].mxu1 %vm483_vm0, %v196_v19 }
  0x99   :  { %6388 = vmatprep.mubr.msk.f32.mxu0 %vm483_vm0, %v83_v20  ;;  %6559 = vmatprep.mubr.msk.f32.mxu1 %vm483_vm0, %v197_v22  ;;  %v103_v22 = vld [vmem:[%s11624_s1 + $0x2b0] sm:$0xff] }
  0x9c   :  { %6389 = vmatmul.mubr.msk.f32.gmra.mrb[66].mxu0 %vm483_vm0, %v84_v21  ;;  %6560 = vmatmul.mubr.msk.f32.gmra.mrb[66].mxu1 %vm483_vm0, %v198_v23  ;;  %v104_v23 = vld [vmem:[%s11624_s1 + $0x2b8] sm:$0xff] }
  0x9d   :  { %6391 = vmatprep.mubr.msk.f32.mxu0 %vm483_vm0, %v85_v24  ;;  %6562 = vmatprep.mubr.msk.f32.mxu1 %vm483_vm0, %v199_v26  ;;  %v260_v26 = vld [vmem:[%s11625_s2 + $0x28] sm:$0xff] }
  0xa0   :  { %6392 = vmatmul.mubr.msk.f32.gmra.mrb[68].mxu0 %vm483_vm0, %v86_v25  ;;  %6563 = vmatmul.mubr.msk.f32.gmra.mrb[68].mxu1 %vm483_vm0, %v200_v27  ;;  %v374_v27 = vld [vmem:[%s11625_s2 + $0x3b8] sm:$0xff] }
  0xa1   :  { %6394 = vmatprep.mubr.msk.f32.mxu0 %vm483_vm0, %v87_v28  ;;  %6565 = vmatprep.mubr.msk.f32.mxu1 %vm483_vm0, %v201_v30  ;;  %v259_v30 = vld [vmem:[%s11625_s2 + $0x20] sm:$0xff] }
  0xa4   :  { %6395 = vmatmul.mubr.msk.f32.gmra.mrb[70].mxu0 %vm483_vm0, %v88_v29  ;;  %6566 = vmatmul.mubr.msk.f32.gmra.mrb[70].mxu1 %vm483_vm0, %v202_v31  ;;  %v373_v31 = vld [vmem:[%s11625_s2 + $0x3b0] sm:$0xff] }
  0xa5   :  { %6397 = vmatprep.mubr.msk.f32.mxu0 %vm483_vm0, %v89_v32  ;;  %6568 = vmatprep.mubr.msk.f32.mxu1 %vm483_vm0, %v203_v34 }
  0xa8   :  { %6398 = vmatmul.mubr.msk.f32.gmra.mrb[72].mxu0 %vm483_vm0, %v90_v33  ;;  %6569 = vmatmul.mubr.msk.f32.gmra.mrb[72].mxu1 %vm483_vm0, %v204_v35 }
  0xa9   :  { %6400 = vmatprep.mubr.msk.f32.mxu0 %vm483_vm0, %v91_v36  ;;  %6571 = vmatprep.mubr.msk.f32.mxu1 %vm483_vm0, %v205_v38 }
  0xac   :  { %6401 = vmatmul.mubr.msk.f32.gmra.mrb[74].mxu0 %vm483_vm0, %v92_v37  ;;  %6572 = vmatmul.mubr.msk.f32.gmra.mrb[74].mxu1 %vm483_vm0, %v206_v39 }
  0xad   :  { %6403 = vmatprep.mubr.msk.f32.mxu0 %vm483_vm0, %v93_v40  ;;  %6574 = vmatprep.mubr.msk.f32.mxu1 %vm483_vm0, %v207_v42  ;;  %v217_v40 = vld [vmem:[%s11624_s1 + $0x640] sm:$0xff] }
  0xb0   :  { %6404 = vmatmul.mubr.msk.f32.gmra.mrb[76].mxu0 %vm483_vm0, %v94_v41  ;;  %6575 = vmatmul.mubr.msk.f32.gmra.mrb[76].mxu1 %vm483_vm0, %v208_v43  ;;  %v218_v41 = vld [vmem:[%s11624_s1 + $0x648] sm:$0xff] }
  0xb1   :  { %6406 = vmatprep.mubr.msk.f32.mxu0 %vm483_vm0, %v95_v44  ;;  %6577 = vmatprep.mubr.msk.f32.mxu1 %vm483_vm0, %v209_v46  ;;  %v262_v44 = vld [vmem:[%s11625_s2 + $0x38] sm:$0xff] }
  0xb4   :  { %6407 = vmatmul.mubr.msk.f32.gmra.mrb[78].mxu0 %vm483_vm0, %v96_v45  ;;  %6578 = vmatmul.mubr.msk.f32.gmra.mrb[78].mxu1 %vm483_vm0, %v210_v47 }
  0xb5   :  { %6409 = vmatprep.mubr.msk.f32.mxu0 %vm483_vm0, %v97_v48  ;;  %6580 = vmatprep.mubr.msk.f32.mxu1 %vm483_vm0, %v211_v50 }
  0xb8   :  { %6410 = vmatmul.mubr.msk.f32.gmra.mrb[80].mxu0 %vm483_vm0, %v98_v49  ;;  %6581 = vmatmul.mubr.msk.f32.gmra.mrb[80].mxu1 %vm483_vm0, %v212_v51 }
  0xb9   :  { %6412 = vmatprep.mubr.msk.f32.mxu0 %vm483_vm0, %v99_v52  ;;  %6583 = vmatprep.mubr.msk.f32.mxu1 %vm483_vm0, %v213_v54  ;;  %v105_v54 = vld [vmem:[%s11624_s1 + $0x2c0] sm:$0xff] }
  0xbc   :  { %6413 = vmatmul.mubr.msk.f32.gmra.mrb[82].mxu0 %vm483_vm0, %v100_v53  ;;  %6584 = vmatmul.mubr.msk.f32.gmra.mrb[82].mxu1 %vm483_vm0, %v214_v55  ;;  %v106_v55 = vld [vmem:[%s11624_s1 + $0x2c8] sm:$0xff] }
  0xbd   :  { %6415 = vmatprep.mubr.msk.f32.mxu0 %vm483_vm0, %v101_v56  ;;  %6586 = vmatprep.mubr.msk.f32.mxu1 %vm483_vm0, %v215_v0 }
  0xc0   :  { %6416 = vmatmul.mubr.msk.f32.gmra.mrb[84].mxu0 %vm483_vm0, %v102_v57  ;;  %6587 = vmatmul.mubr.msk.f32.gmra.mrb[84].mxu1 %vm483_vm0, %v216_v5 }
  0xc1   :  { %6418 = vmatprep.mubr.msk.f32.mxu0 %vm483_vm0, %v103_v22  ;;  %6589 = vmatprep.mubr.msk.f32.mxu1 %vm483_vm0, %v217_v40  ;;  %v108_v22 = vld [vmem:[%s11624_s1 + $0x2d8] sm:$0xff] }
  0xc4   :  { %6419 = vmatmul.mubr.msk.f32.gmra.mrb[86].mxu0 %vm483_vm0, %v104_v23  ;;  %6590 = vmatmul.mubr.msk.f32.gmra.mrb[86].mxu1 %vm483_vm0, %v218_v41 }
  0xc5   :  { %6421 = vmatprep.mubr.msk.f32.mxu0 %vm483_vm0, %v105_v54  ;;  %v265_v54 = vld [vmem:[%s11625_s2 + $0x50] sm:$0xff] }
  0xc8   :  { %6422 = vmatmul.mubr.msk.f32.gmra.mrb[88].mxu0 %vm483_vm0, %v106_v55  ;;  %v380_v55 = vld [vmem:[%s11625_s2 + $0x3e8] sm:$0xff] }
  0xeb   :  { %v6291_v62 = vpop.f32.mrb[0].mxu0  ;;  %v6462_v63 = vpop.f32.mrb[0].mxu1 }
  0xec   :  { %v1244_v1 = vadd.f32 %v6291_v62, %v256_v58  ;;  %v1814_v2 = vadd.f32 %v6462_v63, %v370_v59  ;;  %v1238_v3 = vpop.f32.mrb[1].mxu0  ;;  %v1808_v4 = vpop.f32.mrb[1].mxu1 }
  0xed   :  { %v1239_v6 = vadd.f32 %v1238_v3, %v255_v60  ;;  %v1809_v7 = vadd.f32 %v1808_v4, %v369_v61 }
  0xee   :  { %v5804_v10 = vmul.f32 -1.442695, %v1244_v1  ;;  %v5918_v11 = vmul.f32 -1.442695, %v1814_v2  ;;  %v219_v1 = vld [vmem:[%s11624_s1 + $0x650] sm:$0xff]  ;;  %v220_v2 = vld [vmem:[%s11624_s1 + $0x658] sm:$0xff] }
  0xef   :  { %v5803_v14 = vmul.f32 -1.442695, %v1239_v6  ;;  %v5917_v15 = vmul.f32 -1.442695, %v1809_v7  ;;  %v6294_v16 = vpop.f32.mrb[2].mxu0  ;;  %v6465_v17 = vpop.f32.mrb[2].mxu1  ;;  %6592 = vmatprep.mubr.msk.f32.mxu1 %vm483_vm0, %v219_v1 }
  0xf0   :  { %6667 = vpow2.f32 %v5804_v10  ;;  %v1254_v18 = vadd.f32 %v6294_v16, %v258_v8  ;;  %v1248_v19 = vpop.f32.mrb[3].mxu0  ;;  %v1824_v20 = vadd.f32 %v6465_v17, %v372_v9  ;;  %v1818_v21 = vpop.f32.mrb[3].mxu1  ;;  %6593 = vmatmul.mubr.msk.f32.gmra.mrb[88].mxu1 %vm483_vm0, %v220_v2  ;;  %v261_v10 = vld [vmem:[%s11625_s2 + $0x30] sm:$0xff] }
  0xf1   :  { %6669 = vpow2.f32 %v5918_v11  ;;  %v1249_v24 = vadd.f32 %v1248_v19, %v257_v12  ;;  %v1819_v25 = vadd.f32 %v1818_v21, %v371_v13  ;;  %v107_v17 = vld [vmem:[%s11624_s1 + $0x2d0] sm:$0xff] }
  0xf2   :  { %6671 = vpow2.f32 %v5803_v14  ;;  %v5806_v28 = vmul.f32 -1.442695, %v1254_v18  ;;  %v5920_v29 = vmul.f32 -1.442695, %v1824_v20  ;;  %v376_v14 = vld [vmem:[%s11625_s2 + $0x3c8] sm:$0xff]  ;;  %v375_v20 = vld [vmem:[%s11625_s2 + $0x3c0] sm:$0xff]  ;;  %6424 = vmatprep.mubr.msk.f32.mxu0 %vm483_vm0, %v107_v17 }
  0xf3   :  { %6673 = vpow2.f32 %v5917_v15  ;;  %v5805_v32 = vmul.f32 -1.442695, %v1249_v24  ;;  %v5919_v33 = vmul.f32 -1.442695, %v1819_v25  ;;  %v6297_v34 = vpop.f32.mrb[4].mxu0  ;;  %v6468_v35 = vpop.f32.mrb[4].mxu1  ;;  %6425 = vmatmul.mubr.msk.f32.gmra.mrb[90].mxu0 %vm483_vm0, %v108_v22 }
  0xf4   :  { %6675 = vpow2.f32 %v5806_v28  ;;  %v1264_v36 = vadd.f32 %v6297_v34, %v260_v26  ;;  %v1258_v37 = vpop.f32.mrb[5].mxu0  ;;  %v1834_v38 = vadd.f32 %v6468_v35, %v374_v27  ;;  %v1828_v39 = vpop.f32.mrb[5].mxu1  ;;  %v264_v26 = vld [vmem:[%s11625_s2 + $0x48] sm:$0xff]  ;;  %v378_v35 = vld [vmem:[%s11625_s2 + $0x3d8] sm:$0xff] }
  0xf5   :  { %6677 = vpow2.f32 %v5805_v32  ;;  %v1259_v42 = vadd.f32 %v1258_v37, %v259_v30  ;;  %v1829_v43 = vadd.f32 %v1828_v39, %v373_v31  ;;  %v263_v30 = vld [vmem:[%s11625_s2 + $0x40] sm:$0xff]  ;;  %v224_v22 = vld [vmem:[%s11624_s1 + $0x678] sm:$0xff] }
  0xf6   :  { %6679 = vpow2.f32 %v5920_v29  ;;  %v5808_v45 = vmul.f32 -1.442695, %v1264_v36  ;;  %v5922_v46 = vmul.f32 -1.442695, %v1834_v38  ;;  %v221_v38 = vld [vmem:[%s11624_s1 + $0x660] sm:$0xff] }
  0xf7   :  { %6681 = vpow2.f32 %v5919_v33  ;;  %v5807_v47 = vmul.f32 -1.442695, %v1259_v42  ;;  %v5921_v48 = vmul.f32 -1.442695, %v1829_v43  ;;  %v6300_v49 = vpop.f32.mrb[6].mxu0  ;;  %v6471_v50 = vpop.f32.mrb[6].mxu1  ;;  %6595 = vmatprep.mubr.msk.f32.mxu1 %vm483_vm0, %v221_v38 }
  0xf8   :  { %6683 = vpow2.f32 %v5808_v45  ;;  %v1274_v51 = vadd.f32 %v6300_v49, %v262_v44  ;;  %v1268_v52 = vpop.f32.mrb[7].mxu0  ;;  %v8379_v53 = vpop.f32.mrb[7].mxu1  ;;  %v1844_v29 = vadd.f32 %v6471_v50, %v376_v14  ;;  %v377_v42 = vld [vmem:[%s11625_s2 + $0x3d0] sm:$0xff]  ;;  %v222_v44 = vld [vmem:[%s11624_s1 + $0x668] sm:$0xff]  ;;  %v266_v49 = vld [vmem:[%s11625_s2 + $0x58] sm:$0xff] }
  0xf9   :  { %6685 = vpow2.f32 %v5807_v47  ;;  %v1269_v25 = vadd.f32 %v1268_v52, %v261_v10  ;;  %v1839_v34 = vadd.f32 %v8379_v53, %v375_v20  ;;  %6596 = vmatmul.mubr.msk.f32.gmra.mrb[90].mxu1 %vm483_vm0, %v222_v44  ;;  %v112_v38 = vld [vmem:[%s11624_s1 + $0x2f8] sm:$0xff] }
  0xfa   :  { %v6668_v56 = vpop.eup %6667  ;;  %6687 = vpow2.f32 %v5922_v46  ;;  %v5810_v57 = vmul.f32 -1.442695, %v1274_v51  ;;  %v5924_v52 = vmul.f32 -1.442695, %v1844_v29 }
  0xfb   :  { %v6670_v58 = vpop.eup %6669  ;;  %v3062_v59 = vadd.f32 1.0, %v6668_v56  ;;  %6689 = vpow2.f32 %v5921_v48  ;;  %v6303_v60 = vpop.f32.mrb[8].mxu0  ;;  %v5809_v47 = vmul.f32 -1.442695, %v1269_v25 }
  0xfc   :  { %v6672_v61 = vpop.eup %6671  ;;  %v3176_v62 = vadd.f32 1.0, %v6670_v58  ;;  %6691 = vpow2.f32 %v5810_v57  ;;  %v8389_v63 = vpop.f32.mrb[9].mxu0  ;;  %v1284_v41 = vadd.f32 %v6303_v60, %v264_v26  ;;  %v5923_v58 = vmul.f32 -1.442695, %v1839_v34 }
  0xfd   :  { %v8391_v0 = vpop.f32.mrb[8].mxu1  ;;  %v6674_v3 = vpop.eup %6673  ;;  %6693 = vrcp.f32 %v3062_v59  ;;  %v3061_v4 = vadd.f32 1.0, %v6672_v61  ;;  %v1279_v48 = vadd.f32 %v8389_v63, %v263_v30  ;;  %v110_v63 = vld [vmem:[%s11624_s1 + $0x2e8] sm:$0xff] }
  0xfe   :  { %v8399_v5 = vpop.f32.mrb[9].mxu1  ;;  %v6676_v6 = vpop.eup %6675  ;;  %6695 = vrcp.f32 %v3176_v62  ;;  %v3175_v7 = vadd.f32 1.0, %v6674_v3  ;;  %v1854_v53 = vadd.f32 %v8391_v0, %v378_v35  ;;  %v109_v62 = vld [vmem:[%s11624_s1 + $0x2e0] sm:$0xff]  ;;  %v5812_v1 = vmul.f32 -1.442695, %v1284_v41 }
  0xff   :  { %v6678_v8 = vpop.eup %6677  ;;  %6697 = vrcp.f32 %v3061_v4  ;;  %v3064_v9 = vadd.f32 1.0, %v6676_v6  ;;  %v8406_v11 = vpop.f32.mrb[10].mxu0  ;;  %v1849_v59 = vadd.f32 %v8399_v5, %v377_v42  ;;  %v379_v3 = vld [vmem:[%s11625_s2 + $0x3e0] sm:$0xff]  ;;  %6427 = vmatprep.mubr.msk.f32.mxu0 %vm483_vm0, %v109_v62  ;;  %v5811_v6 = vmul.f32 -1.442695, %v1279_v48 }
 0x100   :  { %v6680_v12 = vpop.eup %6679  ;;  %6699 = vrcp.f32 %v3175_v7  ;;  %v3063_v13 = vadd.f32 1.0, %v6678_v8  ;;  %v8411_v15 = vpop.f32.mrb[11].mxu0  ;;  %v1294_v2 = vadd.f32 %v8406_v11, %v266_v49  ;;  %v268_v8 = vld [vmem:[%s11625_s2 + $0x68] sm:$0xff]  ;;  %6428 = vmatmul.mubr.msk.f32.gmra.mrb[92].mxu0 %vm483_vm0, %v110_v63  ;;  %v5926_v10 = vmul.f32 -1.442695, %v1854_v53 }
 0x101   :  { %v8413_v16 = vpop.f32.mrb[10].mxu1  ;;  %v6682_v18 = vpop.eup %6681  ;;  %6701 = vrcp.f32 %v3064_v9  ;;  %v3178_v19 = vadd.f32 1.0, %v6680_v12  ;;  %v1289_v7 = vadd.f32 %v8411_v15, %v265_v54  ;;  %v267_v12 = vld [vmem:[%s11625_s2 + $0x60] sm:$0xff]  ;;  %v5925_v17 = vmul.f32 -1.442695, %v1849_v59 }
 0x102   :  { %v8421_v21 = vpop.f32.mrb[11].mxu1  ;;  %v6684_v23 = vpop.eup %6683  ;;  %6703 = vrcp.f32 %v3063_v13  ;;  %v3177_v24 = vadd.f32 1.0, %v6682_v18  ;;  %v1864_v11 = vadd.f32 %v8413_v16, %v380_v55  ;;  %v223_v16 = vld [vmem:[%s11624_s1 + $0x670] sm:$0xff] }
 0x103   :  { %v6686_v27 = vpop.eup %6685  ;;  %6705 = vrcp.f32 %v3178_v19  ;;  %v3066_v28 = vadd.f32 1.0, %v6684_v23  ;;  %v8434_v31 = vpop.f32.mrb[12].mxu0  ;;  %v1859_v18 = vadd.f32 %v8421_v21, %v379_v3  ;;  %6598 = vmatprep.mubr.msk.f32.mxu1 %vm483_vm0, %v223_v16  ;;  %v5813_v26 = vmul.f32 -1.442695, %v1289_v7  ;;  %v114_v3 = vld [vmem:[%s11624_s1 + $0x308] sm:$0xff]  ;;  %v382_v7 = vld [vmem:[%s11625_s2 + $0x3f8] sm:$0xff] }
 0x104   :  { %v6688_v32 = vpop.eup %6687  ;;  %6707 = vrcp.f32 %v3177_v24  ;;  %v3065_v33 = vadd.f32 1.0, %v6686_v27  ;;  %v8440_v36 = vpop.f32.mrb[13].mxu0  ;;  %v5814_v24 = vmul.f32 -1.442695, %v1294_v2  ;;  %v1304_v25 = vadd.f32 %v8434_v31, %v268_v8  ;;  %6599 = vmatmul.mubr.msk.f32.gmra.mrb[92].mxu1 %vm483_vm0, %v224_v22  ;;  %v113_v2 = vld [vmem:[%s11624_s1 + $0x300] sm:$0xff] }
 0x105   :  { %v8442_v37 = vpop.f32.mrb[12].mxu1  ;;  %v6690_v39 = vpop.eup %6689  ;;  %6709 = vrcp.f32 %v3066_v28  ;;  %v3180_v40 = vadd.f32 1.0, %v6688_v32  ;;  %v1299_v27 = vadd.f32 %v8440_v36, %v267_v12  ;;  %v5928_v29 = vmul.f32 -1.442695, %v1864_v11  ;;  %v111_v36 = vld [vmem:[%s11624_s1 + $0x2f0] sm:$0xff] }
 0x106   :  { %v8450_v43 = vpop.f32.mrb[13].mxu1  ;;  %v6692_v45 = vpop.eup %6691  ;;  %6711 = vrcp.f32 %v3065_v33  ;;  %v3179_v46 = vadd.f32 1.0, %v6690_v39  ;;  %v5927_v31 = vmul.f32 -1.442695, %v1859_v18  ;;  %6430 = vmatprep.mubr.msk.f32.mxu0 %vm483_vm0, %v111_v36  ;;  %v381_v11 = vld [vmem:[%s11625_s2 + $0x3f0] sm:$0xff] }
 0x107   :  { %v6694_v50 = vpop.eup %6693  ;;  %6713 = vrcp.f32 %v3180_v40  ;;  %v3068_v51 = vadd.f32 1.0, %v6692_v45  ;;  %v8468_v56 = vpop.f32.mrb[14].mxu0  ;;  %v5816_v40 = vmul.f32 -1.442695, %v1304_v25  ;;  %v5815_v42 = vmul.f32 -1.442695, %v1299_v27  ;;  %6431 = vmatmul.mubr.msk.f32.gmra.mrb[94].mxu0 %vm483_vm0, %v112_v38 }
 0x108   :  { %v6696_v57 = vpop.eup %6695  ;;  %6715 = vrcp.f32 %v3179_v46  ;;  %3980 = vperm.xlu0 %6665, %v6694_v50   ;;  %v8471_v60 = vpop.f32.mrb[15].mxu0  ;;  %v225_v50 = vld [vmem:[%s11624_s1 + $0x680] sm:$0xff]  ;;  %6433 = vmatprep.mubr.msk.f32.mxu0 %vm483_vm0, %v113_v2 }
 0x109   :  { %v8473_v61 = vpop.f32.mrb[14].mxu1  ;;  %v6698_v0 = vpop.eup %6697  ;;  %6717 = vrcp.f32 %v3068_v51  ;;  %4550 = vperm.xlu1 %6666, %v6696_v57   ;;  %v226_v51 = vld [vmem:[%s11624_s1 + $0x688] sm:$0xff]  ;;  %6601 = vmatprep.mubr.msk.f32.mxu1 %vm483_vm0, %v225_v50  ;;  %v271_v50 = vld [vmem:[%s11625_s2 + $0x80] sm:$0xff] }
 0x10a   :  { %v8485_v4 = vpop.f32.mrb[15].mxu1  ;;  %v6700_v5 = vpop.eup %6699  ;;  %6719 = vpow2.f32 %v5809_v47  ;;  %6602 = vmatmul.mubr.msk.f32.gmra.mrb[94].mxu1 %vm483_vm0, %v226_v51 }
 0x10b   :  { %v6702_v9 = vpop.eup %6701  ;;  %6721 = vpow2.f32 %v5924_v52  ;;  %v8497_v13 = vpop.f32.mrb[16].mxu0  ;;  %6434 = vmatmul.mubr.msk.f32.gmra.mrb[96].mxu0 %vm483_vm0, %v114_v3 }
 0x10c   :  { %v8499_v14 = vpop.f32.mrb[16].mxu1  ;;  %v6704_v15 = vpop.eup %6703  ;;  %6723 = vpow2.f32 %v5923_v58  ;;  %3975 = vperm.xlu0 %6665, %v6698_v0  }
 0x10d   :  { %v8502_v19 = vpop.f32.mrb[17].mxu0  ;;  %v8504_v20 = vpop.f32.mrb[17].mxu1  ;;  %6725 = vpow2.f32 %v5812_v1  ;;  %3990 = vperm.xlu1 %6666, %v6702_v9  }
 0x10e   :  { %v6706_v23 = vpop.eup %6705  ;;  %6727 = vpow2.f32 %v5811_v6 }
 0x10f   :  { %v6708_v21 = vpop.eup %6707  ;;  %6729 = vpow2.f32 %v5926_v10  ;;  %v8516_v30 = vpop.f32.mrb[18].mxu0 }
 0x110   :  { %v6710_v28 = vpop.eup %6709  ;;  %v8518_v32 = vpop.f32.mrb[18].mxu1  ;;  %6731 = vpow2.f32 %v5925_v17  ;;  %4545 = vperm.xlu0 %6665, %v6700_v5   ;;  %v270_v17 = vld [vmem:[%s11625_s2 + $0x78] sm:$0xff] }
 0x111   :  { %v6712_v33 = vpop.eup %6711  ;;  %v8520_v34 = vpop.f32.mrb[19].mxu0  ;;  %4560 = vperm.xlu1 %6666, %v6706_v23   ;;  %6733 = vpow2.f32 %v5814_v24  ;;  %v1874_v23 = vadd.f32 %v8442_v37, %v382_v7  ;;  %v269_v24 = vld [vmem:[%s11625_s2 + $0x70] sm:$0xff]  ;;  %v384_v37 = vld [vmem:[%s11625_s2 + $0x408] sm:$0xff] }
 0x112   :  { %v8522_v35 = vpop.f32.mrb[19].mxu1  ;;  %v8530_v39 = vpop.eup %6713  ;;  %6735 = vpow2.f32 %v5813_v26  ;;  %v227_v26 = vld [vmem:[%s11624_s1 + $0x690] sm:$0xff] }
 0x113   :  { %v6716_v41 = vpop.eup %6715  ;;  %6737 = vpow2.f32 %v5928_v29  ;;  %v8536_v45 = vpop.f32.mrb[20].mxu0  ;;  %v1869_v29 = vadd.f32 %v8450_v43, %v381_v11  ;;  %6604 = vmatprep.mubr.msk.f32.mxu1 %vm483_vm0, %v227_v26  ;;  %v383_v43 = vld [vmem:[%s11625_s2 + $0x400] sm:$0xff]  ;;  %v1319_v11 = vadd.f32 %v8502_v19, %v271_v50 }
 0x114   :  { %v8534_v44 = vpop.eup %6717  ;;  %v8538_v46 = vpop.f32.mrb[20].mxu1  ;;  %4555 = vperm.xlu0 %6665, %v6708_v21   ;;  %6739 = vpow2.f32 %v5927_v31  ;;  %v228_v31 = vld [vmem:[%s11624_s1 + $0x698] sm:$0xff]  ;;  %v1879_v2 = vadd.f32 %v8485_v4, %v383_v43  ;;  %v385_v4 = vld [vmem:[%s11625_s2 + $0x410] sm:$0xff]  ;;  %v229_v26 = vld [vmem:[%s11624_s1 + $0x6a0] sm:$0xff] }
 0x115   :  { %v6720_v47 = vpop.eup %6719  ;;  %v8540_v48 = vpop.f32.mrb[21].mxu0  ;;  %3985 = vperm.xlu1 %6666, %v6704_v15   ;;  %6741 = vpow2.f32 %v5816_v40  ;;  %v1314_v40 = vadd.f32 %v8468_v56, %v270_v17  ;;  %6605 = vmatmul.mubr.msk.f32.gmra.mrb[96].mxu1 %vm483_vm0, %v228_v31  ;;  %v5819_v43 = vmul.f32 -1.442695, %v1319_v11 }
 0x116   :  { %v8542_v49 = vpop.f32.mrb[21].mxu1  ;;  %v6722_v52 = vpop.eup %6721  ;;  %v3067_v53 = vadd.f32 1.0, %v6720_v47  ;;  %6743 = vpow2.f32 %v5815_v42  ;;  %v1309_v42 = vadd.f32 %v8471_v60, %v269_v24  ;;  %v272_v47 = vld [vmem:[%s11625_s2 + $0x88] sm:$0xff]  ;;  %v115_v60 = vld [vmem:[%s11624_s1 + $0x310] sm:$0xff]  ;;  %6607 = vmatprep.mubr.msk.f32.mxu1 %vm483_vm0, %v229_v26 }
 0x117   :  { %v6724_v54 = vpop.eup %6723  ;;  %v3182_v55 = vadd.f32 1.0, %v6722_v52  ;;  %v8552_v59 = vpop.f32.mrb[22].mxu0  ;;  %6436 = vmatprep.mubr.msk.f32.mxu0 %vm483_vm0, %v115_v60  ;;  %v5818_v7 = vmul.f32 -1.442695, %v1314_v40 }
 0x118   :  { %v6726_v57 = vpop.eup %6725  ;;  %6745 = vrcp.f32 %v3067_v53  ;;  %v3181_v58 = vadd.f32 1.0, %v6724_v54  ;;  %3995 = vperm.xlu0 %6665, %v6712_v33   ;;  %v8554_v0 = vpop.f32.mrb[23].mxu0  ;;  %v5930_v53 = vmul.f32 -1.442695, %v1874_v23  ;;  %v1884_v54 = vadd.f32 %v8473_v61, %v384_v37  ;;  %v386_v61 = vld [vmem:[%s11625_s2 + $0x418] sm:$0xff] }
 0x119   :  { %v6728_v62 = vpop.eup %6727  ;;  %6747 = vrcp.f32 %v3182_v55  ;;  %v3070_v63 = vadd.f32 1.0, %v6726_v57  ;;  %v8556_v1 = vpop.f32.mrb[22].mxu1  ;;  %4000 = vperm.xlu1 %6666, %v6710_v28   ;;  %v1894_v23 = vadd.f32 %v8499_v14, %v386_v61  ;;  %v1889_v37 = vadd.f32 %v8504_v20, %v385_v4  ;;  %v388_v14 = vld [vmem:[%s11625_s2 + $0x428] sm:$0xff]  ;;  %v232_v4 = vld [vmem:[%s11624_s1 + $0x6b8] sm:$0xff] }
 0x11a   :  { %v6730_v5 = vpop.eup %6729  ;;  %6749 = vrcp.f32 %v3181_v58  ;;  %v3069_v6 = vadd.f32 1.0, %v6728_v62  ;;  %v8567_v8 = vpop.f32.mrb[23].mxu1  ;;  %v1904_v50 = vadd.f32 %v8518_v32, %v388_v14 }
 0x11b   :  { %v6732_v9 = vpop.eup %6731  ;;  %6751 = vrcp.f32 %v3070_v63  ;;  %v3184_v10 = vadd.f32 1.0, %v6730_v5  ;;  %v8577_v18 = vpop.f32.mrb[24].mxu0  ;;  %v5929_v63 = vmul.f32 -1.442695, %v1869_v29  ;;  %v116_v5 = vld [vmem:[%s11624_s1 + $0x318] sm:$0xff] }
 0x11c   :  { %v6734_v12 = vpop.eup %6733  ;;  %6753 = vrcp.f32 %v3069_v6  ;;  %v3183_v15 = vadd.f32 1.0, %v6732_v9  ;;  %4565 = vperm.xlu0 %6665, %v6716_v41   ;;  %v8583_v25 = vpop.f32.mrb[25].mxu0  ;;  %6437 = vmatmul.mubr.msk.f32.gmra.mrb[98].mxu0 %vm483_vm0, %v116_v5  ;;  %v5931_v29 = vmul.f32 -1.442695, %v1879_v2  ;;  %v5936_v5 = vmul.f32 -1.442695, %v1904_v50 }
 0x11d   :  { %v6736_v16 = vpop.eup %6735  ;;  %6755 = vrcp.f32 %v3184_v10  ;;  %v3072_v22 = vadd.f32 1.0, %v6734_v12  ;;  %v8585_v21 = vpop.f32.mrb[24].mxu1  ;;  %4570 = vperm.xlu1 %6666, %v8530_v39   ;;  %v5817_v10 = vmul.f32 -1.442695, %v1309_v42  ;;  %v274_v12 = vld [vmem:[%s11625_s2 + $0x98] sm:$0xff]  ;;  %v276_v50 = vld [vmem:[%s11625_s2 + $0xa8] sm:$0xff] }
 0x11e   :  { %v6738_v27 = vpop.eup %6737  ;;  %6757 = vrcp.f32 %v3183_v15  ;;  %v3071_v28 = vadd.f32 1.0, %v6736_v16  ;;  %v8595_v33 = vpop.f32.mrb[25].mxu1  ;;  %v273_v15 = vld [vmem:[%s11625_s2 + $0x90] sm:$0xff] }
 0x11f   :  { %v6740_v36 = vpop.eup %6739  ;;  %6759 = vrcp.f32 %v3072_v22  ;;  %v3186_v38 = vadd.f32 1.0, %v6738_v27  ;;  %v8613_v56 = vpop.f32.mrb[26].mxu0  ;;  %v5932_v22 = vmul.f32 -1.442695, %v1884_v54  ;;  %v230_v27 = vld [vmem:[%s11624_s1 + $0x6a8] sm:$0xff] }
 0x120   :  { %v6742_v39 = vpop.eup %6741  ;;  %6761 = vrcp.f32 %v3071_v28  ;;  %v3185_v41 = vadd.f32 1.0, %v6740_v36  ;;  %v8616_v55 = vpop.f32.mrb[27].mxu0  ;;  %6608 = vmatmul.mubr.msk.f32.gmra.mrb[98].mxu1 %vm483_vm0, %v230_v27  ;;  %v5933_v54 = vmul.f32 -1.442695, %v1889_v37  ;;  %v119_v27 = vld [vmem:[%s11624_s1 + $0x330] sm:$0xff] }
 0x121   :  { %v6744_v51 = vpop.eup %6743  ;;  %6763 = vrcp.f32 %v3186_v38  ;;  %v3074_v52 = vadd.f32 1.0, %v6742_v39  ;;  %v8618_v57 = vpop.f32.mrb[26].mxu1  ;;  %4010 = vperm.xlu1 %6666, %v8534_v44   ;;  %v1324_v44 = vadd.f32 %v8497_v13, %v272_v47  ;;  %v1334_v38 = vadd.f32 %v8516_v30, %v274_v12  ;;  %v117_v30 = vld [vmem:[%s11624_s1 + $0x320] sm:$0xff] }
 0x122   :  { %v6746_v58 = vpop.eup %6745  ;;  %6765 = vrcp.f32 %v3185_v41  ;;  %v3073_v62 = vadd.f32 1.0, %v6744_v51  ;;  %v8628_v3 = vpop.f32.mrb[27].mxu1  ;;  %v1329_v39 = vadd.f32 %v8520_v34, %v273_v15  ;;  %v5934_v47 = vmul.f32 -1.442695, %v1894_v23  ;;  %v118_v34 = vld [vmem:[%s11624_s1 + $0x328] sm:$0xff]  ;;  %6439 = vmatprep.mubr.msk.f32.mxu0 %vm483_vm0, %v117_v30 }
 0x123   :  { %v6748_v6 = vpop.eup %6747  ;;  %6767 = vrcp.f32 %v3074_v52  ;;  %4005 = vperm.xlu0 %6665, %v6746_v58   ;;  %v8646_v13 = vpop.f32.mrb[28].mxu0  ;;  %v5820_v36 = vmul.f32 -1.442695, %v1324_v44  ;;  %v5822_v32 = vmul.f32 -1.442695, %v1334_v38  ;;  %6440 = vmatmul.mubr.msk.f32.gmra.mrb[100].mxu0 %vm483_vm0, %v118_v34  ;;  %v231_v44 = vld [vmem:[%s11624_s1 + $0x6b0] sm:$0xff] }
 0x124   :  { %v6750_v9 = vpop.eup %6749  ;;  %6769 = vrcp.f32 %v3073_v62  ;;  %v8648_v17 = vpop.f32.mrb[28].mxu1  ;;  %v5821_v62 = vmul.f32 -1.442695, %v1329_v39  ;;  %6610 = vmatprep.mubr.msk.f32.mxu1 %vm483_vm0, %v231_v44  ;;  %6442 = vmatprep.mubr.msk.f32.mxu0 %vm483_vm0, %v119_v27  ;;  %v234_v44 = vld [vmem:[%s11624_s1 + $0x6c8] sm:$0xff]  ;;  %v389_v27 = vld [vmem:[%s11625_s2 + $0x430] sm:$0xff] }
 0x125   :  { %v6752_v16 = vpop.eup %6751  ;;  %6771 = vpow2.f32 %v5930_v53  ;;  %v8651_v24 = vpop.f32.mrb[29].mxu0  ;;  %4580 = vperm.xlu1 %6666, %v6748_v6   ;;  %6611 = vmatmul.mubr.msk.f32.gmra.mrb[100].mxu1 %vm483_vm0, %v232_v4 }
 0x126   :  { %v8653_v19 = vpop.f32.mrb[29].mxu1  ;;  %v6754_v28 = vpop.eup %6753  ;;  %6773 = vpow2.f32 %v5929_v63 }
 0x127   :  { %v6756_v31 = vpop.eup %6755  ;;  %6775 = vpow2.f32 %v5818_v7  ;;  %4575 = vperm.xlu0 %6665, %v6750_v9   ;;  %v8669_v20 = vpop.f32.mrb[30].mxu0 }
 0x128   :  { %v6758_v40 = vpop.eup %6757  ;;  %6777 = vpow2.f32 %v5817_v10  ;;  %v8671_v41 = vpop.f32.mrb[30].mxu1 }
 0x129   :  { %v6760_v42 = vpop.eup %6759  ;;  %6779 = vpow2.f32 %v5932_v22  ;;  %v8674_v51 = vpop.f32.mrb[31].mxu0  ;;  %4020 = vperm.xlu1 %6666, %v6752_v16  }
 0x12a   :  { %v8676_v52 = vpop.f32.mrb[31].mxu1  ;;  %v6762_v53 = vpop.eup %6761  ;;  %6781 = vpow2.f32 %v5931_v29 }
 0x12b   :  { %v6764_v60 = vpop.eup %6763  ;;  %4015 = vperm.xlu0 %6665, %v6754_v28   ;;  %6783 = vpow2.f32 %v5820_v36  ;;  %v8688_v63 = vpop.f32.mrb[32].mxu0  ;;  %v120_v28 = vld [vmem:[%s11624_s1 + $0x338] sm:$0xff] }
 0x12c   :  { %v8686_v58 = vpop.eup %6765  ;;  %6785 = vpow2.f32 %v5819_v43  ;;  %v8690_v2 = vpop.f32.mrb[32].mxu1  ;;  %6443 = vmatmul.mubr.msk.f32.gmra.mrb[102].mxu0 %vm483_vm0, %v120_v28  ;;  %v387_v43 = vld [vmem:[%s11625_s2 + $0x420] sm:$0xff] }
 0x12d   :  { %v8692_v61 = vpop.eup %6767  ;;  %6787 = vpow2.f32 %v5934_v47  ;;  %v8694_v6 = vpop.f32.mrb[33].mxu0  ;;  %4590 = vperm.xlu1 %6666, %v6756_v31  }
 0x12e   :  { %v8696_v7 = vpop.f32.mrb[33].mxu1  ;;  %v8704_v9 = vpop.eup %6769  ;;  %6789 = vpow2.f32 %v5933_v54 }
 0x12f   :  { %v6772_v10 = vpop.eup %6771  ;;  %4585 = vperm.xlu0 %6665, %v6758_v40   ;;  %6791 = vpow2.f32 %v5822_v32  ;;  %v8708_v15 = vpop.f32.mrb[34].mxu0 }
 0x130   :  { %v6774_v11 = vpop.eup %6773  ;;  %v3188_v12 = vadd.f32 1.0, %v6772_v10  ;;  %6793 = vpow2.f32 %v5821_v62  ;;  %v8710_v23 = vpop.f32.mrb[35].mxu0  ;;  %v275_v62 = vld [vmem:[%s11625_s2 + $0xa0] sm:$0xff] }
 0x131   :  { %v6776_v16 = vpop.eup %6775  ;;  %v3187_v22 = vadd.f32 1.0, %v6774_v11  ;;  %6795 = vpow2.f32 %v5936_v5  ;;  %v8712_v26 = vpop.f32.mrb[34].mxu1  ;;  %4030 = vperm.xlu1 %6666, %v6760_v42   ;;  %v1899_v11 = vadd.f32 %v8522_v35, %v387_v43 }
 0x132   :  { %v6778_v29 = vpop.eup %6777  ;;  %6797 = vrcp.f32 %v3188_v12  ;;  %v3076_v37 = vadd.f32 1.0, %v6776_v16  ;;  %v8720_v14 = vpop.f32.mrb[35].mxu1 }
 0x133   :  { %v6780_v31 = vpop.eup %6779  ;;  %6799 = vrcp.f32 %v3187_v22  ;;  %v3075_v36 = vadd.f32 1.0, %v6778_v29  ;;  %4025 = vperm.xlu0 %6665, %v6762_v53   ;;  %v8727_v39 = vpop.f32.mrb[36].mxu0  ;;  %v233_v53 = vld [vmem:[%s11624_s1 + $0x6c0] sm:$0xff]  ;;  %v1344_v22 = vadd.f32 %v8536_v45, %v276_v50  ;;  %v1339_v29 = vadd.f32 %v8540_v48, %v275_v62  ;;  %v277_v48 = vld [vmem:[%s11625_s2 + $0xb0] sm:$0xff] }
 0x134   :  { %v6782_v38 = vpop.eup %6781  ;;  %6801 = vrcp.f32 %v3076_v37  ;;  %v3190_v40 = vadd.f32 1.0, %v6780_v31  ;;  %v8732_v30 = vpop.f32.mrb[37].mxu0  ;;  %6613 = vmatprep.mubr.msk.f32.mxu1 %vm483_vm0, %v233_v53  ;;  %v278_v37 = vld [vmem:[%s11625_s2 + $0xb8] sm:$0xff]  ;;  %v121_v45 = vld [vmem:[%s11624_s1 + $0x340] sm:$0xff] }
 0x135   :  { %v6784_v42 = vpop.eup %6783  ;;  %6803 = vrcp.f32 %v3075_v36  ;;  %v3189_v47 = vadd.f32 1.0, %v6782_v38  ;;  %v8734_v34 = vpop.f32.mrb[36].mxu1  ;;  %4600 = vperm.xlu1 %6666, %v6764_v60   ;;  %v390_v60 = vld [vmem:[%s11625_s2 + $0x438] sm:$0xff]  ;;  %6614 = vmatmul.mubr.msk.f32.gmra.mrb[102].mxu1 %vm483_vm0, %v234_v44  ;;  %v5824_v44 = vmul.f32 -1.442695, %v1344_v22 }
 0x136   :  { %v6786_v54 = vpop.eup %6785  ;;  %6805 = vrcp.f32 %v3190_v40  ;;  %v3078_v32 = vadd.f32 1.0, %v6784_v42  ;;  %v8742_v5 = vpop.f32.mrb[37].mxu1  ;;  %v1914_v43 = vadd.f32 %v8538_v46, %v390_v60  ;;  %6445 = vmatprep.mubr.msk.f32.mxu0 %vm483_vm0, %v121_v45  ;;  %v1909_v46 = vadd.f32 %v8542_v49, %v389_v27  ;;  %v280_v49 = vld [vmem:[%s11625_s2 + $0xc8] sm:$0xff]  ;;  %v236_v27 = vld [vmem:[%s11624_s1 + $0x6d8] sm:$0xff] }
 0x137   :  { %v6788_v4 = vpop.eup %6787  ;;  %6807 = vrcp.f32 %v3189_v47  ;;  %v3077_v10 = vadd.f32 1.0, %v6786_v54  ;;  %4595 = vperm.xlu0 %6665, %v8686_v58   ;;  %v8758_v28 = vpop.f32.mrb[38].mxu0  ;;  %v122_v47 = vld [vmem:[%s11624_s1 + $0x348] sm:$0xff]  ;;  %v5935_v54 = vmul.f32 -1.442695, %v1899_v11 }
 0x138   :  { %v6790_v12 = vpop.eup %6789  ;;  %6809 = vrcp.f32 %v3078_v32  ;;  %v3192_v16 = vadd.f32 1.0, %v6788_v4  ;;  %v8764_v31 = vpop.f32.mrb[39].mxu0  ;;  %6446 = vmatmul.mubr.msk.f32.gmra.mrb[104].mxu0 %vm483_vm0, %v122_v47  ;;  %v1354_v4 = vadd.f32 %v8552_v59, %v278_v37  ;;  %v5823_v60 = vmul.f32 -1.442695, %v1339_v29  ;;  %v235_v59 = vld [vmem:[%s11624_s1 + $0x6d0] sm:$0xff] }
 0x139   :  { %v6792_v58 = vpop.eup %6791  ;;  %6811 = vrcp.f32 %v3077_v10  ;;  %v3191_v35 = vadd.f32 1.0, %v6790_v12  ;;  %v8766_v36 = vpop.f32.mrb[38].mxu1  ;;  %4040 = vperm.xlu1 %6666, %v8692_v61   ;;  %v392_v61 = vld [vmem:[%s11625_s2 + $0x448] sm:$0xff]  ;;  %v391_v10 = vld [vmem:[%s11625_s2 + $0x440] sm:$0xff]  ;;  %v1349_v12 = vadd.f32 %v8554_v0, %v277_v48  ;;  %6616 = vmatprep.mubr.msk.f32.mxu1 %vm483_vm0, %v235_v59  ;;  %v1364_v47 = vadd.f32 %v8577_v18, %v280_v49  ;;  %v123_v18 = vld [vmem:[%s11624_s1 + $0x350] sm:$0xff] }
 0x13a   :  { %v6794_v38 = vpop.eup %6793  ;;  %6813 = vrcp.f32 %v3192_v16  ;;  %v3080_v40 = vadd.f32 1.0, %v6792_v58  ;;  %v8776_v42 = vpop.f32.mrb[39].mxu1  ;;  %v1924_v29 = vadd.f32 %v8556_v1, %v392_v61  ;;  %v279_v0 = vld [vmem:[%s11625_s2 + $0xc0] sm:$0xff]  ;;  %6617 = vmatmul.mubr.msk.f32.gmra.mrb[104].mxu1 %vm483_vm0, %v236_v27  ;;  %v5826_v48 = vmul.f32 -1.442695, %v1354_v4  ;;  %6448 = vmatprep.mubr.msk.f32.mxu0 %vm483_vm0, %v123_v18 }
 0x13b   :  { %v6796_v50 = vpop.eup %6795  ;;  %6815 = vrcp.f32 %v3191_v35  ;;  %v3079_v53 = vadd.f32 1.0, %v6794_v38  ;;  %4035 = vperm.xlu0 %6665, %v8704_v9   ;;  %v8795_v9 = vpop.f32.mrb[40].mxu0  ;;  %v5938_v35 = vmul.f32 -1.442695, %v1914_v43  ;;  %v5937_v38 = vmul.f32 -1.442695, %v1909_v46 }
 0x13c   :  { %v6798_v32 = vpop.eup %6797  ;;  %6817 = vrcp.f32 %v3080_v40  ;;  %v3194_v62 = vadd.f32 1.0, %v6796_v50  ;;  %v8798_v16 = vpop.f32.mrb[41].mxu0  ;;  %v1919_v40 = vadd.f32 %v8567_v8, %v391_v10  ;;  %v394_v43 = vld [vmem:[%s11625_s2 + $0x458] sm:$0xff]  ;;  %v393_v50 = vld [vmem:[%s11625_s2 + $0x450] sm:$0xff]  ;;  %v5825_v46 = vmul.f32 -1.442695, %v1349_v12 }
 0x13d   :  { %v6800_v11 = vpop.eup %6799  ;;  %6819 = vrcp.f32 %v3079_v53  ;;  %v8800_v22 = vpop.f32.mrb[40].mxu1  ;;  %4610 = vperm.xlu1 %6666, %v6798_v32   ;;  %v1359_v61 = vadd.f32 %v8583_v25, %v279_v0  ;;  %v5940_v10 = vmul.f32 -1.442695, %v1924_v29  ;;  %v1934_v49 = vadd.f32 %v8585_v21, %v394_v43 }
 0x13e   :  { %v6802_v58 = vpop.eup %6801  ;;  %6821 = vrcp.f32 %v3194_v62  ;;  %v8812_v37 = vpop.f32.mrb[41].mxu1  ;;  %v5828_v59 = vmul.f32 -1.442695, %v1364_v47 }
 0x13f   :  { %v6804_v45 = vpop.eup %6803  ;;  %6823 = vpow2.f32 %v5935_v54  ;;  %4605 = vperm.xlu0 %6665, %v6800_v11   ;;  %v8824_v53 = vpop.f32.mrb[42].mxu0  ;;  %v5939_v11 = vmul.f32 -1.442695, %v1919_v40  ;;  %v5827_v21 = vmul.f32 -1.442695, %v1359_v61 }
 0x140   :  { %v6806_v1 = vpop.eup %6805  ;;  %6825 = vpow2.f32 %v5824_v44  ;;  %v8826_v54 = vpop.f32.mrb[42].mxu1  ;;  %v124_v44 = vld [vmem:[%s11624_s1 + $0x358] sm:$0xff]  ;;  %v5942_v40 = vmul.f32 -1.442695, %v1934_v49 }
 0x141   :  { %v6808_v8 = vpop.eup %6807  ;;  %6827 = vpow2.f32 %v5823_v60  ;;  %v8829_v32 = vpop.f32.mrb[43].mxu0  ;;  %4050 = vperm.xlu1 %6666, %v6802_v58   ;;  %v1929_v60 = vadd.f32 %v8595_v33, %v393_v50  ;;  %6449 = vmatmul.mubr.msk.f32.gmra.mrb[106].mxu0 %vm483_vm0, %v124_v44  ;;  %v237_v33 = vld [vmem:[%s11624_s1 + $0x6e0] sm:$0xff]  ;;  %v126_v44 = vld [vmem:[%s11624_s1 + $0x368] sm:$0xff] }
 0x142   :  { %v8831_v62 = vpop.f32.mrb[43].mxu1  ;;  %v6810_v4 = vpop.eup %6809  ;;  %6829 = vpow2.f32 %v5938_v35  ;;  %6619 = vmatprep.mubr.msk.f32.mxu1 %vm483_vm0, %v237_v33 }
 0x143   :  { %v6812_v25 = vpop.eup %6811  ;;  %6831 = vpow2.f32 %v5937_v38  ;;  %4045 = vperm.xlu0 %6665, %v6804_v45   ;;  %v8843_v27 = vpop.f32.mrb[44].mxu0  ;;  %v238_v45 = vld [vmem:[%s11624_s1 + $0x6e8] sm:$0xff] }
 0x144   :  { %v6814_v12 = vpop.eup %6813  ;;  %6833 = vpow2.f32 %v5826_v48  ;;  %v8845_v35 = vpop.f32.mrb[44].mxu1  ;;  %v5941_v48 = vmul.f32 -1.442695, %v1929_v60  ;;  %6620 = vmatmul.mubr.msk.f32.gmra.mrb[106].mxu1 %vm483_vm0, %v238_v45 }
 0x145   :  { %v6816_v58 = vpop.eup %6815  ;;  %6835 = vpow2.f32 %v5825_v46  ;;  %v8847_v29 = vpop.f32.mrb[45].mxu0  ;;  %4620 = vperm.xlu1 %6666, %v6806_v1  }
 0x146   :  { %v8849_v0 = vpop.f32.mrb[45].mxu1  ;;  %v8857_v38 = vpop.eup %6817  ;;  %6837 = vpow2.f32 %v5940_v10 }
 0x147   :  { %v8860_v43 = vpop.eup %6819  ;;  %4615 = vperm.xlu0 %6665, %v6808_v8   ;;  %6839 = vpow2.f32 %v5939_v11  ;;  %v8865_v50 = vpop.f32.mrb[46].mxu0  ;;  %v125_v8 = vld [vmem:[%s11624_s1 + $0x360] sm:$0xff] }
 0x148   :  { %v8863_v47 = vpop.eup %6821  ;;  %6841 = vpow2.f32 %v5828_v59  ;;  %v8867_v46 = vpop.f32.mrb[46].mxu1  ;;  %6451 = vmatprep.mubr.msk.f32.mxu0 %vm483_vm0, %v125_v8  ;;  %v282_v8 = vld [vmem:[%s11625_s2 + $0xd8] sm:$0xff] }
 0x149   :  { %11628 = vst [vmem:[#allocation2_spill] sm:$0xff] %v8867_v46  ;;  %v6824_v61 = vpop.eup %6823  ;;  %6843 = vpow2.f32 %v5827_v21  ;;  %v8869_v1 = vpop.f32.mrb[47].mxu0  ;;  %4060 = vperm.xlu1 %6666, %v6810_v4   ;;  %6452 = vmatmul.mubr.msk.f32.gmra.mrb[108].mxu0 %vm483_vm0, %v126_v44 }
 0x14a   :  { %v8871_v18 = vpop.f32.mrb[47].mxu1  ;;  %v6826_v10 = vpop.eup %6825  ;;  %v3193_v49 = vadd.f32 1.0, %v6824_v61  ;;  %6845 = vpow2.f32 %v5942_v40  ;;  %v239_v40 = vld [vmem:[%s11624_s1 + $0x6f0] sm:$0xff] }
 0x14b   :  { %11629 = vst [vmem:[#allocation3_spill] sm:$0xff] %v8871_v18  ;;  %v6828_v11 = vpop.eup %6827  ;;  %v3082_v60 = vadd.f32 1.0, %v6826_v10  ;;  %4055 = vperm.xlu0 %6665, %v6812_v25   ;;  %6847 = vpow2.f32 %v5941_v48  ;;  %v8881_v33 = vpop.f32.mrb[48].mxu0  ;;  %v240_v25 = vld [vmem:[%s11624_s1 + $0x6f8] sm:$0xff]  ;;  %6622 = vmatprep.mubr.msk.f32.mxu1 %vm483_vm0, %v239_v40  ;;  %v395_v40 = vld [vmem:[%s11625_s2 + $0x460] sm:$0xff] }
 0x14c   :  { %v6830_v59 = vpop.eup %6829  ;;  %6849 = vrcp.f32 %v3193_v49  ;;  %v3081_v21 = vadd.f32 1.0, %v6828_v11  ;;  %v8883_v46 = vpop.f32.mrb[49].mxu0  ;;  %v281_v11 = vld [vmem:[%s11625_s2 + $0xd0] sm:$0xff]  ;;  %6623 = vmatmul.mubr.msk.f32.gmra.mrb[108].mxu1 %vm483_vm0, %v240_v25 }
 0x14d   :  { %v6832_v45 = vpop.eup %6831  ;;  %6851 = vrcp.f32 %v3082_v60  ;;  %v3196_v18 = vadd.f32 1.0, %v6830_v59  ;;  %v8885_v4 = vpop.f32.mrb[48].mxu1  ;;  %4630 = vperm.xlu1 %6666, %v6814_v12   ;;  %v396_v59 = vld [vmem:[%s11625_s2 + $0x468] sm:$0xff] }
 0x14e   :  { %v6834_v48 = vpop.eup %6833  ;;  %6853 = vrcp.f32 %v3081_v21  ;;  %v3195_v61 = vadd.f32 1.0, %v6832_v45  ;;  %v8896_v44 = vpop.f32.mrb[49].mxu1 }
 0x14f   :  { %11630 = vst [vmem:[#allocation4_spill] sm:$0xff] %v8896_v44  ;;  %v6836_v10 = vpop.eup %6835  ;;  %6855 = vrcp.f32 %v3196_v18  ;;  %v3084_v49 = vadd.f32 1.0, %v6834_v48  ;;  %4625 = vperm.xlu0 %6665, %v6816_v58   ;;  %v8906_v21 = vpop.f32.mrb[50].mxu0  ;;  %v1374_v58 = vadd.f32 %v8613_v56, %v282_v8  ;;  %v284_v56 = vld [vmem:[%s11625_s2 + $0xe8] sm:$0xff] }
 0x150   :  { %v6838_v60 = vpop.eup %6837  ;;  %6857 = vrcp.f32 %v3195_v61  ;;  %v3083_v12 = vadd.f32 1.0, %v6836_v10  ;;  %11631 = vst [vmem:[#allocation5_spill] sm:$0xff] %v8906_v21  ;;  %v8912_v48 = vpop.f32.mrb[51].mxu0  ;;  %v127_v61 = vld [vmem:[%s11624_s1 + $0x370] sm:$0xff] }
 0x151   :  { %v6840_v45 = vpop.eup %6839  ;;  %6859 = vrcp.f32 %v3084_v49  ;;  %v3198_v18 = vadd.f32 1.0, %v6838_v60  ;;  %11632 = vst [vmem:[#allocation6_spill] sm:$0xff] %v8912_v48  ;;  %v8914_v25 = vpop.f32.mrb[50].mxu1  ;;  %4070 = vperm.xlu1 %6666, %v8857_v38   ;;  %v1369_v49 = vadd.f32 %v8616_v55, %v281_v11  ;;  %6454 = vmatprep.mubr.msk.f32.mxu0 %vm483_vm0, %v127_v61  ;;  %v128_v60 = vld [vmem:[%s11624_s1 + $0x378] sm:$0xff]  ;;  %v1944_v38 = vadd.f32 %v8618_v57, %v396_v59  ;;  %v283_v55 = vld [vmem:[%s11625_s2 + $0xe0] sm:$0xff] }
 0x152   :  { %11633 = vst [vmem:[#allocation7_spill] sm:$0xff] %v8914_v25  ;;  %v6842_v10 = vpop.eup %6841  ;;  %6861 = vrcp.f32 %v3083_v12  ;;  %v3197_v21 = vadd.f32 1.0, %v6840_v45  ;;  %v8924_v8 = vpop.f32.mrb[51].mxu1  ;;  %6455 = vmatmul.mubr.msk.f32.gmra.mrb[110].mxu0 %vm483_vm0, %v128_v60  ;;  %v1939_v61 = vadd.f32 %v8628_v3, %v395_v40  ;;  %v1384_v60 = vadd.f32 %v8646_v13, %v284_v56  ;;  %v241_v3 = vld [vmem:[%s11624_s1 + $0x700] sm:$0xff]  ;;  %v286_v13 = vld [vmem:[%s11625_s2 + $0xf8] sm:$0xff]  ;;  %v242_v56 = vld [vmem:[%s11624_s1 + $0x708] sm:$0xff] }
 0x153   :  { %11634 = vst [vmem:[#allocation8_spill] sm:$0xff] %v8924_v8  ;;  %v6844_v25 = vpop.eup %6843  ;;  %6863 = vrcp.f32 %v3198_v18  ;;  %v3086_v12 = vadd.f32 1.0, %v6842_v10  ;;  %4065 = vperm.xlu0 %6665, %v8860_v43   ;;  %v398_v18 = vld [vmem:[%s11625_s2 + $0x478] sm:$0xff]  ;;  %v397_v43 = vld [vmem:[%s11625_s2 + $0x470] sm:$0xff]  ;;  %v8943_v57 = vpop.f32.mrb[52].mxu0  ;;  %6625 = vmatprep.mubr.msk.f32.mxu1 %vm483_vm0, %v241_v3  ;;  %v400_v3 = vld [vmem:[%s11625_s2 + $0x488] sm:$0xff] }
 0x154   :  { %v6846_v11 = vpop.eup %6845  ;;  %6865 = vrcp.f32 %v3197_v21  ;;  %v3085_v45 = vadd.f32 1.0, %v6844_v25  ;;  %v5830_v8 = vmul.f32 -1.442695, %v1374_v58  ;;  %v8946_v21 = vpop.f32.mrb[53].mxu0  ;;  %v5829_v44 = vmul.f32 -1.442695, %v1369_v49  ;;  %6626 = vmatmul.mubr.msk.f32.gmra.mrb[110].mxu1 %vm483_vm0, %v242_v56 }
 0x155   :  { %v6848_v59 = vpop.eup %6847  ;;  %6867 = vrcp.f32 %v3086_v12  ;;  %v3200_v10 = vadd.f32 1.0, %v6846_v11  ;;  %v8948_v25 = vpop.f32.mrb[52].mxu1  ;;  %4640 = vperm.xlu1 %6666, %v8863_v47   ;;  %v1379_v12 = vadd.f32 %v8651_v24, %v283_v55  ;;  %v5944_v49 = vmul.f32 -1.442695, %v1944_v38  ;;  %v285_v24 = vld [vmem:[%s11625_s2 + $0xf0] sm:$0xff]  ;;  %v399_v38 = vld [vmem:[%s11625_s2 + $0x480] sm:$0xff] }
 0x156   :  { %v6850_v40 = vpop.eup %6849  ;;  %6869 = vrcp.f32 %v3085_v45  ;;  %v3199_v48 = vadd.f32 1.0, %v6848_v59  ;;  %v8958_v58 = vpop.f32.mrb[53].mxu1  ;;  %v1954_v47 = vadd.f32 %v8648_v17, %v398_v18  ;;  %v5943_v45 = vmul.f32 -1.442695, %v1939_v61  ;;  %v130_v56 = vld [vmem:[%s11624_s1 + $0x388] sm:$0xff] }
 0x157   :  { %v6852_v11 = vpop.eup %6851  ;;  %6871 = vrcp.f32 %v3200_v10  ;;  %4635 = vperm.xlu0 %6665, %v6850_v40   ;;  %v1949_v59 = vadd.f32 %v8653_v19, %v397_v43  ;;  %v8976_v17 = vpop.f32.mrb[54].mxu0  ;;  %v5832_v40 = vmul.f32 -1.442695, %v1384_v60  ;;  %v129_v43 = vld [vmem:[%s11624_s1 + $0x380] sm:$0xff] }
 0x158   :  { %v6854_v55 = vpop.eup %6853  ;;  %6873 = vrcp.f32 %v3199_v48  ;;  %11635 = vst [vmem:[#allocation9_spill] sm:$0xff] %v8976_v17  ;;  %v8978_v18 = vpop.f32.mrb[54].mxu1  ;;  %v1394_v48 = vadd.f32 %v8669_v20, %v286_v13  ;;  %v288_v20 = vld [vmem:[%s11625_s2 + $0x108] sm:$0xff]  ;;  %6457 = vmatprep.mubr.msk.f32.mxu0 %vm483_vm0, %v129_v43  ;;  %v5946_v13 = vmul.f32 -1.442695, %v1954_v47 }
 0x159   :  { %11636 = vst [vmem:[#allocation10_spill] sm:$0xff] %v8978_v18  ;;  %v6856_v10 = vpop.eup %6855  ;;  %6875 = vpow2.f32 %v5830_v8  ;;  %v8981_v61 = vpop.f32.mrb[55].mxu0  ;;  %4080 = vperm.xlu1 %6666, %v6852_v11   ;;  %v5831_v18 = vmul.f32 -1.442695, %v1379_v12  ;;  %v1389_v8 = vadd.f32 %v8674_v51, %v285_v24  ;;  %6458 = vmatmul.mubr.msk.f32.gmra.mrb[112].mxu0 %vm483_vm0, %v130_v56  ;;  %v1959_v12 = vadd.f32 %v8676_v52, %v399_v38  ;;  %v244_v52 = vld [vmem:[%s11624_s1 + $0x718] sm:$0xff] }
 0x15a   :  { %11637 = vst [vmem:[#allocation11_spill] sm:$0xff] %v8981_v61  ;;  %v8983_v19 = vpop.f32.mrb[55].mxu1  ;;  %v6858_v17 = vpop.eup %6857  ;;  %6877 = vpow2.f32 %v5829_v44  ;;  %v5945_v44 = vmul.f32 -1.442695, %v1949_v59  ;;  %v5834_v43 = vmul.f32 -1.442695, %v1394_v48 }
 0x15b   :  { %11638 = vst [vmem:[#allocation12_spill] sm:$0xff] %v8983_v19  ;;  %v6860_v60 = vpop.eup %6859  ;;  %6879 = vpow2.f32 %v5944_v49  ;;  %4075 = vperm.xlu0 %6665, %v6854_v55   ;;  %v1964_v19 = vadd.f32 %v8671_v41, %v400_v3  ;;  %v8999_v51 = vpop.f32.mrb[56].mxu0  ;;  %v1404_v49 = vadd.f32 %v8688_v63, %v288_v20  ;;  %v243_v41 = vld [vmem:[%s11624_s1 + $0x710] sm:$0xff]  ;;  %v5833_v59 = vmul.f32 -1.442695, %v1389_v8 }
 0x15c   :  { %v6862_v61 = vpop.eup %6861  ;;  %6881 = vpow2.f32 %v5943_v45  ;;  %v9001_v11 = vpop.f32.mrb[56].mxu1  ;;  %6628 = vmatprep.mubr.msk.f32.mxu1 %vm483_vm0, %v243_v41 }
 0x15d   :  { %v6864_v24 = vpop.eup %6863  ;;  %6883 = vpow2.f32 %v5832_v40  ;;  %v9004_v55 = vpop.f32.mrb[57].mxu0  ;;  %4650 = vperm.xlu1 %6666, %v6856_v10   ;;  %v5948_v63 = vmul.f32 -1.442695, %v1964_v19  ;;  %6629 = vmatmul.mubr.msk.f32.gmra.mrb[112].mxu1 %vm483_vm0, %v244_v52  ;;  %v5947_v40 = vmul.f32 -1.442695, %v1959_v12 }
 0x15e   :  { %v9006_v47 = vpop.f32.mrb[57].mxu1  ;;  %v6866_v45 = vpop.eup %6865  ;;  %6885 = vpow2.f32 %v5831_v18  ;;  %v5836_v18 = vmul.f32 -1.442695, %v1404_v49 }
 0x15f   :  { %v6868_v3 = vpop.eup %6867  ;;  %4645 = vperm.xlu0 %6665, %v6858_v17   ;;  %6887 = vpow2.f32 %v5946_v13  ;;  %v9016_v48 = vpop.f32.mrb[58].mxu0 }
 0x160   :  { %v6870_v38 = vpop.eup %6869  ;;  %6889 = vpow2.f32 %v5945_v44  ;;  %v9018_v56 = vpop.f32.mrb[58].mxu1 }
 0x161   :  { %11639 = vst [vmem:[#allocation13_spill] sm:$0xff] %v9018_v56  ;;  %v9020_v20 = vpop.eup %6871  ;;  %6891 = vpow2.f32 %v5834_v43  ;;  %v9022_v10 = vpop.f32.mrb[59].mxu0  ;;  %4090 = vperm.xlu1 %6666, %v6860_v60  }
 0x162   :  { %v9024_v8 = vpop.f32.mrb[59].mxu1  ;;  %v9026_v17 = vpop.eup %6873  ;;  %6893 = vpow2.f32 %v5833_v59 }
 0x163   :  { %11640 = vst [vmem:[#allocation14_spill] sm:$0xff] %v9024_v8  ;;  %v6876_v19 = vpop.eup %6875  ;;  %4085 = vperm.xlu0 %6665, %v6862_v61   ;;  %6895 = vpow2.f32 %v5948_v63  ;;  %v9028_v12 = vpop.f32.mrb[60].mxu0 }
 0x164   :  { %v6878_v13 = vpop.eup %6877  ;;  %v3088_v44 = vadd.f32 1.0, %v6876_v19  ;;  %6897 = vpow2.f32 %v5947_v40  ;;  %v9030_v43 = vpop.f32.mrb[61].mxu0 }
 0x165   :  { %v6880_v41 = vpop.eup %6879  ;;  %v3087_v52 = vadd.f32 1.0, %v6878_v13  ;;  %6899 = vpow2.f32 %v5836_v18  ;;  %v9032_v49 = vpop.f32.mrb[60].mxu1  ;;  %4660 = vperm.xlu1 %6666, %v6864_v24   ;;  %v287_v18 = vld [vmem:[%s11625_s2 + $0x100] sm:$0xff]  ;;  %v402_v24 = vld [vmem:[%s11625_s2 + $0x498] sm:$0xff] }
 0x166   :  { %v6882_v8 = vpop.eup %6881  ;;  %6901 = vrcp.f32 %v3088_v44  ;;  %v3202_v56 = vadd.f32 1.0, %v6880_v41  ;;  %v9034_v60 = vpop.f32.mrb[61].mxu1 }
 0x167   :  { %v6884_v61 = vpop.eup %6883  ;;  %6903 = vrcp.f32 %v3087_v52  ;;  %v3201_v59 = vadd.f32 1.0, %v6882_v8  ;;  %4655 = vperm.xlu0 %6665, %v6866_v45   ;;  %v9039_v19 = vpop.f32.mrb[62].mxu0  ;;  %v401_v52 = vld [vmem:[%s11625_s2 + $0x490] sm:$0xff] }
 0x168   :  { %v6886_v63 = vpop.eup %6885  ;;  %6905 = vrcp.f32 %v3202_v56  ;;  %v3090_v40 = vadd.f32 1.0, %v6884_v61  ;;  %11641 = vst [vmem:[#allocation15_spill] sm:$0xff] %v9039_v19  ;;  %v9044_v41 = vpop.f32.mrb[63].mxu0  ;;  %v1399_v19 = vadd.f32 %v8694_v6, %v287_v18  ;;  %v404_v6 = vld [vmem:[%s11625_s2 + $0x4a8] sm:$0xff] }
 0x169   :  { %v6888_v13 = vpop.eup %6887  ;;  %6907 = vrcp.f32 %v3201_v59  ;;  %v3089_v44 = vadd.f32 1.0, %v6886_v63  ;;  %11642 = vst [vmem:[#allocation16_spill] sm:$0xff] %v9044_v41  ;;  %v9046_v8 = vpop.f32.mrb[62].mxu1  ;;  %4100 = vperm.xlu1 %6666, %v6868_v3   ;;  %v1974_v3 = vadd.f32 %v8690_v2, %v402_v24  ;;  %v403_v24 = vld [vmem:[%s11625_s2 + $0x4a0] sm:$0xff] }
 0x16a   :  { %11643 = vst [vmem:[#allocation17_spill] sm:$0xff] %v9046_v8  ;;  %v6890_v45 = vpop.eup %6889  ;;  %6909 = vrcp.f32 %v3090_v40  ;;  %v3204_v56 = vadd.f32 1.0, %v6888_v13  ;;  %v9051_v61 = vpop.f32.mrb[63].mxu1  ;;  %v290_v8 = vld [vmem:[%s11625_s2 + $0x118] sm:$0xff]  ;;  %v289_v13 = vld [vmem:[%s11625_s2 + $0x110] sm:$0xff] }
 0x16b   :  { %11644 = vst [vmem:[#allocation18_spill] sm:$0xff] %v9051_v61  ;;  %v6892_v59 = vpop.eup %6891  ;;  %6911 = vrcp.f32 %v3089_v44  ;;  %v3203_v63 = vadd.f32 1.0, %v6890_v45  ;;  %4095 = vperm.xlu0 %6665, %v6870_v38   ;;  %v1969_v38 = vadd.f32 %v8696_v7, %v401_v52  ;;  %v9065_v18 = vpop.f32.mrb[64].mxu0  ;;  %v1414_v2 = vadd.f32 %v8708_v15, %v290_v8 }
 0x16c   :  { %v6894_v41 = vpop.eup %6893  ;;  %6913 = vrcp.f32 %v3204_v56  ;;  %v3092_v40 = vadd.f32 1.0, %v6892_v59  ;;  %v5835_v59 = vmul.f32 -1.442695, %v1399_v19  ;;  %v5950_v8 = vmul.f32 -1.442695, %v1974_v3 }
 0x16d   :  { %v6896_v61 = vpop.eup %6895  ;;  %6915 = vrcp.f32 %v3203_v63  ;;  %v3091_v44 = vadd.f32 1.0, %v6894_v41  ;;  %4670 = vperm.xlu1 %6666, %v9020_v20   ;;  %v9072_v41 = vpop.f32.mrb[65].mxu0  ;;  %v1409_v63 = vadd.f32 %v8710_v23, %v289_v13  ;;  %v292_v20 = vld [vmem:[%s11625_s2 + $0x128] sm:$0xff]  ;;  %v5949_v19 = vmul.f32 -1.442695, %v1969_v38  ;;  %v406_v23 = vld [vmem:[%s11625_s2 + $0x4b8] sm:$0xff] }
 0x16e   :  { %v6898_v45 = vpop.eup %6897  ;;  %6917 = vrcp.f32 %v3092_v40  ;;  %v3206_v56 = vadd.f32 1.0, %v6896_v61  ;;  %v1984_v40 = vadd.f32 %v8712_v26, %v404_v6  ;;  %v9087_v13 = vpop.f32.mrb[64].mxu1  ;;  %v5838_v3 = vmul.f32 -1.442695, %v1414_v2  ;;  %v405_v6 = vld [vmem:[%s11625_s2 + $0x4b0] sm:$0xff] }
 0x16f   :  { %v6900_v7 = vpop.eup %6899  ;;  %6919 = vrcp.f32 %v3091_v44  ;;  %v3205_v52 = vadd.f32 1.0, %v6898_v45  ;;  %4665 = vperm.xlu0 %6665, %v9026_v17   ;;  %v291_v44 = vld [vmem:[%s11625_s2 + $0x120] sm:$0xff]  ;;  %v1979_v17 = vadd.f32 %v8720_v14, %v403_v24  ;;  %v1424_v26 = vadd.f32 %v8727_v39, %v292_v20  ;;  %v293_v20 = vld [vmem:[%s11625_s2 + $0x130] sm:$0xff] }
 0x170   :  { %v6902_v61 = vpop.eup %6901  ;;  %6921 = vrcp.f32 %v3206_v56  ;;  %v3094_v15 = vadd.f32 1.0, %v6900_v7  ;;  %v9093_v7 = vpop.f32.mrb[65].mxu1  ;;  %v5837_v14 = vmul.f32 -1.442695, %v1409_v63  ;;  %v1419_v24 = vadd.f32 %v8732_v30, %v291_v44 }
 0x171   :  { %v6904_v45 = vpop.eup %6903  ;;  %6923 = vrcp.f32 %v3205_v52  ;;  %4110 = vperm.xlu1 %6666, %v6902_v61   ;;  %11645 = vst [vmem:[#allocation19_spill] sm:$0xff] %v9093_v7  ;;  %v294_v52 = vld [vmem:[%s11625_s2 + $0x138] sm:$0xff]  ;;  %v5952_v2 = vmul.f32 -1.442695, %v1984_v40  ;;  %v1994_v39 = vadd.f32 %v8734_v34, %v406_v23  ;;  %v1989_v63 = vadd.f32 %v8742_v5, %v405_v6 }
 0x172   :  { %v6906_v56 = vpop.eup %6905  ;;  %6925 = vrcp.f32 %v3094_v15  ;;  %v5840_v44 = vmul.f32 -1.442695, %v1424_v26  ;;  %v5839_v23 = vmul.f32 -1.442695, %v1419_v24  ;;  %v1429_v7 = vadd.f32 %v8764_v31, %v293_v20 }
 0x173   :  { %v6908_v38 = vpop.eup %6907  ;;  %6927 = vpow2.f32 %v5835_v59  ;;  %4105 = vperm.xlu0 %6665, %v6904_v45   ;;  %v5951_v59 = vmul.f32 -1.442695, %v1979_v17  ;;  %v9104_v45 = vpop.f32.mrb[66].mxu0  ;;  %v5954_v17 = vmul.f32 -1.442695, %v1994_v39 }
 0x174   :  { %v6910_v61 = vpop.eup %6909  ;;  %6929 = vpow2.f32 %v5950_v8  ;;  %11646 = vst [vmem:[#allocation20_spill] sm:$0xff] %v9104_v45  ;;  %v1434_v8 = vadd.f32 %v8758_v28, %v294_v52  ;;  %v9107_v40 = vpop.f32.mrb[67].mxu0  ;;  %v5953_v6 = vmul.f32 -1.442695, %v1989_v63 }
 0x175   :  { %v6912_v15 = vpop.eup %6911  ;;  %6931 = vpow2.f32 %v5949_v19  ;;  %4680 = vperm.xlu1 %6666, %v6906_v56   ;;  %v9110_v45 = vpop.f32.mrb[66].mxu1 }
 0x176   :  { %v6914_v30 = vpop.eup %6913  ;;  %6933 = vpow2.f32 %v5838_v3  ;;  %v5842_v28 = vmul.f32 -1.442695, %v1434_v8  ;;  %v9112_v3 = vpop.f32.mrb[67].mxu1 }
 0x177   :  { %v6916_v34 = vpop.eup %6915  ;;  %6935 = vpow2.f32 %v5837_v14  ;;  %4675 = vperm.xlu0 %6665, %v6908_v38   ;;  %v5841_v38 = vmul.f32 -1.442695, %v1429_v7  ;;  %v9116_v24 = vpop.f32.mrb[68].mxu0 }
 0x178   :  { %v6918_v19 = vpop.eup %6917  ;;  %6937 = vpow2.f32 %v5952_v2  ;;  %v9126_v8 = vpop.f32.mrb[68].mxu1 }
 0x179   :  { %v6920_v5 = vpop.eup %6919  ;;  %6939 = vpow2.f32 %v5951_v59  ;;  %4120 = vperm.xlu1 %6666, %v6910_v61   ;;  %v9118_v61 = vpop.f32.mrb[69].mxu0  ;;  %v408_v59 = vld [vmem:[%s11625_s2 + $0x4c8] sm:$0xff] }
 0x17a   :  { %v6922_v56 = vpop.eup %6921  ;;  %6941 = vpow2.f32 %v5840_v44 }
 0x17b   :  { %v6924_v26 = vpop.eup %6923  ;;  %4115 = vperm.xlu0 %6665, %v6912_v15   ;;  %6943 = vpow2.f32 %v5839_v23 }
 0x17c   :  { %v9114_v14 = vpop.eup %6925  ;;  %6945 = vpow2.f32 %v5954_v17  ;;  %v9128_v17 = vpop.f32.mrb[69].mxu1 }
 0x17d   :  { %v6928_v31 = vpop.eup %6927  ;;  %6947 = vpow2.f32 %v5953_v6  ;;  %4690 = vperm.xlu1 %6666, %v6914_v30   ;;  %v407_v30 = vld [vmem:[%s11625_s2 + $0x4c0] sm:$0xff] }
 0x17e   :  { %v6930_v52 = vpop.eup %6929  ;;  %v3093_v2 = vadd.f32 1.0, %v6928_v31  ;;  %6949 = vpow2.f32 %v5842_v28 }
 0x17f   :  { %v6932_v39 = vpop.eup %6931  ;;  %v3208_v20 = vadd.f32 1.0, %v6930_v52  ;;  %4685 = vperm.xlu0 %6665, %v6916_v34   ;;  %6951 = vpow2.f32 %v5841_v38  ;;  %v2004_v38 = vadd.f32 %v8766_v36, %v408_v59  ;;  %v410_v59 = vld [vmem:[%s11625_s2 + $0x4d8] sm:$0xff] }
 0x180   :  { %v6934_v15 = vpop.eup %6933  ;;  %6953 = vrcp.f32 %v3093_v2  ;;  %v3207_v7 = vadd.f32 1.0, %v6932_v39  ;;  %v1999_v2 = vadd.f32 %v8776_v42, %v407_v30  ;;  %v296_v39 = vld [vmem:[%s11625_s2 + $0x148] sm:$0xff] }
 0x181   :  { %v6936_v63 = vpop.eup %6935  ;;  %6955 = vrcp.f32 %v3208_v20  ;;  %v3096_v44 = vadd.f32 1.0, %v6934_v15  ;;  %4130 = vperm.xlu1 %6666, %v6918_v19   ;;  %v295_v15 = vld [vmem:[%s11625_s2 + $0x140] sm:$0xff]  ;;  %v3746_v42 = vld [vmem:[%s11626_s3 + $0x8] sm:$0xff] }
 0x182   :  { %v6938_v23 = vpop.eup %6937  ;;  %6957 = vrcp.f32 %v3207_v7  ;;  %v3095_v34 = vadd.f32 1.0, %v6936_v63  ;;  %v9138_v7 = vpop.f32.mrb[70].mxu0 }
 0x183   :  { %v6940_v6 = vpop.eup %6939  ;;  %6959 = vrcp.f32 %v3096_v44  ;;  %v3210_v28 = vadd.f32 1.0, %v6938_v23  ;;  %4125 = vperm.xlu0 %6665, %v6920_v5   ;;  %v9146_v63 = vpop.f32.mrb[71].mxu0  ;;  %v5956_v23 = vmul.f32 -1.442695, %v2004_v38 }
 0x184   :  { %v6942_v31 = vpop.eup %6941  ;;  %6961 = vrcp.f32 %v3095_v34  ;;  %v3209_v52 = vadd.f32 1.0, %v6940_v6  ;;  %11647 = vst [vmem:[#allocation21_spill] sm:$0xff] %v9146_v63  ;;  %v1444_v34 = vadd.f32 %v8795_v9, %v296_v39  ;;  %v409_v6 = vld [vmem:[%s11625_s2 + $0x4d0] sm:$0xff]  ;;  %v2014_v39 = vadd.f32 %v8800_v22, %v410_v59  ;;  %v412_v22 = vld [vmem:[%s11625_s2 + $0x4e8] sm:$0xff] }
 0x185   :  { %v6944_v20 = vpop.eup %6943  ;;  %6963 = vrcp.f32 %v3210_v28  ;;  %v3098_v19 = vadd.f32 1.0, %v6942_v31  ;;  %4700 = vperm.xlu1 %6666, %v6922_v56   ;;  %v3860_v56 = vld [vmem:[%s11626_s3 + $0x398] sm:$0xff] }
 0x186   :  { %v6946_v5 = vpop.eup %6945  ;;  %6965 = vrcp.f32 %v3209_v52  ;;  %v3097_v36 = vadd.f32 1.0, %v6944_v20  ;;  %v5955_v52 = vmul.f32 -1.442695, %v1999_v2 }
 0x187   :  { %v6948_v44 = vpop.eup %6947  ;;  %6967 = vrcp.f32 %v3098_v19  ;;  %v3212_v30 = vadd.f32 1.0, %v6946_v5  ;;  %4695 = vperm.xlu0 %6665, %v6924_v26   ;;  %v3981_v20 = vpop.permute.xlu0 %3980  ;;  %v1439_v19 = vadd.f32 %v8798_v16, %v295_v15  ;;  %v298_v26 = vld [vmem:[%s11625_s2 + $0x158] sm:$0xff] }
 0x188   :  { %v6950_v28 = vpop.eup %6949  ;;  %6969 = vrcp.f32 %v3097_v36  ;;  %v3211_v31 = vadd.f32 1.0, %v6948_v44  ;;  %v4551_v63 = vpop.permute.xlu1 %4550  ;;  %v5114_v9 = vmul.f32 %v3981_v20, %v3746_v42  ;;  %v297_v36 = vld [vmem:[%s11625_s2 + $0x150] sm:$0xff]  ;;  %v2009_v42 = vadd.f32 %v8812_v37, %v409_v6 }
 0x189   :  { %v6952_v38 = vpop.eup %6951  ;;  %6971 = vrcp.f32 %v3212_v30  ;;  %v3100_v5 = vadd.f32 1.0, %v6950_v28  ;;  %v9163_v44 = vpop.f32.mrb[70].mxu1  ;;  %v5228_v15 = vmul.f32 %v4551_v63, %v3860_v56  ;;  %4140 = vperm.xlu1 %6666, %v9114_v14   ;;  %v3745_v30 = vld [vmem:[%s11626_s3] sm:$0xff]  ;;  %v5844_v14 = vmul.f32 -1.442695, %v1444_v34 }
 0x18a   :  { %v6954_v2 = vpop.eup %6953  ;;  %6973 = vrcp.f32 %v3211_v31  ;;  %v3099_v16 = vadd.f32 1.0, %v6952_v38  ;;  %v9173_v59 = vpop.f32.mrb[71].mxu1  ;;  %5343 = vst.msk [vmem:[%s11627_s4 + $0x8] sm:$0xff] %vm5341_vm4, %v5114_v9  ;;  %v1454_v37 = vadd.f32 %v8824_v53, %v298_v26  ;;  %v411_v56 = vld [vmem:[%s11625_s2 + $0x4e0] sm:$0xff]  ;;  %v5843_v31 = vmul.f32 -1.442695, %v1439_v19 }
 0x18b   :  { %v6956_v28 = vpop.eup %6955  ;;  %6975 = vrcp.f32 %v3100_v5  ;;  %4135 = vperm.xlu0 %6665, %v6954_v2   ;;  %v3976_v20 = vpop.permute.xlu0 %3975  ;;  %v1449_v34 = vadd.f32 %v8829_v32, %v297_v36  ;;  %v300_v38 = vld [vmem:[%s11625_s2 + $0x168] sm:$0xff]  ;;  %v5958_v9 = vmul.f32 -1.442695, %v2014_v39  ;;  %v2024_v2 = vadd.f32 %v8826_v54, %v412_v22  ;;  %v414_v54 = vld [vmem:[%s11625_s2 + $0x4f8] sm:$0xff] }
 0x18c   :  { %v6958_v6 = vpop.eup %6957  ;;  %6977 = vrcp.f32 %v3099_v16  ;;  %v3991_v26 = vpop.permute.xlu1 %3990  ;;  %v5113_v5 = vmul.f32 %v3976_v20, %v3745_v30  ;;  %v299_v16 = vld [vmem:[%s11625_s2 + $0x160] sm:$0xff]  ;;  %v5957_v36 = vmul.f32 -1.442695, %v2009_v42  ;;  %v2019_v30 = vadd.f32 %v8831_v62, %v411_v56 }
 0x18d   :  { %v6960_v53 = vpop.eup %6959  ;;  %6979 = vpow2.f32 %v5956_v23  ;;  %4710 = vperm.xlu1 %6666, %v6956_v28   ;;  %v5846_v42 = vmul.f32 -1.442695, %v1454_v37  ;;  %v1464_v62 = vadd.f32 %v8843_v27, %v300_v38  ;;  %v1459_v56 = vadd.f32 %v8847_v29, %v299_v16 }
 0x18e   :  { %v6962_v19 = vpop.eup %6961  ;;  %6981 = vpow2.f32 %v5955_v52  ;;  %v2034_v37 = vadd.f32 %v8845_v35, %v414_v54 }
 0x18f   :  { %v6964_v22 = vpop.eup %6963  ;;  %6983 = vpow2.f32 %v5844_v14  ;;  %4705 = vperm.xlu0 %6665, %v6958_v6   ;;  %v4546_v14 = vpop.permute.xlu0 %4545  ;;  %v5847_v16 = vmul.f32 -1.442695, %v1459_v56 }
 0x190   :  { %v6966_v28 = vpop.eup %6965  ;;  %6985 = vpow2.f32 %v5843_v31  ;;  %v4561_v6 = vpop.permute.xlu1 %4560 }
 0x191   :  { %v3748_v63 = vld [vmem:[%s11626_s3 + $0x18] sm:$0xff]  ;;  %v6968_v20 = vpop.eup %6967  ;;  %6987 = vpow2.f32 %v5958_v9  ;;  %4150 = vperm.xlu1 %6666, %v6960_v53   ;;  %v5848_v53 = vmul.f32 -1.442695, %v1464_v62 }
 0x192   :  { %5457 = vst.msk [vmem:[%s11627_s4 + $0x398] sm:$0xff] %vm5341_vm4, %v5228_v15  ;;  %v9198_v15 = vpop.f32.mrb[72].mxu0  ;;  %v5116_v32 = vmul.f32 %v3991_v26, %v3748_v63  ;;  %v5845_v63 = vmul.f32 -1.442695, %v1449_v34  ;;  %v6970_v27 = vpop.eup %6969  ;;  %6989 = vpow2.f32 %v5957_v36  ;;  %v5959_v34 = vmul.f32 -1.442695, %v2019_v30 }
 0x193   :  { %v9207_v39 = vpop.f32.mrb[73].mxu0  ;;  %v9230_v29 = vpop.eup %6971  ;;  %4145 = vperm.xlu0 %6665, %v6962_v19   ;;  %6991 = vpow2.f32 %v5846_v42  ;;  %v5962_v30 = vmul.f32 -1.442695, %v2034_v37 }
 0x194   :  { %11648 = vst [vmem:[#allocation22_spill] sm:$0xff] %v9207_v39  ;;  %v9223_v39 = vpop.f32.mrb[72].mxu1  ;;  %v9239_v9 = vpop.eup %6973  ;;  %6993 = vpow2.f32 %v5845_v63 }
 0x195   :  { %v9245_v36 = vpop.eup %6975  ;;  %v9247_v54 = vpop.f32.mrb[74].mxu0  ;;  %4720 = vperm.xlu1 %6666, %v6964_v22  }
 0x197   :  { %4715 = vperm.xlu0 %6665, %v6966_v28  }
 0x199   :  { %v3859_v23 = vld [vmem:[%s11626_s3 + $0x390] sm:$0xff]  ;;  %4160 = vperm.xlu1 %6666, %v6968_v20  }
 0x19a   :  { %5342 = vst.msk [vmem:[%s11627_s4] sm:$0xff] %vm5341_vm4, %v5113_v5  ;;  %v5227_v26 = vmul.f32 %v4546_v14, %v3859_v23  ;;  %v5960_v5 = vmul.f32 -1.442695, %v2024_v2  ;;  %v4556_v2 = vpop.permute.xlu0 %4555  ;;  %v3986_v23 = vpop.permute.xlu1 %3985 }
 0x19b   :  { %v9254_v14 = vpop.f32.mrb[75].mxu0  ;;  %4155 = vperm.xlu0 %6665, %v6970_v27  }
 0x19c   :  { %6995 = vpow2.f32 %v5960_v5 }
 0x19d   :  { %6997 = vpow2.f32 %v5959_v34  ;;  %4730 = vperm.xlu1 %6666, %v9230_v29  }
 0x19e   :  { %6999 = vpow2.f32 %v5848_v53 }
 0x19f   :  { %7001 = vpow2.f32 %v5847_v16  ;;  %v413_v16 = vld [vmem:[%s11625_s2 + $0x4f0] sm:$0xff]  ;;  %4725 = vperm.xlu0 %6665, %v9239_v9  }
 0x1a0   :  { %7003 = vpow2.f32 %v5962_v30  ;;  %v2029_v27 = vadd.f32 %v8849_v0, %v413_v16  ;;  %v416_v16 = vld [vmem:[%s11625_s2 + $0x508] sm:$0xff] }
 0x1a1   :  { %v3862_v52 = vld [vmem:[%s11626_s3 + $0x3a8] sm:$0xff]  ;;  %4170 = vperm.xlu1 %6666, %v9245_v36  }
 0x1a2   :  { %5345 = vst.msk [vmem:[%s11627_s4 + $0x18] sm:$0xff] %vm5341_vm4, %v5116_v32  ;;  %v5230_v31 = vmul.f32 %v4561_v6, %v3862_v52  ;;  %v9228_v32 = vpop.f32.mrb[73].mxu1  ;;  %v9249_v52 = vpop.eup %6977 }
 0x1a3   :  { %v6980_v63 = vpop.eup %6979  ;;  %v9267_v28 = vpop.f32.mrb[74].mxu1  ;;  %4165 = vperm.xlu0 %6665, %v9249_v52  }
 0x1a4   :  { %v6982_v22 = vpop.eup %6981  ;;  %v3214_v6 = vadd.f32 1.0, %v6980_v63 }
 0x1a5   :  { %v6984_v5 = vpop.eup %6983  ;;  %v3213_v37 = vadd.f32 1.0, %v6982_v22 }
 0x1a6   :  { %v6986_v34 = vpop.eup %6985  ;;  %7005 = vrcp.f32 %v3214_v6 }
 0x1a7   :  { %7007 = vrcp.f32 %v3213_v37  ;;  %v3101_v30 = vadd.f32 1.0, %v6986_v34  ;;  %v9292_v37 = vpop.f32.mrb[76].mxu0 }
 0x1a8   :  { %11650 = vst [vmem:[#allocation24_spill] sm:$0xff] %v9292_v37 }
 0x1a9   :  { %v3861_v38 = vld [vmem:[%s11626_s3 + $0x3a0] sm:$0xff] }
 0x1aa   :  { %5456 = vst.msk [vmem:[%s11627_s4 + $0x390] sm:$0xff] %vm5341_vm4, %v5227_v26  ;;  %v5229_v19 = vmul.f32 %v4556_v2, %v3861_v38  ;;  %v3996_v26 = vpop.permute.xlu0 %3995 }
 0x1ae   :  { %v4566_v63 = vpop.permute.xlu0 %4565 }
 0x1b1   :  { %v3747_v35 = vld [vmem:[%s11626_s3 + $0x10] sm:$0xff] }
 0x1b2   :  { %5459 = vst.msk [vmem:[%s11627_s4 + $0x3a8] sm:$0xff] %vm5341_vm4, %v5230_v31  ;;  %v5115_v42 = vmul.f32 %v3986_v23, %v3747_v35  ;;  %v4001_v31 = vpop.permute.xlu1 %4000  ;;  %v3102_v35 = vadd.f32 1.0, %v6984_v5  ;;  %v9275_v23 = vpop.f32.mrb[75].mxu1  ;;  %v302_v5 = vld [vmem:[%s11625_s2 + $0x178] sm:$0xff] }
 0x1b3   :  { %11649 = vst [vmem:[#allocation23_spill] sm:$0xff] %v9275_v23 }
 0x1b4   :  { %7009 = vrcp.f32 %v3102_v35  ;;  %v301_v35 = vld [vmem:[%s11625_s2 + $0x170] sm:$0xff] }
 0x1b5   :  { %7011 = vrcp.f32 %v3101_v30 }
 0x1b6   :  { %v4571_v6 = vpop.permute.xlu1 %4570 }
 0x1b9   :  { %v3749_v62 = vld [vmem:[%s11626_s3 + $0x20] sm:$0xff] }
 0x1ba   :  { %5458 = vst.msk [vmem:[%s11627_s4 + $0x3a0] sm:$0xff] %vm5341_vm4, %v5229_v19  ;;  %v5117_v38 = vmul.f32 %v3996_v26, %v3749_v62  ;;  %v6988_v19 = vpop.eup %6987 }
 0x1bb   :  { %v3216_v62 = vadd.f32 1.0, %v6988_v19 }
 0x1bd   :  { %7013 = vrcp.f32 %v3216_v62 }
 0x1c1   :  { %v3750_v56 = vld [vmem:[%s11626_s3 + $0x28] sm:$0xff] }
 0x1c2   :  { %5344 = vst.msk [vmem:[%s11627_s4 + $0x10] sm:$0xff] %vm5341_vm4, %v5115_v42  ;;  %v5118_v53 = vmul.f32 %v4001_v31, %v3750_v56  ;;  %v6990_v42 = vpop.eup %6989 }
 0x1c3   :  { %v6992_v56 = vpop.eup %6991  ;;  %v3215_v22 = vadd.f32 1.0, %v6990_v42  ;;  %v415_v42 = vld [vmem:[%s11625_s2 + $0x500] sm:$0xff] }
 0x1c4   :  { %v6994_v31 = vpop.eup %6993 }
 0x1c5   :  { %7015 = vrcp.f32 %v3215_v22  ;;  %v3103_v0 = vadd.f32 1.0, %v6994_v31  ;;  %v4011_v22 = vpop.permute.xlu1 %4010  ;;  %v9326_v31 = vpop.f32.mrb[76].mxu1 }
 0x1c6   :  { %11652 = vst [vmem:[#allocation26_spill] sm:$0xff] %v9326_v31 }
 0x1c9   :  { %v3863_v2 = vld [vmem:[%s11626_s3 + $0x3b0] sm:$0xff] }
 0x1ca   :  { %5346 = vst.msk [vmem:[%s11627_s4 + $0x20] sm:$0xff] %vm5341_vm4, %v5117_v38  ;;  %v5231_v26 = vmul.f32 %v4566_v63, %v3863_v2  ;;  %v3104_v38 = vadd.f32 1.0, %v6992_v56  ;;  %v6996_v2 = vpop.eup %6995  ;;  %v5961_v56 = vmul.f32 -1.442695, %v2029_v27  ;;  %v303_v27 = vld [vmem:[%s11625_s2 + $0x180] sm:$0xff] }
 0x1cb   :  { %v6998_v19 = vpop.eup %6997  ;;  %v3218_v30 = vadd.f32 1.0, %v6996_v2  ;;  %v11653_v2 = vld [vmem:[#allocation2_spill] sm:$0xff] }
 0x1cc   :  { %7017 = vrcp.f32 %v3104_v38  ;;  %v7000_v62 = vpop.eup %6999  ;;  %v3217_v63 = vadd.f32 1.0, %v6998_v19 }
 0x1cd   :  { %7019 = vrcp.f32 %v3103_v0  ;;  %v7002_v38 = vpop.eup %7001  ;;  %v2044_v0 = vadd.f32 %v11653_v2, %v416_v16  ;;  %v418_v16 = vld [vmem:[%s11625_s2 + $0x518] sm:$0xff] }
 0x1ce   :  { %7021 = vrcp.f32 %v3218_v30  ;;  %v3105_v19 = vadd.f32 1.0, %v7002_v38  ;;  %v11655_v30 = vld [vmem:[#allocation3_spill] sm:$0xff] }
 0x1cf   :  { %7023 = vrcp.f32 %v3217_v63  ;;  %v2039_v36 = vadd.f32 %v11655_v30, %v415_v42  ;;  %v417_v42 = vld [vmem:[%s11625_s2 + $0x510] sm:$0xff]  ;;  %v2054_v30 = vadd.f32 %v8885_v4, %v418_v16  ;;  %v420_v4 = vld [vmem:[%s11625_s2 + $0x528] sm:$0xff]  ;;  %v11659_v16 = vld [vmem:[#allocation5_spill] sm:$0xff] }
 0x1d1   :  { %v3864_v20 = vld [vmem:[%s11626_s3 + $0x3b8] sm:$0xff] }
 0x1d2   :  { %5347 = vst.msk [vmem:[%s11627_s4 + $0x28] sm:$0xff] %vm5341_vm4, %v5118_v53  ;;  %v5232_v34 = vmul.f32 %v4571_v6, %v3864_v20  ;;  %v9298_v53 = vpop.f32.mrb[77].mxu0  ;;  %5460 = vst.msk [vmem:[%s11627_s4 + $0x3b0] sm:$0xff] %vm5341_vm4, %v5231_v26  ;;  %v1474_v20 = vadd.f32 %v8865_v50, %v302_v5  ;;  %v1469_v6 = vadd.f32 %v8869_v1, %v301_v35  ;;  %v304_v26 = vld [vmem:[%s11625_s2 + $0x188] sm:$0xff]  ;;  %v3106_v50 = vadd.f32 1.0, %v7000_v62  ;;  %v9333_v1 = vpop.f32.mrb[77].mxu1 }
 0x1d3   :  { %11651 = vst [vmem:[#allocation25_spill] sm:$0xff] %v9298_v53  ;;  %11654 = vst [vmem:[#allocation2_spill] sm:$0xff] %v9333_v1  ;;  %v7004_v35 = vpop.eup %7003  ;;  %v1484_v63 = vadd.f32 %v8881_v33, %v304_v26  ;;  %v9362_v33 = vpop.f32.mrb[78].mxu0  ;;  %v5963_v1 = vmul.f32 -1.442695, %v2039_v36 }
 0x1d4   :  { %v7006_v62 = vpop.eup %7005  ;;  %7025 = vrcp.f32 %v3106_v50  ;;  %v5849_v50 = vmul.f32 -1.442695, %v1469_v6  ;;  %11656 = vst [vmem:[#allocation3_spill] sm:$0xff] %v9362_v33  ;;  %v9368_v6 = vpop.f32.mrb[79].mxu0  ;;  %v11661_v33 = vld [vmem:[#allocation7_spill] sm:$0xff] }
 0x1d5   :  { %v7008_v38 = vpop.eup %7007  ;;  %7027 = vrcp.f32 %v3105_v19  ;;  %4740 = vperm.xlu1 %6666, %v7006_v62   ;;  %v5964_v19 = vmul.f32 -1.442695, %v2044_v0  ;;  %11657 = vst [vmem:[#allocation27_spill] sm:$0xff] %v9368_v6  ;;  %v5852_v36 = vmul.f32 -1.442695, %v1484_v63  ;;  %v2064_v31 = vadd.f32 %v11661_v33, %v420_v4 }
 0x1d6   :  { %v7010_v26 = vpop.eup %7009  ;;  %4735 = vperm.xlu0 %6665, %v7008_v38   ;;  %v5966_v6 = vmul.f32 -1.442695, %v2054_v30 }
 0x1d9   :  { %v3752_v29 = vld [vmem:[%s11626_s3 + $0x38] sm:$0xff]  ;;  %4180 = vperm.xlu1 %6666, %v7010_v26  }
 0x1da   :  { %5461 = vst.msk [vmem:[%s11627_s4 + $0x3b8] sm:$0xff] %vm5341_vm4, %v5232_v34  ;;  %v5120_v5 = vmul.f32 %v4011_v22, %v3752_v29  ;;  %v4006_v34 = vpop.permute.xlu0 %4005  ;;  %v3220_v22 = vadd.f32 1.0, %v7004_v35 }
 0x1dc   :  { %7029 = vrcp.f32 %v3220_v22  ;;  %v11658_v22 = vld [vmem:[#allocation4_spill] sm:$0xff] }
 0x1dd   :  { %7031 = vpow2.f32 %v5961_v56  ;;  %v2049_v62 = vadd.f32 %v11658_v22, %v417_v42  ;;  %v419_v42 = vld [vmem:[%s11625_s2 + $0x520] sm:$0xff]  ;;  %v9393_v22 = vpop.f32.mrb[78].mxu1 }
 0x1de   :  { %v4576_v35 = vpop.permute.xlu0 %4575 }
 0x1e1   :  { %v3751_v9 = vld [vmem:[%s11626_s3 + $0x30] sm:$0xff]  ;;  %v3866_v29 = vld [vmem:[%s11626_s3 + $0x3c8] sm:$0xff] }
 0x1e2   :  { %v5119_v53 = vmul.f32 %v4006_v34, %v3751_v9  ;;  %5349 = vst.msk [vmem:[%s11627_s4 + $0x38] sm:$0xff] %vm5341_vm4, %v5120_v5  ;;  %v5850_v9 = vmul.f32 -1.442695, %v1474_v20  ;;  %v4581_v5 = vpop.permute.xlu1 %4580  ;;  %v1479_v20 = vadd.f32 %v8883_v46, %v303_v27  ;;  %v306_v34 = vld [vmem:[%s11625_s2 + $0x198] sm:$0xff]  ;;  %v7012_v46 = vpop.eup %7011 }
 0x1e3   :  { %v5234_v2 = vmul.f32 %v4581_v5, %v3866_v29  ;;  %v7014_v0 = vpop.eup %7013  ;;  %4175 = vperm.xlu0 %6665, %v7012_v46  }
 0x1e4   :  { %7033 = vpow2.f32 %v5850_v9  ;;  %v7016_v38 = vpop.eup %7015  ;;  %v5851_v5 = vmul.f32 -1.442695, %v1479_v20  ;;  %4750 = vperm.xlu1 %6666, %v7014_v0  }
 0x1e5   :  { %7035 = vpow2.f32 %v5849_v50  ;;  %v7018_v63 = vpop.eup %7017  ;;  %v9396_v50 = vpop.f32.mrb[79].mxu1 }
 0x1e6   :  { %v4021_v9 = vpop.permute.xlu1 %4020  ;;  %7037 = vpow2.f32 %v5964_v19  ;;  %v7020_v37 = vpop.eup %7019 }
 0x1e7   :  { %7039 = vpow2.f32 %v5963_v1  ;;  %v7022_v19 = vpop.eup %7021  ;;  %4745 = vperm.xlu0 %6665, %v7016_v38   ;;  %v9439_v38 = vpop.f32.mrb[80].mxu1 }
 0x1e8   :  { %7041 = vpow2.f32 %v5852_v36  ;;  %v9409_v26 = vpop.eup %7023  ;;  %v5968_v36 = vmul.f32 -1.442695, %v2064_v31  ;;  %4190 = vperm.xlu1 %6666, %v7018_v63  }
 0x1e9   :  { %v3865_v52 = vld [vmem:[%s11626_s3 + $0x3c0] sm:$0xff]  ;;  %7043 = vpow2.f32 %v5851_v5 }
 0x1ea   :  { %5348 = vst.msk [vmem:[%s11627_s4 + $0x30] sm:$0xff] %vm5341_vm4, %v5119_v53  ;;  %v305_v53 = vld [vmem:[%s11625_s2 + $0x190] sm:$0xff]  ;;  %v5233_v27 = vmul.f32 %v4576_v35, %v3865_v52  ;;  %v1494_v52 = vadd.f32 %v11659_v16, %v306_v34  ;;  %v4016_v16 = vpop.permute.xlu0 %4015  ;;  %v4591_v30 = vpop.permute.xlu1 %4590  ;;  %7045 = vpow2.f32 %v5966_v6 }
 0x1eb   :  { %4185 = vperm.xlu0 %6665, %v7020_v37  }
 0x1ec   :  { %v5854_v33 = vmul.f32 -1.442695, %v1494_v52  ;;  %4760 = vperm.xlu1 %6666, %v7022_v19  }
 0x1ee   :  { %v4031_v0 = vpop.permute.xlu1 %4030 }
 0x1ef   :  { %4755 = vperm.xlu0 %6665, %v9409_v26   ;;  %v422_v26 = vld [vmem:[%s11625_s2 + $0x538] sm:$0xff] }
 0x1f1   :  { %v3754_v29 = vld [vmem:[%s11626_s3 + $0x48] sm:$0xff] }
 0x1f2   :  { %5463 = vst.msk [vmem:[%s11627_s4 + $0x3c8] sm:$0xff] %vm5341_vm4, %v5234_v2  ;;  %v11660_v2 = vld [vmem:[#allocation6_spill] sm:$0xff]  ;;  %v5122_v34 = vmul.f32 %v4021_v9, %v3754_v29  ;;  %v9415_v29 = vpop.f32.mrb[80].mxu0 }
 0x1f3   :  { %v1489_v35 = vadd.f32 %v11660_v2, %v305_v53  ;;  %v5965_v53 = vmul.f32 -1.442695, %v2049_v62  ;;  %v9417_v62 = vpop.eup %7025  ;;  %v9419_v52 = vpop.f32.mrb[81].mxu0 }
 0x1f4   :  { %4200 = vperm.xlu1 %6666, %v9417_v62   ;;  %v309_v62 = vld [vmem:[%s11625_s2 + $0x1b0] sm:$0xff] }
 0x1f5   :  { %v5853_v46 = vmul.f32 -1.442695, %v1489_v35  ;;  %7047 = vpow2.f32 %v5965_v53 }
 0x1f6   :  { %7049 = vpow2.f32 %v5854_v33 }
 0x1f7   :  { %7051 = vpow2.f32 %v5853_v46 }
 0x1f8   :  { %7053 = vpow2.f32 %v5968_v36  ;;  %v4601_v36 = vpop.permute.xlu1 %4600 }
 0x1f9   :  { %v3753_v56 = vld [vmem:[%s11626_s3 + $0x40] sm:$0xff] }
 0x1fa   :  { %5462 = vst.msk [vmem:[%s11627_s4 + $0x3c0] sm:$0xff] %vm5341_vm4, %v5233_v27  ;;  %v5121_v23 = vmul.f32 %v4016_v16, %v3753_v56  ;;  %v11662_v27 = vld [vmem:[#allocation8_spill] sm:$0xff]  ;;  %v4586_v56 = vpop.permute.xlu0 %4585 }
 0x1fb   :  { %v2059_v2 = vadd.f32 %v11662_v27, %v419_v42  ;;  %v9421_v42 = vpop.eup %7027  ;;  %v9441_v27 = vpop.f32.mrb[81].mxu1 }
 0x1fc   :  { %v9426_v35 = vpop.eup %7029  ;;  %4195 = vperm.xlu0 %6665, %v9421_v42  }
 0x1fd   :  { %v5967_v5 = vmul.f32 -1.442695, %v2059_v2  ;;  %v7032_v6 = vpop.eup %7031  ;;  %4770 = vperm.xlu1 %6666, %v9426_v35   ;;  %v311_v35 = vld [vmem:[%s11625_s2 + $0x1c0] sm:$0xff] }
 0x1fe   :  { %v3219_v16 = vadd.f32 1.0, %v7032_v6  ;;  %v4026_v53 = vpop.permute.xlu0 %4025 }
 0x1ff   :  { %7055 = vpow2.f32 %v5967_v5 }
 0x200   :  { %7057 = vrcp.f32 %v3219_v16 }
 0x201   :  { %v3868_v20 = vld [vmem:[%s11626_s3 + $0x3d8] sm:$0xff] }
 0x202   :  { %5351 = vst.msk [vmem:[%s11627_s4 + $0x48] sm:$0xff] %vm5341_vm4, %v5122_v34  ;;  %v5236_v4 = vmul.f32 %v4591_v30, %v3868_v20  ;;  %v7034_v34 = vpop.eup %7033 }
 0x203   :  { %v7036_v2 = vpop.eup %7035 }
 0x204   :  { %v7038_v46 = vpop.eup %7037 }
 0x205   :  { %v3222_v37 = vadd.f32 1.0, %v7038_v46 }
 0x209   :  { %v3867_v1 = vld [vmem:[%s11626_s3 + $0x3d0] sm:$0xff] }
 0x20a   :  { %5350 = vst.msk [vmem:[%s11627_s4 + $0x40] sm:$0xff] %vm5341_vm4, %v5121_v23  ;;  %v5235_v9 = vmul.f32 %v4586_v56, %v3867_v1  ;;  %v3108_v1 = vadd.f32 1.0, %v7034_v34  ;;  %v7040_v56 = vpop.eup %7039  ;;  %v307_v34 = vld [vmem:[%s11625_s2 + $0x1a0] sm:$0xff] }
 0x20b   :  { %v7042_v5 = vpop.eup %7041 }
 0x20c   :  { %7059 = vrcp.f32 %v3108_v1 }
 0x211   :  { %v3756_v23 = vld [vmem:[%s11626_s3 + $0x58] sm:$0xff] }
 0x212   :  { %5465 = vst.msk [vmem:[%s11627_s4 + $0x3d8] sm:$0xff] %vm5341_vm4, %v5236_v4  ;;  %v5124_v20 = vmul.f32 %v4031_v0, %v3756_v23  ;;  %v3107_v4 = vadd.f32 1.0, %v7036_v2  ;;  %v9460_v23 = vpop.f32.mrb[82].mxu0  ;;  %v4596_v0 = vpop.permute.xlu0 %4595 }
 0x213   :  { %v9465_v16 = vpop.f32.mrb[83].mxu0 }
 0x214   :  { %7061 = vrcp.f32 %v3107_v4 }
 0x215   :  { %7063 = vrcp.f32 %v3222_v37  ;;  %v1499_v37 = vadd.f32 %v8946_v21, %v307_v34 }
 0x219   :  { %v3755_v31 = vld [vmem:[%s11626_s3 + $0x50] sm:$0xff] }
 0x21a   :  { %5464 = vst.msk [vmem:[%s11627_s4 + $0x3d0] sm:$0xff] %vm5341_vm4, %v5235_v9  ;;  %v5123_v33 = vmul.f32 %v4026_v53, %v3755_v31  ;;  %v308_v9 = vld [vmem:[%s11625_s2 + $0x1a8] sm:$0xff]  ;;  %v3221_v31 = vadd.f32 1.0, %v7040_v56  ;;  %v3110_v53 = vadd.f32 1.0, %v7042_v5  ;;  %v4041_v56 = vpop.permute.xlu1 %4040 }
 0x21b   :  { %v1504_v46 = vadd.f32 %v8943_v57, %v308_v9  ;;  %v9490_v57 = vpop.f32.mrb[82].mxu1 }
 0x21c   :  { %7065 = vrcp.f32 %v3221_v31 }
 0x21d   :  { %7067 = vrcp.f32 %v3110_v53 }
 0x221   :  { %v3870_v30 = vld [vmem:[%s11626_s3 + $0x3e8] sm:$0xff] }
 0x222   :  { %5353 = vst.msk [vmem:[%s11627_s4 + $0x58] sm:$0xff] %vm5341_vm4, %v5124_v20  ;;  %v5238_v6 = vmul.f32 %v4601_v36, %v3870_v30  ;;  %v7044_v20 = vpop.eup %7043  ;;  %v421_v36 = vld [vmem:[%s11625_s2 + $0x530] sm:$0xff] }
 0x223   :  { %v3109_v30 = vadd.f32 1.0, %v7044_v20  ;;  %v9496_v20 = vpop.f32.mrb[83].mxu1 }
 0x224   :  { %11663 = vst [vmem:[#allocation4_spill] sm:$0xff] %v9496_v20 }
 0x225   :  { %7069 = vrcp.f32 %v3109_v30 }
 0x229   :  { %v3869_v63 = vld [vmem:[%s11626_s3 + $0x3e0] sm:$0xff] }
 0x22a   :  { %5352 = vst.msk [vmem:[%s11627_s4 + $0x50] sm:$0xff] %vm5341_vm4, %v5123_v33  ;;  %v5237_v2 = vmul.f32 %v4596_v0, %v3869_v63  ;;  %v7046_v33 = vpop.eup %7045  ;;  %v310_v0 = vld [vmem:[%s11625_s2 + $0x1b8] sm:$0xff] }
 0x22b   :  { %v7048_v4 = vpop.eup %7047  ;;  %v3224_v63 = vadd.f32 1.0, %v7046_v33 }
 0x22c   :  { %v7050_v9 = vpop.eup %7049  ;;  %v3223_v5 = vadd.f32 1.0, %v7048_v4  ;;  %v2069_v4 = vadd.f32 %v8958_v58, %v421_v36  ;;  %v423_v58 = vld [vmem:[%s11625_s2 + $0x540] sm:$0xff]  ;;  %v9525_v36 = vpop.f32.mrb[84].mxu0 }
 0x22d   :  { %v7052_v21 = vpop.eup %7051  ;;  %7071 = vrcp.f32 %v3224_v63  ;;  %v3112_v34 = vadd.f32 1.0, %v7050_v9  ;;  %v11664_v9 = vld [vmem:[#allocation9_spill] sm:$0xff]  ;;  %11665 = vst [vmem:[#allocation5_spill] sm:$0xff] %v9525_v36 }
 0x22e   :  { %v7054_v33 = vpop.eup %7053  ;;  %7073 = vrcp.f32 %v3223_v5  ;;  %v3111_v30 = vadd.f32 1.0, %v7052_v21  ;;  %v1514_v5 = vadd.f32 %v11664_v9, %v310_v0  ;;  %v9532_v0 = vpop.f32.mrb[85].mxu0 }
 0x22f   :  { %7075 = vrcp.f32 %v3112_v34  ;;  %v3226_v63 = vadd.f32 1.0, %v7054_v33  ;;  %v11666_v33 = vld [vmem:[#allocation11_spill] sm:$0xff]  ;;  %11667 = vst [vmem:[#allocation6_spill] sm:$0xff] %v9532_v0  ;;  %v1519_v0 = vadd.f32 %v9004_v55, %v311_v35 }
 0x230   :  { %7077 = vrcp.f32 %v3111_v30  ;;  %v1509_v20 = vadd.f32 %v11666_v33, %v309_v62  ;;  %v11668_v30 = vld [vmem:[#allocation10_spill] sm:$0xff] }
 0x231   :  { %v3758_v1 = vld [vmem:[%s11626_s3 + $0x68] sm:$0xff]  ;;  %7079 = vrcp.f32 %v3226_v63  ;;  %v11669_v63 = vld [vmem:[#allocation12_spill] sm:$0xff] }
 0x232   :  { %5467 = vst.msk [vmem:[%s11627_s4 + $0x3e8] sm:$0xff] %vm5341_vm4, %v5238_v6  ;;  %v5126_v31 = vmul.f32 %v4041_v56, %v3758_v1  ;;  %v4036_v6 = vpop.permute.xlu0 %4035  ;;  %v2074_v1 = vadd.f32 %v8948_v25, %v422_v26  ;;  %v424_v25 = vld [vmem:[%s11625_s2 + $0x548] sm:$0xff]  ;;  %v7056_v26 = vpop.eup %7055  ;;  %v5855_v56 = vmul.f32 -1.442695, %v1499_v37 }
 0x233   :  { %v312_v37 = vld [vmem:[%s11625_s2 + $0x1c8] sm:$0xff] }
 0x234   :  { %v5970_v36 = vmul.f32 -1.442695, %v2074_v1 }
 0x236   :  { %v4606_v34 = vpop.permute.xlu0 %4605 }
 0x239   :  { %v3757_v19 = vld [vmem:[%s11626_s3 + $0x60] sm:$0xff] }
 0x23a   :  { %5466 = vst.msk [vmem:[%s11627_s4 + $0x3e0] sm:$0xff] %vm5341_vm4, %v5237_v2  ;;  %v5125_v53 = vmul.f32 %v4036_v6, %v3757_v19  ;;  %v5856_v19 = vmul.f32 -1.442695, %v1504_v46  ;;  %v4611_v46 = vpop.permute.xlu1 %4610  ;;  %v3225_v6 = vadd.f32 1.0, %v7056_v26  ;;  %v2084_v26 = vadd.f32 %v11668_v30, %v424_v25  ;;  %v426_v25 = vld [vmem:[%s11625_s2 + $0x558] sm:$0xff] }
 0x23c   :  { %7081 = vrcp.f32 %v3225_v6 }
 0x23d   :  { %7083 = vpow2.f32 %v5856_v19  ;;  %v5857_v19 = vmul.f32 -1.442695, %v1509_v20 }
 0x23e   :  { %v4051_v6 = vpop.permute.xlu1 %4050  ;;  %7085 = vpow2.f32 %v5855_v56 }
 0x23f   :  { %7087 = vpow2.f32 %v5970_v36 }
 0x241   :  { %v3872_v2 = vld [vmem:[%s11626_s3 + $0x3f8] sm:$0xff] }
 0x242   :  { %5355 = vst.msk [vmem:[%s11627_s4 + $0x68] sm:$0xff] %vm5341_vm4, %v5126_v31  ;;  %v7058_v31 = vpop.eup %7057  ;;  %v5240_v21 = vmul.f32 %v4611_v46, %v3872_v2  ;;  %v2079_v46 = vadd.f32 %v11669_v63, %v423_v58  ;;  %v9560_v58 = vpop.f32.mrb[84].mxu1 }
 0x243   :  { %4765 = vperm.xlu0 %6665, %v7058_v31   ;;  %v4046_v63 = vpop.permute.xlu0 %4045 }
 0x244   :  { %v5971_v36 = vmul.f32 -1.442695, %v2079_v46  ;;  %v9585_v46 = vpop.f32.mrb[86].mxu0 }
 0x249   :  { %v3871_v42 = vld [vmem:[%s11626_s3 + $0x3f0] sm:$0xff] }
 0x24a   :  { %5354 = vst.msk [vmem:[%s11627_s4 + $0x60] sm:$0xff] %vm5341_vm4, %v5125_v53  ;;  %v7060_v53 = vpop.eup %7059  ;;  %v5239_v9 = vmul.f32 %v4606_v34, %v3871_v42  ;;  %v5969_v42 = vmul.f32 -1.442695, %v2069_v4  ;;  %v1524_v4 = vadd.f32 %v8999_v51, %v312_v37  ;;  %v425_v34 = vld [vmem:[%s11625_s2 + $0x550] sm:$0xff] }
 0x24b   :  { %v7062_v62 = vpop.eup %7061  ;;  %4210 = vperm.xlu1 %6666, %v7060_v53   ;;  %v2094_v53 = vadd.f32 %v9001_v11, %v426_v25  ;;  %v2089_v35 = vadd.f32 %v9006_v47, %v425_v34  ;;  %v4621_v11 = vpop.permute.xlu1 %4620 }
 0x24c   :  { %v7064_v31 = vpop.eup %7063  ;;  %4205 = vperm.xlu0 %6665, %v7062_v62   ;;  %7089 = vpow2.f32 %v5969_v42 }
 0x24d   :  { %v7066_v33 = vpop.eup %7065 }
 0x24e   :  { %v7068_v51 = vpop.eup %7067 }
 0x24f   :  { %v7070_v20 = vpop.eup %7069  ;;  %4780 = vperm.xlu1 %6666, %v7064_v31   ;;  %v5973_v31 = vmul.f32 -1.442695, %v2089_v35 }
 0x250   :  { %v7072_v62 = vpop.eup %7071  ;;  %4775 = vperm.xlu0 %6665, %v7066_v33  }
 0x251   :  { %v3760_v2 = vld [vmem:[%s11626_s3 + $0x78] sm:$0xff] }
 0x252   :  { %5469 = vst.msk [vmem:[%s11627_s4 + $0x3f8] sm:$0xff] %vm5341_vm4, %v5240_v21  ;;  %v5858_v21 = vmul.f32 -1.442695, %v1514_v5  ;;  %v5128_v30 = vmul.f32 %v4051_v6, %v3760_v2  ;;  %v314_v5 = vld [vmem:[%s11625_s2 + $0x1d8] sm:$0xff]  ;;  %v5972_v2 = vmul.f32 -1.442695, %v2084_v26  ;;  %v4616_v6 = vpop.permute.xlu0 %4615 }
 0x253   :  { %v5860_v26 = vmul.f32 -1.442695, %v1524_v4  ;;  %v1534_v42 = vadd.f32 %v9016_v48, %v314_v5  ;;  %v5974_v4 = vmul.f32 -1.442695, %v2094_v53  ;;  %4220 = vperm.xlu1 %6666, %v7068_v51  }
 0x254   :  { %7091 = vpow2.f32 %v5858_v21  ;;  %4215 = vperm.xlu0 %6665, %v7070_v20  }
 0x255   :  { %7093 = vpow2.f32 %v5857_v19  ;;  %v4061_v19 = vpop.permute.xlu1 %4060  ;;  %v5862_v5 = vmul.f32 -1.442695, %v1534_v42 }
 0x256   :  { %7095 = vpow2.f32 %v5972_v2  ;;  %v4056_v2 = vpop.permute.xlu0 %4055 }
 0x257   :  { %7097 = vpow2.f32 %v5971_v36  ;;  %4790 = vperm.xlu1 %6666, %v7072_v62  }
 0x258   :  { %7099 = vpow2.f32 %v5860_v26 }
 0x259   :  { %v3759_v1 = vld [vmem:[%s11626_s3 + $0x70] sm:$0xff] }
 0x25a   :  { %5468 = vst.msk [vmem:[%s11627_s4 + $0x3f0] sm:$0xff] %vm5341_vm4, %v5239_v9  ;;  %v9566_v9 = vpop.f32.mrb[85].mxu1  ;;  %v5127_v37 = vmul.f32 %v4046_v63, %v3759_v1  ;;  %v7074_v1 = vpop.eup %7073 }
 0x25b   :  { %v9587_v47 = vpop.eup %7075  ;;  %v9592_v63 = vpop.f32.mrb[87].mxu0  ;;  %4785 = vperm.xlu0 %6665, %v7074_v1  }
 0x25c   :  { %v9594_v48 = vpop.eup %7077  ;;  %v9611_v53 = vpop.f32.mrb[86].mxu1  ;;  %4230 = vperm.xlu1 %6666, %v9587_v47   ;;  %v316_v47 = vld [vmem:[%s11625_s2 + $0x1e8] sm:$0xff] }
 0x25d   :  { %v9603_v33 = vpop.eup %7079 }
 0x25f   :  { %4225 = vperm.xlu0 %6665, %v9594_v48  }
 0x260   :  { %4800 = vperm.xlu1 %6666, %v9603_v33  }
 0x261   :  { %v3874_v56 = vld [vmem:[%s11626_s3 + $0x408] sm:$0xff] }
 0x262   :  { %5357 = vst.msk [vmem:[%s11627_s4 + $0x78] sm:$0xff] %vm5341_vm4, %v5128_v30  ;;  %v5242_v25 = vmul.f32 %v4621_v11, %v3874_v56  ;;  %v5859_v30 = vmul.f32 -1.442695, %v1519_v0  ;;  %v9616_v11 = vpop.f32.mrb[87].mxu1 }
 0x264   :  { %7101 = vpow2.f32 %v5859_v30 }
 0x265   :  { %7103 = vpow2.f32 %v5974_v4  ;;  %v4626_v4 = vpop.permute.xlu0 %4625 }
 0x266   :  { %7105 = vpow2.f32 %v5973_v31  ;;  %v9632_v31 = vpop.f32.mrb[88].mxu0 }
 0x267   :  { %7107 = vpow2.f32 %v5862_v5 }
 0x269   :  { %v3873_v55 = vld [vmem:[%s11626_s3 + $0x400] sm:$0xff] }
 0x26a   :  { %5356 = vst.msk [vmem:[%s11627_s4 + $0x70] sm:$0xff] %vm5341_vm4, %v5127_v37  ;;  %v5241_v34 = vmul.f32 %v4616_v6, %v3873_v55  ;;  %v9609_v37 = vpop.eup %7081  ;;  %v4631_v6 = vpop.permute.xlu1 %4630 }
 0x26b   :  { %v7084_v55 = vpop.eup %7083  ;;  %4795 = vperm.xlu0 %6665, %v9609_v37  }
 0x26c   :  { %v7086_v26 = vpop.eup %7085  ;;  %v3114_v42 = vadd.f32 1.0, %v7084_v55  ;;  %v9637_v55 = vpop.f32.mrb[89].mxu0 }
 0x26d   :  { %v7088_v20 = vpop.eup %7087  ;;  %11670 = vst [vmem:[#allocation7_spill] sm:$0xff] %v9637_v55 }
 0x26e   :  { %v7090_v30 = vpop.eup %7089  ;;  %7109 = vrcp.f32 %v3114_v42  ;;  %v4071_v42 = vpop.permute.xlu1 %4070 }
 0x271   :  { %v3762_v21 = vld [vmem:[%s11626_s3 + $0x88] sm:$0xff] }
 0x272   :  { %5471 = vst.msk [vmem:[%s11627_s4 + $0x408] sm:$0xff] %vm5341_vm4, %v5242_v25  ;;  %v5130_v56 = vmul.f32 %v4061_v19, %v3762_v21  ;;  %v3113_v25 = vadd.f32 1.0, %v7086_v26  ;;  %v7092_v19 = vpop.eup %7091 }
 0x273   :  { %v3116_v62 = vadd.f32 1.0, %v7092_v19 }
 0x274   :  { %7111 = vrcp.f32 %v3113_v25 }
 0x279   :  { %v3761_v0 = vld [vmem:[%s11626_s3 + $0x80] sm:$0xff] }
 0x27a   :  { %5470 = vst.msk [vmem:[%s11627_s4 + $0x400] sm:$0xff] %vm5341_vm4, %v5241_v34  ;;  %v5129_v36 = vmul.f32 %v4056_v2, %v3761_v0  ;;  %v3228_v34 = vadd.f32 1.0, %v7088_v20  ;;  %v313_v0 = vld [vmem:[%s11625_s2 + $0x1d0] sm:$0xff]  ;;  %v428_v20 = vld [vmem:[%s11625_s2 + $0x568] sm:$0xff] }
 0x27c   :  { %7113 = vrcp.f32 %v3228_v34  ;;  %v4066_v34 = vpop.permute.xlu0 %4065 }
 0x281   :  { %v3876_v35 = vld [vmem:[%s11626_s3 + $0x418] sm:$0xff] }
 0x282   :  { %5359 = vst.msk [vmem:[%s11627_s4 + $0x88] sm:$0xff] %vm5341_vm4, %v5130_v56  ;;  %v5244_v21 = vmul.f32 %v4631_v6, %v3876_v35  ;;  %v3227_v56 = vadd.f32 1.0, %v7090_v30 }
 0x284   :  { %7115 = vrcp.f32 %v3227_v56 }
 0x285   :  { %7117 = vrcp.f32 %v3116_v62  ;;  %v11673_v62 = vld [vmem:[#allocation13_spill] sm:$0xff] }
 0x289   :  { %v3875_v51 = vld [vmem:[%s11626_s3 + $0x410] sm:$0xff] }
 0x28a   :  { %5358 = vst.msk [vmem:[%s11627_s4 + $0x80] sm:$0xff] %vm5341_vm4, %v5129_v36  ;;  %v5243_v2 = vmul.f32 %v4626_v4, %v3875_v51  ;;  %v7094_v36 = vpop.eup %7093  ;;  %v1529_v51 = vadd.f32 %v9022_v10, %v313_v0  ;;  %v9658_v4 = vpop.f32.mrb[88].mxu1 }
 0x28b   :  { %v7096_v26 = vpop.eup %7095  ;;  %v3115_v1 = vadd.f32 1.0, %v7094_v36  ;;  %11671 = vst [vmem:[#allocation8_spill] sm:$0xff] %v9658_v4  ;;  %v4636_v4 = vpop.permute.xlu0 %4635 }
 0x28c   :  { %v7098_v25 = vpop.eup %7097  ;;  %v3230_v6 = vadd.f32 1.0, %v7096_v26  ;;  %v315_v26 = vld [vmem:[%s11625_s2 + $0x1e0] sm:$0xff] }
 0x28d   :  { %v7100_v19 = vpop.eup %7099  ;;  %7119 = vrcp.f32 %v3115_v1  ;;  %v3229_v10 = vadd.f32 1.0, %v7098_v25  ;;  %v5861_v25 = vmul.f32 -1.442695, %v1529_v51  ;;  %v429_v51 = vld [vmem:[%s11625_s2 + $0x570] sm:$0xff]  ;;  %v1539_v33 = vadd.f32 %v9030_v43, %v315_v26 }
 0x28e   :  { %7121 = vrcp.f32 %v3230_v6  ;;  %v3118_v36 = vadd.f32 1.0, %v7100_v19  ;;  %v4641_v6 = vpop.permute.xlu1 %4640 }
 0x28f   :  { %7123 = vrcp.f32 %v3229_v10  ;;  %v1544_v10 = vadd.f32 %v9028_v12, %v316_v47  ;;  %v318_v12 = vld [vmem:[%s11625_s2 + $0x1f8] sm:$0xff] }
 0x290   :  { %7125 = vrcp.f32 %v3118_v36 }
 0x291   :  { %v3764_v5 = vld [vmem:[%s11626_s3 + $0x98] sm:$0xff] }
 0x292   :  { %5473 = vst.msk [vmem:[%s11627_s4 + $0x418] sm:$0xff] %vm5341_vm4, %v5244_v21  ;;  %v5132_v30 = vmul.f32 %v4071_v42, %v3764_v5  ;;  %v427_v21 = vld [vmem:[%s11625_s2 + $0x560] sm:$0xff]  ;;  %v7102_v5 = vpop.eup %7101 }
 0x293   :  { %v7104_v1 = vpop.eup %7103  ;;  %v3117_v42 = vadd.f32 1.0, %v7102_v5 }
 0x294   :  { %v7106_v19 = vpop.eup %7105 }
 0x295   :  { %7127 = vrcp.f32 %v3117_v42  ;;  %v3231_v5 = vadd.f32 1.0, %v7106_v19  ;;  %v4076_v19 = vpop.permute.xlu0 %4075 }
 0x299   :  { %v3763_v35 = vld [vmem:[%s11626_s3 + $0x90] sm:$0xff] }
 0x29a   :  { %5472 = vst.msk [vmem:[%s11627_s4 + $0x410] sm:$0xff] %vm5341_vm4, %v5243_v2  ;;  %v5131_v0 = vmul.f32 %v4066_v34, %v3763_v35  ;;  %v9667_v2 = vpop.f32.mrb[89].mxu1  ;;  %v2104_v35 = vadd.f32 %v11673_v62, %v428_v20  ;;  %v430_v20 = vld [vmem:[%s11625_s2 + $0x578] sm:$0xff]  ;;  %v3232_v62 = vadd.f32 1.0, %v7104_v1 }
 0x29b   :  { %11672 = vst [vmem:[#allocation9_spill] sm:$0xff] %v9667_v2  ;;  %v2114_v43 = vadd.f32 %v9032_v49, %v430_v20 }
 0x29c   :  { %7129 = vrcp.f32 %v3232_v62  ;;  %v5976_v37 = vmul.f32 -1.442695, %v2104_v35  ;;  %v2109_v35 = vadd.f32 %v9034_v60, %v429_v51  ;;  %v5864_v62 = vmul.f32 -1.442695, %v1544_v10  ;;  %v320_v10 = vld [vmem:[%s11625_s2 + $0x208] sm:$0xff] }
 0x29d   :  { %7131 = vrcp.f32 %v3231_v5  ;;  %v5863_v51 = vmul.f32 -1.442695, %v1539_v33  ;;  %v5978_v33 = vmul.f32 -1.442695, %v2114_v43 }
 0x2a1   :  { %v3878_v56 = vld [vmem:[%s11626_s3 + $0x428] sm:$0xff] }
 0x2a2   :  { %5361 = vst.msk [vmem:[%s11627_s4 + $0x98] sm:$0xff] %vm5341_vm4, %v5132_v30  ;;  %v11674_v30 = vld [vmem:[#allocation14_spill] sm:$0xff]  ;;  %v5246_v2 = vmul.f32 %v4641_v6, %v3878_v56  ;;  %v432_v6 = vld [vmem:[%s11625_s2 + $0x588] sm:$0xff] }
 0x2a3   :  { %v2099_v34 = vadd.f32 %v11674_v30, %v427_v21  ;;  %v7108_v21 = vpop.eup %7107 }
 0x2a4   :  { %v7110_v36 = vpop.eup %7109  ;;  %v3120_v1 = vadd.f32 1.0, %v7108_v21  ;;  %v11677_v21 = vld [vmem:[#allocation15_spill] sm:$0xff] }
 0x2a5   :  { %v7112_v26 = vpop.eup %7111  ;;  %v5975_v42 = vmul.f32 -1.442695, %v2099_v34  ;;  %4240 = vperm.xlu1 %6666, %v7110_v36   ;;  %v1554_v5 = vadd.f32 %v11677_v21, %v318_v12  ;;  %v9728_v34 = vpop.f32.mrb[90].mxu1  ;;  %v11682_v21 = vld [vmem:[#allocation18_spill] sm:$0xff] }
 0x2a6   :  { %v7114_v49 = vpop.eup %7113  ;;  %7133 = vrcp.f32 %v3120_v1  ;;  %11678 = vst [vmem:[#allocation12_spill] sm:$0xff] %v9728_v34  ;;  %4235 = vperm.xlu0 %6665, %v7112_v26   ;;  %v11679_v1 = vld [vmem:[#allocation16_spill] sm:$0xff]  ;;  %v9737_v12 = vpop.f32.mrb[91].mxu1  ;;  %v319_v26 = vld [vmem:[%s11625_s2 + $0x200] sm:$0xff] }
 0x2a7   :  { %7135 = vpow2.f32 %v5861_v25  ;;  %11680 = vst [vmem:[#allocation13_spill] sm:$0xff] %v9737_v12  ;;  %v4646_v34 = vpop.permute.xlu0 %4645 }
 0x2a8   :  { %7137 = vpow2.f32 %v5976_v37 }
 0x2a9   :  { %v3877_v48 = vld [vmem:[%s11626_s3 + $0x420] sm:$0xff]  ;;  %7139 = vpow2.f32 %v5975_v42  ;;  %4810 = vperm.xlu1 %6666, %v7114_v49  }
 0x2aa   :  { %5360 = vst.msk [vmem:[%s11627_s4 + $0x90] sm:$0xff] %vm5341_vm4, %v5131_v0  ;;  %v9693_v0 = vpop.f32.mrb[90].mxu0  ;;  %v5245_v30 = vmul.f32 %v4636_v4, %v3877_v48  ;;  %v317_v48 = vld [vmem:[%s11625_s2 + $0x1f0] sm:$0xff]  ;;  %7141 = vpow2.f32 %v5864_v62 }
 0x2ab   :  { %11675 = vst [vmem:[#allocation11_spill] sm:$0xff] %v9693_v0  ;;  %v9703_v47 = vpop.f32.mrb[91].mxu0  ;;  %v1549_v36 = vadd.f32 %v11679_v1, %v317_v48  ;;  %7143 = vpow2.f32 %v5863_v51 }
 0x2ac   :  { %11676 = vst [vmem:[#allocation10_spill] sm:$0xff] %v9703_v47  ;;  %v7116_v47 = vpop.eup %7115  ;;  %v9756_v0 = vpop.f32.mrb[92].mxu0  ;;  %7145 = vpow2.f32 %v5978_v33 }
 0x2ad   :  { %4805 = vperm.xlu0 %6665, %v7116_v47   ;;  %v9762_v62 = vpop.f32.mrb[93].mxu0 }
 0x2b1   :  { %v3766_v56 = vld [vmem:[%s11626_s3 + $0xa8] sm:$0xff] }
 0x2b2   :  { %5475 = vst.msk [vmem:[%s11627_s4 + $0x428] sm:$0xff] %vm5341_vm4, %v5246_v2  ;;  %v4081_v2 = vpop.permute.xlu1 %4080 }
 0x2b3   :  { %v5134_v20 = vmul.f32 %v4081_v2, %v3766_v56  ;;  %v7118_v2 = vpop.eup %7117 }
 0x2b4   :  { %4250 = vperm.xlu1 %6666, %v7118_v2  }
 0x2b6   :  { %v4651_v37 = vpop.permute.xlu1 %4650 }
 0x2b9   :  { %v3765_v4 = vld [vmem:[%s11626_s3 + $0xa0] sm:$0xff] }
 0x2ba   :  { %5474 = vst.msk [vmem:[%s11627_s4 + $0x420] sm:$0xff] %vm5341_vm4, %v5245_v30  ;;  %v431_v30 = vld [vmem:[%s11625_s2 + $0x580] sm:$0xff]  ;;  %v5133_v60 = vmul.f32 %v4076_v19, %v3765_v4  ;;  %v11681_v4 = vld [vmem:[#allocation17_spill] sm:$0xff]  ;;  %v7120_v19 = vpop.eup %7119 }
 0x2bb   :  { %v2124_v48 = vadd.f32 %v11681_v4, %v432_v6  ;;  %v2119_v1 = vadd.f32 %v11682_v21, %v431_v30  ;;  %v7122_v12 = vpop.eup %7121  ;;  %v5866_v6 = vmul.f32 -1.442695, %v1554_v5  ;;  %v1564_v4 = vadd.f32 %v9065_v18, %v320_v10  ;;  %4245 = vperm.xlu0 %6665, %v7120_v19  }
 0x2bc   :  { %v7124_v42 = vpop.eup %7123  ;;  %v1559_v30 = vadd.f32 %v9072_v41, %v319_v26  ;;  %v4091_v41 = vpop.permute.xlu1 %4090  ;;  %4820 = vperm.xlu1 %6666, %v7122_v12  }
 0x2bd   :  { %v5980_v47 = vmul.f32 -1.442695, %v2124_v48  ;;  %v5979_v5 = vmul.f32 -1.442695, %v2119_v1  ;;  %v5868_v10 = vmul.f32 -1.442695, %v1564_v4 }
 0x2be   :  { %v5867_v26 = vmul.f32 -1.442695, %v1559_v30 }
 0x2bf   :  { %4815 = vperm.xlu0 %6665, %v7124_v42  }
 0x2c0   :  { %v4661_v21 = vpop.permute.xlu1 %4660 }
 0x2c1   :  { %v3880_v56 = vld [vmem:[%s11626_s3 + $0x438] sm:$0xff] }
 0x2c2   :  { %5363 = vst.msk [vmem:[%s11627_s4 + $0xa8] sm:$0xff] %vm5341_vm4, %v5134_v20  ;;  %v5977_v20 = vmul.f32 -1.442695, %v2109_v35  ;;  %v5248_v43 = vmul.f32 %v4651_v37, %v3880_v56  ;;  %v7126_v56 = vpop.eup %7125 }
 0x2c3   :  { %v9771_v49 = vpop.eup %7127  ;;  %4260 = vperm.xlu1 %6666, %v7126_v56  }
 0x2c4   :  { %7147 = vpow2.f32 %v5977_v20  ;;  %4255 = vperm.xlu0 %6665, %v9771_v49  }
 0x2c5   :  { %7149 = vpow2.f32 %v5866_v6 }
 0x2c9   :  { %v3879_v25 = vld [vmem:[%s11626_s3 + $0x430] sm:$0xff] }
 0x2ca   :  { %5362 = vst.msk [vmem:[%s11627_s4 + $0xa0] sm:$0xff] %vm5341_vm4, %v5133_v60  ;;  %v5247_v55 = vmul.f32 %v4646_v34, %v3879_v25  ;;  %v5865_v60 = vmul.f32 -1.442695, %v1549_v36  ;;  %v9777_v34 = vpop.eup %7129  ;;  %v4086_v36 = vpop.permute.xlu0 %4085 }
 0x2cb   :  { %v9779_v25 = vpop.f32.mrb[92].mxu1  ;;  %v9781_v33 = vpop.eup %7131  ;;  %4830 = vperm.xlu1 %6666, %v9777_v34   ;;  %v435_v34 = vld [vmem:[%s11625_s2 + $0x5a0] sm:$0xff] }
 0x2cc   :  { %7151 = vpow2.f32 %v5865_v60  ;;  %v9786_v37 = vpop.f32.mrb[93].mxu1  ;;  %v9788_v20 = vpop.eup %7133  ;;  %4825 = vperm.xlu0 %6665, %v9781_v33  }
 0x2cd   :  { %7153 = vpow2.f32 %v5980_v47  ;;  %v7136_v19 = vpop.eup %7135 }
 0x2ce   :  { %7155 = vpow2.f32 %v5979_v5  ;;  %v7138_v1 = vpop.eup %7137  ;;  %v4656_v4 = vpop.permute.xlu0 %4655 }
 0x2cf   :  { %7157 = vpow2.f32 %v5868_v10  ;;  %v7140_v60 = vpop.eup %7139  ;;  %v3234_v30 = vadd.f32 1.0, %v7138_v1  ;;  %v4101_v10 = vpop.permute.xlu1 %4100  ;;  %4270 = vperm.xlu1 %6666, %v9788_v20  }
 0x2d0   :  { %7159 = vpow2.f32 %v5867_v26  ;;  %v7142_v5 = vpop.eup %7141  ;;  %v9825_v1 = vpop.f32.mrb[94].mxu1 }
 0x2d1   :  { %v3768_v35 = vld [vmem:[%s11626_s3 + $0xb8] sm:$0xff]  ;;  %v7144_v42 = vpop.eup %7143 }
 0x2d2   :  { %5477 = vst.msk [vmem:[%s11627_s4 + $0x438] sm:$0xff] %vm5341_vm4, %v5248_v43  ;;  %v5136_v51 = vmul.f32 %v4091_v41, %v3768_v35  ;;  %v3119_v43 = vadd.f32 1.0, %v7136_v19  ;;  %v9801_v35 = vpop.f32.mrb[94].mxu0  ;;  %v3121_v26 = vadd.f32 1.0, %v7144_v42  ;;  %v4096_v19 = vpop.permute.xlu0 %4095 }
 0x2d3   :  { %v9806_v41 = vpop.f32.mrb[95].mxu0  ;;  %v4671_v42 = vpop.permute.xlu1 %4670 }
 0x2d4   :  { %7161 = vrcp.f32 %v3119_v43 }
 0x2d5   :  { %7163 = vrcp.f32 %v3234_v30  ;;  %v9831_v30 = vpop.f32.mrb[95].mxu1 }
 0x2d9   :  { %v3767_v18 = vld [vmem:[%s11626_s3 + $0xb0] sm:$0xff] }
 0x2da   :  { %5476 = vst.msk [vmem:[%s11627_s4 + $0x430] sm:$0xff] %vm5341_vm4, %v5247_v55  ;;  %v5135_v48 = vmul.f32 %v4086_v36, %v3767_v18  ;;  %v3122_v36 = vadd.f32 1.0, %v7142_v5  ;;  %v322_v5 = vld [vmem:[%s11625_s2 + $0x218] sm:$0xff] }
 0x2e1   :  { %v3882_v55 = vld [vmem:[%s11626_s3 + $0x448] sm:$0xff] }
 0x2e2   :  { %5365 = vst.msk [vmem:[%s11627_s4 + $0xb8] sm:$0xff] %vm5341_vm4, %v5136_v51  ;;  %v5250_v6 = vmul.f32 %v4661_v21, %v3882_v55  ;;  %v3233_v51 = vadd.f32 1.0, %v7140_v60  ;;  %v7146_v55 = vpop.eup %7145  ;;  %v433_v21 = vld [vmem:[%s11625_s2 + $0x590] sm:$0xff] }
 0x2e3   :  { %v7148_v43 = vpop.eup %7147 }
 0x2e4   :  { %7165 = vrcp.f32 %v3233_v51  ;;  %v3235_v56 = vadd.f32 1.0, %v7148_v43  ;;  %v9856_v43 = vpop.f32.mrb[96].mxu0 }
 0x2e5   :  { %7167 = vrcp.f32 %v3122_v36  ;;  %v11683_v36 = vld [vmem:[#allocation19_spill] sm:$0xff] }
 0x2e6   :  { %7169 = vrcp.f32 %v3121_v26 }
 0x2e9   :  { %v3881_v2 = vld [vmem:[%s11626_s3 + $0x440] sm:$0xff] }
 0x2ea   :  { %5364 = vst.msk [vmem:[%s11627_s4 + $0xb0] sm:$0xff] %vm5341_vm4, %v5135_v48  ;;  %v5249_v18 = vmul.f32 %v4656_v4, %v3881_v2  ;;  %v434_v48 = vld [vmem:[%s11625_s2 + $0x598] sm:$0xff] }
 0x2eb   :  { %v2134_v49 = vadd.f32 %v9087_v13, %v434_v48 }
 0x2ed   :  { %v5982_v33 = vmul.f32 -1.442695, %v2134_v49  ;;  %v4111_v49 = vpop.permute.xlu1 %4110 }
 0x2f1   :  { %v3770_v47 = vld [vmem:[%s11626_s3 + $0xc8] sm:$0xff] }
 0x2f2   :  { %5479 = vst.msk [vmem:[%s11627_s4 + $0x448] sm:$0xff] %vm5341_vm4, %v5250_v6  ;;  %v5138_v2 = vmul.f32 %v4101_v10, %v3770_v47  ;;  %v3236_v6 = vadd.f32 1.0, %v7146_v55  ;;  %v2129_v10 = vadd.f32 %v11683_v36, %v433_v21  ;;  %v321_v55 = vld [vmem:[%s11625_s2 + $0x210] sm:$0xff] }
 0x2f4   :  { %7171 = vrcp.f32 %v3236_v6 }
 0x2f5   :  { %7173 = vrcp.f32 %v3235_v56 }
 0x2f9   :  { %v3769_v12 = vld [vmem:[%s11626_s3 + $0xc0] sm:$0xff] }
 0x2fa   :  { %5478 = vst.msk [vmem:[%s11627_s4 + $0x440] sm:$0xff] %vm5341_vm4, %v5249_v18  ;;  %v5137_v4 = vmul.f32 %v4096_v19, %v3769_v12  ;;  %v7150_v18 = vpop.eup %7149  ;;  %v436_v19 = vld [vmem:[%s11625_s2 + $0x5a8] sm:$0xff] }
 0x2fb   :  { %v7152_v51 = vpop.eup %7151  ;;  %v3124_v12 = vadd.f32 1.0, %v7150_v18 }
 0x2fc   :  { %v7154_v13 = vpop.eup %7153  ;;  %v3123_v48 = vadd.f32 1.0, %v7152_v51  ;;  %v9866_v51 = vpop.f32.mrb[97].mxu0 }
 0x2fd   :  { %v7156_v6 = vpop.eup %7155  ;;  %7175 = vrcp.f32 %v3124_v12  ;;  %v3238_v21 = vadd.f32 1.0, %v7154_v13  ;;  %11685 = vst [vmem:[#allocation14_spill] sm:$0xff] %v9866_v51  ;;  %v324_v12 = vld [vmem:[%s11625_s2 + $0x228] sm:$0xff] }
 0x2fe   :  { %7177 = vrcp.f32 %v3123_v48  ;;  %v3237_v36 = vadd.f32 1.0, %v7156_v6 }
 0x2ff   :  { %7179 = vrcp.f32 %v3238_v21  ;;  %v2139_v21 = vadd.f32 %v9112_v3, %v435_v34  ;;  %v437_v3 = vld [vmem:[%s11625_s2 + $0x5b0] sm:$0xff] }
 0x300   :  { %7181 = vrcp.f32 %v3237_v36  ;;  %v1584_v36 = vadd.f32 %v9116_v24, %v324_v12 }
 0x301   :  { %v3884_v60 = vld [vmem:[%s11626_s3 + $0x458] sm:$0xff] }
 0x302   :  { %5367 = vst.msk [vmem:[%s11627_s4 + $0xc8] sm:$0xff] %vm5341_vm4, %v5138_v2  ;;  %v5252_v26 = vmul.f32 %v4671_v42, %v3884_v60  ;;  %v4666_v2 = vpop.permute.xlu0 %4665  ;;  %v11684_v60 = vld [vmem:[#allocation20_spill] sm:$0xff]  ;;  %v7158_v42 = vpop.eup %7157 }
 0x303   :  { %v1574_v56 = vadd.f32 %v11684_v60, %v322_v5  ;;  %v1569_v5 = vadd.f32 %v9107_v40, %v321_v55  ;;  %v7160_v13 = vpop.eup %7159  ;;  %v3126_v48 = vadd.f32 1.0, %v7158_v42  ;;  %v323_v40 = vld [vmem:[%s11625_s2 + $0x220] sm:$0xff] }
 0x304   :  { %v7162_v55 = vpop.eup %7161  ;;  %v3125_v6 = vadd.f32 1.0, %v7160_v13  ;;  %v1579_v24 = vadd.f32 %v9118_v61, %v323_v40  ;;  %v4681_v13 = vpop.permute.xlu1 %4680 }
 0x305   :  { %7183 = vrcp.f32 %v3126_v48  ;;  %4265 = vperm.xlu0 %6665, %v7162_v55   ;;  %v5870_v42 = vmul.f32 -1.442695, %v1574_v56  ;;  %v5869_v56 = vmul.f32 -1.442695, %v1569_v5 }
 0x306   :  { %v4106_v51 = vpop.permute.xlu0 %4105  ;;  %7185 = vrcp.f32 %v3125_v6  ;;  %v5983_v6 = vmul.f32 -1.442695, %v2139_v21 }
 0x307   :  { %7187 = vpow2.f32 %v5982_v33  ;;  %v2149_v33 = vadd.f32 %v9128_v17, %v437_v3  ;;  %v11686_v3 = vld [vmem:[#allocation21_spill] sm:$0xff] }
 0x309   :  { %v3883_v47 = vld [vmem:[%s11626_s3 + $0x450] sm:$0xff] }
 0x30a   :  { %5366 = vst.msk [vmem:[%s11627_s4 + $0xc0] sm:$0xff] %vm5341_vm4, %v5137_v4  ;;  %v5251_v4 = vmul.f32 %v4666_v2, %v3883_v47  ;;  %v2144_v2 = vadd.f32 %v9110_v45, %v436_v19  ;;  %v7164_v45 = vpop.eup %7163  ;;  %v4676_v55 = vpop.permute.xlu0 %4675 }
 0x30b   :  { %v7166_v34 = vpop.eup %7165  ;;  %4840 = vperm.xlu1 %6666, %v7164_v45  }
 0x30c   :  { %v7168_v12 = vpop.eup %7167  ;;  %v5984_v48 = vmul.f32 -1.442695, %v2144_v2  ;;  %4835 = vperm.xlu0 %6665, %v7166_v34  }
 0x30d   :  { %v7170_v61 = vpop.eup %7169 }
 0x30e   :  { %v7172_v2 = vpop.eup %7171 }
 0x30f   :  { %v7174_v17 = vpop.eup %7173  ;;  %4280 = vperm.xlu1 %6666, %v7168_v12  }
 0x310   :  { %4275 = vperm.xlu0 %6665, %v7170_v61  }
 0x311   :  { %v3772_v18 = vld [vmem:[%s11626_s3 + $0xd8] sm:$0xff] }
 0x312   :  { %5481 = vst.msk [vmem:[%s11627_s4 + $0x458] sm:$0xff] %vm5341_vm4, %v5252_v26  ;;  %v5981_v26 = vmul.f32 -1.442695, %v2129_v10  ;;  %v5140_v60 = vmul.f32 %v4111_v49, %v3772_v18  ;;  %v438_v10 = vld [vmem:[%s11625_s2 + $0x5b8] sm:$0xff]  ;;  %v325_v49 = vld [vmem:[%s11625_s2 + $0x230] sm:$0xff] }
 0x313   :  { %v2154_v5 = vadd.f32 %v9126_v8, %v438_v10  ;;  %v5872_v10 = vmul.f32 -1.442695, %v1584_v36  ;;  %v1589_v34 = vadd.f32 %v11686_v3, %v325_v49  ;;  %4850 = vperm.xlu1 %6666, %v7172_v2  }
 0x314   :  { %7189 = vpow2.f32 %v5981_v26  ;;  %4845 = vperm.xlu0 %6665, %v7174_v17  }
 0x315   :  { %7191 = vpow2.f32 %v5870_v42  ;;  %v5986_v36 = vmul.f32 -1.442695, %v2154_v5  ;;  %v5873_v61 = vmul.f32 -1.442695, %v1589_v34 }
 0x316   :  { %7193 = vpow2.f32 %v5869_v56 }
 0x317   :  { %7195 = vpow2.f32 %v5984_v48 }
 0x318   :  { %7197 = vpow2.f32 %v5983_v6 }
 0x319   :  { %v3771_v47 = vld [vmem:[%s11626_s3 + $0xd0] sm:$0xff]  ;;  %7199 = vpow2.f32 %v5872_v10 }
 0x31a   :  { %5480 = vst.msk [vmem:[%s11627_s4 + $0x450] sm:$0xff] %vm5341_vm4, %v5251_v4  ;;  %v9892_v4 = vpop.f32.mrb[96].mxu1  ;;  %v5139_v19 = vmul.f32 %v4106_v51, %v3771_v47  ;;  %v326_v47 = vld [vmem:[%s11625_s2 + $0x238] sm:$0xff] }
 0x31b   :  { %v9901_v20 = vpop.f32.mrb[97].mxu1  ;;  %v1594_v45 = vadd.f32 %v9138_v7, %v326_v47  ;;  %v4121_v7 = vpop.permute.xlu1 %4120 }
 0x31d   :  { %v5874_v5 = vmul.f32 -1.442695, %v1594_v45 }
 0x321   :  { %v3886_v18 = vld [vmem:[%s11626_s3 + $0x468] sm:$0xff] }
 0x322   :  { %5369 = vst.msk [vmem:[%s11627_s4 + $0xd8] sm:$0xff] %vm5341_vm4, %v5140_v60  ;;  %v5254_v40 = vmul.f32 %v4681_v13, %v3886_v18  ;;  %v440_v60 = vld [vmem:[%s11625_s2 + $0x5c8] sm:$0xff]  ;;  %v5871_v18 = vmul.f32 -1.442695, %v1579_v24  ;;  %v9947_v24 = vpop.f32.mrb[98].mxu1 }
 0x323   :  { %v2164_v56 = vadd.f32 %v9163_v44, %v440_v60 }
 0x324   :  { %7201 = vpow2.f32 %v5871_v18 }
 0x325   :  { %7203 = vpow2.f32 %v5986_v36  ;;  %v5988_v60 = vmul.f32 -1.442695, %v2164_v56 }
 0x329   :  { %v3885_v51 = vld [vmem:[%s11626_s3 + $0x460] sm:$0xff] }
 0x32a   :  { %5368 = vst.msk [vmem:[%s11627_s4 + $0xd0] sm:$0xff] %vm5341_vm4, %v5139_v19  ;;  %v9926_v19 = vpop.f32.mrb[98].mxu0  ;;  %v5253_v8 = vmul.f32 %v4676_v55, %v3885_v51  ;;  %v7176_v51 = vpop.eup %7175  ;;  %v5985_v55 = vmul.f32 -1.442695, %v2149_v33 }
 0x32b   :  { %v9932_v21 = vpop.f32.mrb[99].mxu0  ;;  %v7178_v47 = vpop.eup %7177  ;;  %4290 = vperm.xlu1 %6666, %v7176_v51  }
 0x32c   :  { %v9949_v49 = vpop.eup %7179  ;;  %v4691_v33 = vpop.permute.xlu1 %4690  ;;  %7205 = vpow2.f32 %v5985_v55  ;;  %4285 = vperm.xlu0 %6665, %v7178_v47  }
 0x32d   :  { %v9956_v44 = vpop.eup %7181  ;;  %7207 = vpow2.f32 %v5874_v5 }
 0x32e   :  { %v9965_v6 = vpop.eup %7183  ;;  %7209 = vpow2.f32 %v5873_v61 }
 0x32f   :  { %7211 = vpow2.f32 %v5988_v60  ;;  %4860 = vperm.xlu1 %6666, %v9949_v49   ;;  %v442_v49 = vld [vmem:[%s11625_s2 + $0x5d8] sm:$0xff] }
 0x330   :  { %v4131_v55 = vpop.permute.xlu1 %4130  ;;  %4855 = vperm.xlu0 %6665, %v9956_v44  }
 0x331   :  { %v3774_v26 = vld [vmem:[%s11626_s3 + $0xe8] sm:$0xff] }
 0x332   :  { %5483 = vst.msk [vmem:[%s11627_s4 + $0x468] sm:$0xff] %vm5341_vm4, %v5254_v40  ;;  %v5142_v13 = vmul.f32 %v4121_v7, %v3774_v26  ;;  %v4116_v40 = vpop.permute.xlu0 %4115  ;;  %v9971_v26 = vpop.eup %7185 }
 0x333   :  { %v7188_v18 = vpop.eup %7187  ;;  %4300 = vperm.xlu1 %6666, %v9965_v6  }
 0x334   :  { %v7190_v36 = vpop.eup %7189  ;;  %v3240_v56 = vadd.f32 1.0, %v7188_v18  ;;  %4295 = vperm.xlu0 %6665, %v9971_v26  }
 0x335   :  { %v7192_v17 = vpop.eup %7191 }
 0x336   :  { %v4686_v45 = vpop.permute.xlu0 %4685  ;;  %7213 = vrcp.f32 %v3240_v56 }
 0x339   :  { %v3773_v42 = vld [vmem:[%s11626_s3 + $0xe0] sm:$0xff] }
 0x33a   :  { %5482 = vst.msk [vmem:[%s11627_s4 + $0x460] sm:$0xff] %vm5341_vm4, %v5253_v8  ;;  %v5141_v3 = vmul.f32 %v4116_v40, %v3773_v42  ;;  %v9954_v8 = vpop.f32.mrb[99].mxu1  ;;  %v9973_v42 = vpop.f32.mrb[100].mxu0  ;;  %v3239_v40 = vadd.f32 1.0, %v7190_v36 }
 0x33b   :  { %v9994_v61 = vpop.f32.mrb[100].mxu1 }
 0x33c   :  { %7215 = vrcp.f32 %v3239_v40  ;;  %v328_v40 = vld [vmem:[%s11625_s2 + $0x248] sm:$0xff] }
 0x341   :  { %v3888_v48 = vld [vmem:[%s11626_s3 + $0x478] sm:$0xff] }
 0x342   :  { %5371 = vst.msk [vmem:[%s11627_s4 + $0xe8] sm:$0xff] %vm5341_vm4, %v5142_v13  ;;  %v5256_v10 = vmul.f32 %v4691_v33, %v3888_v48  ;;  %v9978_v13 = vpop.f32.mrb[101].mxu0  ;;  %v3128_v48 = vadd.f32 1.0, %v7192_v17  ;;  %v439_v33 = vld [vmem:[%s11625_s2 + $0x5c0] sm:$0xff] }
 0x343   :  { %v2159_v17 = vadd.f32 %v9173_v59, %v439_v33 }
 0x344   :  { %7217 = vrcp.f32 %v3128_v48 }
 0x349   :  { %v3887_v12 = vld [vmem:[%s11626_s3 + $0x470] sm:$0xff] }
 0x34a   :  { %5370 = vst.msk [vmem:[%s11627_s4 + $0xe0] sm:$0xff] %vm5341_vm4, %v5141_v3  ;;  %v5255_v34 = vmul.f32 %v4686_v45, %v3887_v12  ;;  %v7194_v3 = vpop.eup %7193  ;;  %v4126_v12 = vpop.permute.xlu0 %4125 }
 0x34b   :  { %v3127_v45 = vadd.f32 1.0, %v7194_v3 }
 0x34d   :  { %7219 = vrcp.f32 %v3127_v45 }
 0x351   :  { %v3776_v7 = vld [vmem:[%s11626_s3 + $0xf8] sm:$0xff] }
 0x352   :  { %5485 = vst.msk [vmem:[%s11627_s4 + $0x478] sm:$0xff] %vm5341_vm4, %v5256_v10  ;;  %v5144_v5 = vmul.f32 %v4131_v55, %v3776_v7  ;;  %v7196_v10 = vpop.eup %7195 }
 0x353   :  { %v7198_v7 = vpop.eup %7197  ;;  %v3242_v51 = vadd.f32 1.0, %v7196_v10  ;;  %v10020_v10 = vpop.f32.mrb[102].mxu0 }
 0x354   :  { %v7200_v56 = vpop.eup %7199  ;;  %v3241_v47 = vadd.f32 1.0, %v7198_v7  ;;  %11688 = vst [vmem:[#allocation16_spill] sm:$0xff] %v10020_v10 }
 0x355   :  { %v7202_v55 = vpop.eup %7201  ;;  %7221 = vrcp.f32 %v3242_v51  ;;  %v3130_v3 = vadd.f32 1.0, %v7200_v56  ;;  %v441_v56 = vld [vmem:[%s11625_s2 + $0x5d0] sm:$0xff] }
 0x356   :  { %v7204_v45 = vpop.eup %7203  ;;  %7223 = vrcp.f32 %v3241_v47  ;;  %v3129_v59 = vadd.f32 1.0, %v7202_v55  ;;  %v5987_v55 = vmul.f32 -1.442695, %v2159_v17  ;;  %v329_v17 = vld [vmem:[%s11625_s2 + $0x250] sm:$0xff]  ;;  %v2169_v6 = vadd.f32 %v9228_v32, %v441_v56 }
 0x357   :  { %v7206_v7 = vpop.eup %7205  ;;  %7225 = vrcp.f32 %v3130_v3  ;;  %v3244_v51 = vadd.f32 1.0, %v7204_v45 }
 0x358   :  { %v7208_v47 = vpop.eup %7207  ;;  %7227 = vrcp.f32 %v3129_v59  ;;  %v2174_v59 = vadd.f32 %v9223_v39, %v442_v49  ;;  %v444_v39 = vld [vmem:[%s11625_s2 + $0x5e8] sm:$0xff] }
 0x359   :  { %v3775_v2 = vld [vmem:[%s11626_s3 + $0xf0] sm:$0xff]  ;;  %7229 = vrcp.f32 %v3244_v51  ;;  %v3132_v45 = vadd.f32 1.0, %v7208_v47 }
 0x35a   :  { %5484 = vst.msk [vmem:[%s11627_s4 + $0x470] sm:$0xff] %vm5341_vm4, %v5255_v34  ;;  %v5143_v18 = vmul.f32 %v4126_v12, %v3775_v2  ;;  %v9999_v34 = vpop.f32.mrb[101].mxu1  ;;  %v4701_v2 = vpop.permute.xlu1 %4700  ;;  %v327_v12 = vld [vmem:[%s11625_s2 + $0x240] sm:$0xff] }
 0x35b   :  { %11687 = vst [vmem:[#allocation15_spill] sm:$0xff] %v9999_v34 }
 0x35e   :  { %v4141_v3 = vpop.permute.xlu1 %4140 }
 0x361   :  { %v3890_v60 = vld [vmem:[%s11626_s3 + $0x488] sm:$0xff] }
 0x362   :  { %5373 = vst.msk [vmem:[%s11627_s4 + $0xf8] sm:$0xff] %vm5341_vm4, %v5144_v5  ;;  %v5258_v48 = vmul.f32 %v4701_v2, %v3890_v60  ;;  %v4696_v5 = vpop.permute.xlu0 %4695  ;;  %v10029_v60 = vpop.f32.mrb[103].mxu0  ;;  %v3243_v2 = vadd.f32 1.0, %v7206_v7 }
 0x363   :  { %11689 = vst [vmem:[#allocation17_spill] sm:$0xff] %v10029_v60 }
 0x364   :  { %7231 = vrcp.f32 %v3243_v2 }
 0x365   :  { %7233 = vrcp.f32 %v3132_v45  ;;  %v5990_v45 = vmul.f32 -1.442695, %v2174_v59 }
 0x366   :  { %v4136_v10 = vpop.permute.xlu0 %4135 }
 0x369   :  { %v3889_v36 = vld [vmem:[%s11626_s3 + $0x480] sm:$0xff] }
 0x36a   :  { %5372 = vst.msk [vmem:[%s11627_s4 + $0xf0] sm:$0xff] %vm5341_vm4, %v5143_v18  ;;  %v5257_v33 = vmul.f32 %v4696_v5, %v3889_v36  ;;  %v1604_v36 = vadd.f32 %v9198_v15, %v328_v40  ;;  %v330_v15 = vld [vmem:[%s11625_s2 + $0x258] sm:$0xff]  ;;  %v7210_v40 = vpop.eup %7209 }
 0x36b   :  { %v3131_v7 = vadd.f32 1.0, %v7210_v40  ;;  %v1614_v32 = vadd.f32 %v9247_v54, %v330_v15  ;;  %v4706_v40 = vpop.permute.xlu0 %4705 }
 0x36c   :  { %v5876_v26 = vmul.f32 -1.442695, %v1604_v36  ;;  %v1609_v36 = vadd.f32 %v9254_v14, %v329_v17  ;;  %v5989_v17 = vmul.f32 -1.442695, %v2169_v6 }
 0x36d   :  { %7235 = vrcp.f32 %v3131_v7  ;;  %v331_v7 = vld [vmem:[%s11625_s2 + $0x260] sm:$0xff]  ;;  %v5878_v6 = vmul.f32 -1.442695, %v1614_v32 }
 0x371   :  { %v3778_v18 = vld [vmem:[%s11626_s3 + $0x108] sm:$0xff] }
 0x372   :  { %5487 = vst.msk [vmem:[%s11627_s4 + $0x488] sm:$0xff] %vm5341_vm4, %v5258_v48  ;;  %v11690_v48 = vld [vmem:[#allocation22_spill] sm:$0xff]  ;;  %v5146_v60 = vmul.f32 %v4141_v3, %v3778_v18  ;;  %v332_v3 = vld [vmem:[%s11625_s2 + $0x268] sm:$0xff] }
 0x373   :  { %v1599_v5 = vadd.f32 %v11690_v48, %v327_v12  ;;  %v7212_v12 = vpop.eup %7211 }
 0x374   :  { %v7214_v51 = vpop.eup %7213  ;;  %v3246_v47 = vadd.f32 1.0, %v7212_v12  ;;  %v2184_v12 = vadd.f32 %v9267_v28, %v444_v39  ;;  %v446_v28 = vld [vmem:[%s11625_s2 + $0x5f8] sm:$0xff] }
 0x375   :  { %v7216_v56 = vpop.eup %7215  ;;  %v5875_v2 = vmul.f32 -1.442695, %v1599_v5  ;;  %4870 = vperm.xlu1 %6666, %v7214_v51   ;;  %v10090_v5 = vpop.f32.mrb[104].mxu0 }
 0x376   :  { %v7218_v54 = vpop.eup %7217  ;;  %7237 = vrcp.f32 %v3246_v47  ;;  %11693 = vst [vmem:[#allocation20_spill] sm:$0xff] %v10090_v5  ;;  %4865 = vperm.xlu0 %6665, %v7216_v56   ;;  %v11694_v47 = vld [vmem:[#allocation23_spill] sm:$0xff]  ;;  %v10099_v59 = vpop.f32.mrb[105].mxu0  ;;  %v445_v56 = vld [vmem:[%s11625_s2 + $0x5f0] sm:$0xff] }
 0x377   :  { %7239 = vpow2.f32 %v5987_v55  ;;  %11695 = vst [vmem:[#allocation21_spill] sm:$0xff] %v10099_v59  ;;  %v4146_v5 = vpop.permute.xlu0 %4145 }
 0x378   :  { %7241 = vpow2.f32 %v5876_v26 }
 0x379   :  { %v3777_v44 = vld [vmem:[%s11626_s3 + $0x100] sm:$0xff]  ;;  %7243 = vpow2.f32 %v5875_v2  ;;  %4310 = vperm.xlu1 %6666, %v7218_v54  }
 0x37a   :  { %5486 = vst.msk [vmem:[%s11627_s4 + $0x480] sm:$0xff] %vm5341_vm4, %v5257_v33  ;;  %v10055_v33 = vpop.f32.mrb[102].mxu1  ;;  %v5145_v48 = vmul.f32 %v4136_v10, %v3777_v44  ;;  %v443_v44 = vld [vmem:[%s11625_s2 + $0x5e0] sm:$0xff]  ;;  %7245 = vpow2.f32 %v5990_v45 }
 0x37b   :  { %11691 = vst [vmem:[#allocation18_spill] sm:$0xff] %v10055_v33  ;;  %v10065_v49 = vpop.f32.mrb[103].mxu1  ;;  %v2179_v51 = vadd.f32 %v11694_v47, %v443_v44  ;;  %7247 = vpow2.f32 %v5989_v17 }
 0x37c   :  { %11692 = vst [vmem:[#allocation19_spill] sm:$0xff] %v10065_v49  ;;  %v10118_v33 = vpop.f32.mrb[104].mxu1  ;;  %7249 = vpow2.f32 %v5878_v6 }
 0x37d   :  { %v10124_v45 = vpop.f32.mrb[105].mxu1 }
 0x381   :  { %v3892_v18 = vld [vmem:[%s11626_s3 + $0x498] sm:$0xff] }
 0x382   :  { %5375 = vst.msk [vmem:[%s11627_s4 + $0x108] sm:$0xff] %vm5341_vm4, %v5146_v60  ;;  %v4711_v60 = vpop.permute.xlu1 %4710 }
 0x383   :  { %v5260_v15 = vmul.f32 %v4711_v60, %v3892_v18 }
 0x386   :  { %v4151_v26 = vpop.permute.xlu1 %4150 }
 0x389   :  { %v3891_v10 = vld [vmem:[%s11626_s3 + $0x490] sm:$0xff] }
 0x38a   :  { %5374 = vst.msk [vmem:[%s11627_s4 + $0x100] sm:$0xff] %vm5341_vm4, %v5145_v48  ;;  %v7220_v48 = vpop.eup %7219  ;;  %v5259_v14 = vmul.f32 %v4706_v40, %v3891_v10  ;;  %v11696_v10 = vld [vmem:[#allocation24_spill] sm:$0xff]  ;;  %v11697_v40 = vld [vmem:[#allocation25_spill] sm:$0xff] }
 0x38b   :  { %v7222_v39 = vpop.eup %7221  ;;  %v1624_v44 = vadd.f32 %v11696_v10, %v332_v3  ;;  %v1619_v47 = vadd.f32 %v11697_v40, %v331_v7  ;;  %v5992_v3 = vmul.f32 -1.442695, %v2184_v12  ;;  %v11698_v10 = vld [vmem:[#allocation26_spill] sm:$0xff]  ;;  %4305 = vperm.xlu0 %6665, %v7220_v48   ;;  %v4721_v48 = vpop.permute.xlu1 %4720 }
 0x38c   :  { %v7224_v60 = vpop.eup %7223  ;;  %v2194_v49 = vadd.f32 %v11698_v10, %v446_v28  ;;  %v11699_v7 = vld [vmem:[#allocation2_spill] sm:$0xff]  ;;  %4880 = vperm.xlu1 %6666, %v7222_v39  }
 0x38d   :  { %v7226_v59 = vpop.eup %7225  ;;  %v2189_v40 = vadd.f32 %v11699_v7, %v445_v56  ;;  %v5880_v12 = vmul.f32 -1.442695, %v1624_v44  ;;  %v5879_v17 = vmul.f32 -1.442695, %v1619_v47  ;;  %v10141_v56 = vpop.f32.mrb[106].mxu0 }
 0x38e   :  { %v7228_v2 = vpop.eup %7227  ;;  %v5994_v6 = vmul.f32 -1.442695, %v2194_v49  ;;  %v10148_v47 = vpop.f32.mrb[107].mxu0 }
 0x38f   :  { %4875 = vperm.xlu0 %6665, %v7224_v60   ;;  %v4161_v60 = vpop.permute.xlu1 %4160  ;;  %v10163_v7 = vpop.f32.mrb[106].mxu1 }
 0x390   :  { %4320 = vperm.xlu1 %6666, %v7226_v59  }
 0x391   :  { %v3780_v18 = vld [vmem:[%s11626_s3 + $0x118] sm:$0xff] }
 0x392   :  { %5489 = vst.msk [vmem:[%s11627_s4 + $0x498] sm:$0xff] %vm5341_vm4, %v5260_v15  ;;  %v5877_v15 = vmul.f32 -1.442695, %v1609_v36  ;;  %v5148_v32 = vmul.f32 %v4151_v26, %v3780_v18  ;;  %v7230_v18 = vpop.eup %7229 }
 0x393   :  { %4315 = vperm.xlu0 %6665, %v7228_v2  }
 0x394   :  { %7251 = vpow2.f32 %v5877_v15  ;;  %v5993_v15 = vmul.f32 -1.442695, %v2189_v40  ;;  %4890 = vperm.xlu1 %6666, %v7230_v18  }
 0x395   :  { %7253 = vpow2.f32 %v5992_v3 }
 0x399   :  { %v3779_v55 = vld [vmem:[%s11626_s3 + $0x110] sm:$0xff] }
 0x39a   :  { %5488 = vst.msk [vmem:[%s11627_s4 + $0x490] sm:$0xff] %vm5341_vm4, %v5259_v14  ;;  %v5147_v34 = vmul.f32 %v4146_v5, %v3779_v55  ;;  %v5991_v14 = vmul.f32 -1.442695, %v2179_v51  ;;  %v10133_v5 = vpop.eup %7231  ;;  %v4716_v55 = vpop.permute.xlu0 %4715 }
 0x39b   :  { %v10139_v51 = vpop.eup %7233  ;;  %4885 = vperm.xlu0 %6665, %v10133_v5  }
 0x39c   :  { %v10143_v44 = vpop.eup %7235  ;;  %7255 = vpow2.f32 %v5991_v14  ;;  %4330 = vperm.xlu1 %6666, %v10139_v51   ;;  %v335_v51 = vld [vmem:[%s11625_s2 + $0x280] sm:$0xff] }
 0x39d   :  { %7257 = vpow2.f32 %v5880_v12 }
 0x39e   :  { %7259 = vpow2.f32 %v5879_v17  ;;  %v4156_v14 = vpop.permute.xlu0 %4155 }
 0x39f   :  { %7261 = vpow2.f32 %v5994_v6  ;;  %4325 = vperm.xlu0 %6665, %v10143_v44  }
 0x3a0   :  { %7263 = vpow2.f32 %v5993_v15 }
 0x3a1   :  { %v3894_v36 = vld [vmem:[%s11626_s3 + $0x4a8] sm:$0xff] }
 0x3a2   :  { %5377 = vst.msk [vmem:[%s11627_s4 + $0x118] sm:$0xff] %vm5341_vm4, %v5148_v32  ;;  %v5262_v28 = vmul.f32 %v4721_v48, %v3894_v36  ;;  %v10150_v32 = vpop.eup %7237 }
 0x3a3   :  { %v7240_v39 = vpop.eup %7239  ;;  %4900 = vperm.xlu1 %6666, %v10150_v32  }
 0x3a4   :  { %v7242_v3 = vpop.eup %7241  ;;  %v3245_v10 = vadd.f32 1.0, %v7240_v39 }
 0x3a5   :  { %v7244_v40 = vpop.eup %7243 }
 0x3a6   :  { %v7246_v17 = vpop.eup %7245  ;;  %7265 = vrcp.f32 %v3245_v10  ;;  %v10187_v10 = vpop.f32.mrb[108].mxu0 }
 0x3a7   :  { %v7248_v2 = vpop.eup %7247  ;;  %v3248_v6 = vadd.f32 1.0, %v7246_v17 }
 0x3a8   :  { %v7250_v15 = vpop.eup %7249 }
 0x3a9   :  { %v3893_v54 = vld [vmem:[%s11626_s3 + $0x4a0] sm:$0xff] }
 0x3aa   :  { %5376 = vst.msk [vmem:[%s11627_s4 + $0x110] sm:$0xff] %vm5341_vm4, %v5147_v34  ;;  %v5261_v26 = vmul.f32 %v4716_v55, %v3893_v54  ;;  %v3134_v54 = vadd.f32 1.0, %v7242_v3  ;;  %v3133_v55 = vadd.f32 1.0, %v7244_v40  ;;  %v333_v3 = vld [vmem:[%s11625_s2 + $0x270] sm:$0xff] }
 0x3ac   :  { %7267 = vrcp.f32 %v3134_v54 }
 0x3ad   :  { %7269 = vrcp.f32 %v3133_v55  ;;  %v11700_v55 = vld [vmem:[#allocation3_spill] sm:$0xff] }
 0x3ae   :  { %7271 = vrcp.f32 %v3248_v6 }
 0x3b1   :  { %v3782_v34 = vld [vmem:[%s11626_s3 + $0x128] sm:$0xff] }
 0x3b2   :  { %5491 = vst.msk [vmem:[%s11627_s4 + $0x4a8] sm:$0xff] %vm5341_vm4, %v5262_v28  ;;  %v5150_v36 = vmul.f32 %v4161_v60, %v3782_v34  ;;  %v10168_v28 = vpop.f32.mrb[107].mxu1  ;;  %v334_v34 = vld [vmem:[%s11625_s2 + $0x278] sm:$0xff]  ;;  %v4726_v60 = vpop.permute.xlu0 %4725 }
 0x3b3   :  { %v1634_v5 = vadd.f32 %v11700_v55, %v334_v34 }
 0x3b5   :  { %v5882_v44 = vmul.f32 -1.442695, %v1634_v5 }
 0x3b6   :  { %v4166_v55 = vpop.permute.xlu0 %4165 }
 0x3b9   :  { %v3781_v49 = vld [vmem:[%s11626_s3 + $0x120] sm:$0xff] }
 0x3ba   :  { %5490 = vst.msk [vmem:[%s11627_s4 + $0x4a0] sm:$0xff] %vm5341_vm4, %v5261_v26  ;;  %v5149_v48 = vmul.f32 %v4156_v14, %v3781_v49  ;;  %v4731_v26 = vpop.permute.xlu1 %4730  ;;  %v3247_v49 = vadd.f32 1.0, %v7248_v2  ;;  %v3136_v14 = vadd.f32 1.0, %v7250_v15  ;;  %v11701_v15 = vld [vmem:[#allocation27_spill] sm:$0xff] }
 0x3bc   :  { %7273 = vrcp.f32 %v3247_v49  ;;  %v1629_v49 = vadd.f32 %v11701_v15, %v333_v3 }
 0x3bd   :  { %7275 = vrcp.f32 %v3136_v14  ;;  %v336_v14 = vld [vmem:[%s11625_s2 + $0x288] sm:$0xff] }
 0x3c1   :  { %v3896_v12 = vld [vmem:[%s11626_s3 + $0x4b8] sm:$0xff] }
 0x3c2   :  { %5379 = vst.msk [vmem:[%s11627_s4 + $0x128] sm:$0xff] %vm5341_vm4, %v5150_v36  ;;  %v5264_v39 = vmul.f32 %v4731_v26, %v3896_v12  ;;  %v7252_v36 = vpop.eup %7251  ;;  %v4171_v26 = vpop.permute.xlu1 %4170 }
 0x3c3   :  { %v7254_v12 = vpop.eup %7253  ;;  %v3135_v18 = vadd.f32 1.0, %v7252_v36 }
 0x3c4   :  { %v7256_v2 = vpop.eup %7255  ;;  %v3250_v6 = vadd.f32 1.0, %v7254_v12  ;;  %v10218_v12 = vpop.f32.mrb[108].mxu1 }
 0x3c5   :  { %v7258_v34 = vpop.eup %7257  ;;  %7277 = vrcp.f32 %v3135_v18  ;;  %11702 = vst [vmem:[#allocation22_spill] sm:$0xff] %v10218_v12 }
 0x3c6   :  { %7279 = vrcp.f32 %v3250_v6  ;;  %v3138_v3 = vadd.f32 1.0, %v7258_v34  ;;  %v4741_v5 = vpop.permute.xlu1 %4740 }
 0x3c9   :  { %v3895_v59 = vld [vmem:[%s11626_s3 + $0x4b0] sm:$0xff] }
 0x3ca   :  { %5378 = vst.msk [vmem:[%s11627_s4 + $0x120] sm:$0xff] %vm5341_vm4, %v5149_v48  ;;  %v5263_v40 = vmul.f32 %v4726_v60, %v3895_v59  ;;  %v10193_v48 = vpop.f32.mrb[109].mxu0  ;;  %v448_v59 = vld [vmem:[%s11625_s2 + $0x608] sm:$0xff]  ;;  %v3249_v60 = vadd.f32 1.0, %v7256_v2  ;;  %v10228_v2 = vpop.f32.mrb[109].mxu1 }
 0x3cb   :  { %11703 = vst [vmem:[#allocation23_spill] sm:$0xff] %v10228_v2  ;;  %v4736_v2 = vpop.permute.xlu0 %4735 }
 0x3cc   :  { %7281 = vrcp.f32 %v3249_v60  ;;  %v5881_v60 = vmul.f32 -1.442695, %v1629_v49  ;;  %v338_v49 = vld [vmem:[%s11625_s2 + $0x298] sm:$0xff] }
 0x3cd   :  { %7283 = vrcp.f32 %v3138_v3  ;;  %v1639_v3 = vadd.f32 %v9419_v52, %v335_v51  ;;  %v337_v52 = vld [vmem:[%s11625_s2 + $0x290] sm:$0xff] }
 0x3d1   :  { %v3784_v54 = vld [vmem:[%s11626_s3 + $0x138] sm:$0xff] }
 0x3d2   :  { %5493 = vst.msk [vmem:[%s11627_s4 + $0x4b8] sm:$0xff] %vm5341_vm4, %v5264_v39  ;;  %v447_v39 = vld [vmem:[%s11625_s2 + $0x600] sm:$0xff]  ;;  %v5152_v36 = vmul.f32 %v4171_v26, %v3784_v54  ;;  %v2204_v54 = vadd.f32 %v9393_v22, %v448_v59  ;;  %v450_v59 = vld [vmem:[%s11625_s2 + $0x618] sm:$0xff] }
 0x3d3   :  { %v2199_v22 = vadd.f32 %v9396_v50, %v447_v39  ;;  %v449_v50 = vld [vmem:[%s11625_s2 + $0x610] sm:$0xff] }
 0x3d9   :  { %v3783_v17 = vld [vmem:[%s11626_s3 + $0x130] sm:$0xff] }
 0x3da   :  { %5492 = vst.msk [vmem:[%s11627_s4 + $0x4b0] sm:$0xff] %vm5341_vm4, %v5263_v40  ;;  %v7260_v40 = vpop.eup %7259  ;;  %v5151_v15 = vmul.f32 %v4166_v55, %v3783_v17 }
 0x3db   :  { %v7262_v26 = vpop.eup %7261  ;;  %v3137_v12 = vadd.f32 1.0, %v7260_v40 }
 0x3dc   :  { %v7264_v6 = vpop.eup %7263  ;;  %v3252_v34 = vadd.f32 1.0, %v7262_v26  ;;  %v5996_v26 = vmul.f32 -1.442695, %v2204_v54  ;;  %v5995_v54 = vmul.f32 -1.442695, %v2199_v22  ;;  %v1654_v22 = vadd.f32 %v9460_v23, %v338_v49 }
 0x3dd   :  { %v7266_v39 = vpop.eup %7265  ;;  %7285 = vrcp.f32 %v3137_v12  ;;  %v3251_v55 = vadd.f32 1.0, %v7264_v6  ;;  %v4181_v6 = vpop.permute.xlu1 %4180 }
 0x3de   :  { %7287 = vrcp.f32 %v3252_v34  ;;  %4895 = vperm.xlu0 %6665, %v7266_v39   ;;  %v4176_v39 = vpop.permute.xlu0 %4175 }
 0x3df   :  { %7289 = vrcp.f32 %v3251_v55  ;;  %v5883_v55 = vmul.f32 -1.442695, %v1639_v3 }
 0x3e0   :  { %7291 = vpow2.f32 %v5882_v44  ;;  %v1649_v44 = vadd.f32 %v9465_v16, %v337_v52  ;;  %v11705_v52 = vld [vmem:[#allocation4_spill] sm:$0xff] }
 0x3e1   :  { %v3898_v18 = vld [vmem:[%s11626_s3 + $0x4c8] sm:$0xff]  ;;  %7293 = vpow2.f32 %v5881_v60 }
 0x3e2   :  { %5381 = vst.msk [vmem:[%s11627_s4 + $0x138] sm:$0xff] %vm5341_vm4, %v5152_v36  ;;  %v1644_v36 = vadd.f32 %v9415_v29, %v336_v14  ;;  %v5266_v40 = vmul.f32 %v4741_v5, %v3898_v18  ;;  %v7268_v29 = vpop.eup %7267  ;;  %v2214_v18 = vadd.f32 %v9439_v38, %v450_v59  ;;  %v2209_v38 = vadd.f32 %v9441_v27, %v449_v50  ;;  %v451_v5 = vld [vmem:[%s11625_s2 + $0x620] sm:$0xff] }
 0x3e3   :  { %v7270_v51 = vpop.eup %7269  ;;  %4340 = vperm.xlu1 %6666, %v7268_v29   ;;  %7295 = vpow2.f32 %v5996_v26 }
 0x3e4   :  { %v7272_v59 = vpop.eup %7271  ;;  %v5884_v34 = vmul.f32 -1.442695, %v1644_v36  ;;  %4335 = vperm.xlu0 %6665, %v7270_v51   ;;  %v5998_v49 = vmul.f32 -1.442695, %v2214_v18  ;;  %7297 = vpow2.f32 %v5995_v54  ;;  %v2219_v51 = vadd.f32 %v11705_v52, %v451_v5  ;;  %v11706_v54 = vld [vmem:[#allocation5_spill] sm:$0xff] }
 0x3e5   :  { %v7274_v27 = vpop.eup %7273  ;;  %v5886_v18 = vmul.f32 -1.442695, %v1654_v22 }
 0x3e6   :  { %v7276_v36 = vpop.eup %7275  ;;  %7299 = vpow2.f32 %v5884_v34 }
 0x3e7   :  { %v7278_v16 = vpop.eup %7277  ;;  %7301 = vpow2.f32 %v5883_v55  ;;  %4910 = vperm.xlu1 %6666, %v7272_v59  }
 0x3e8   :  { %4905 = vperm.xlu0 %6665, %v7274_v27   ;;  %7303 = vpow2.f32 %v5998_v49  ;;  %v5999_v27 = vmul.f32 -1.442695, %v2219_v51 }
 0x3e9   :  { %v3897_v17 = vld [vmem:[%s11626_s3 + $0x4c0] sm:$0xff] }
 0x3ea   :  { %5380 = vst.msk [vmem:[%s11627_s4 + $0x130] sm:$0xff] %vm5341_vm4, %v5151_v15  ;;  %v10254_v15 = vpop.f32.mrb[110].mxu0  ;;  %v5265_v14 = vmul.f32 %v4736_v2, %v3897_v17  ;;  %v452_v17 = vld [vmem:[%s11625_s2 + $0x628] sm:$0xff] }
 0x3eb   :  { %v10263_v32 = vpop.f32.mrb[111].mxu0  ;;  %v2224_v29 = vadd.f32 %v9490_v57, %v452_v17  ;;  %v4751_v57 = vpop.permute.xlu1 %4750  ;;  %4350 = vperm.xlu1 %6666, %v7276_v36  }
 0x3ec   :  { %4345 = vperm.xlu0 %6665, %v7278_v16  }
 0x3ed   :  { %v6000_v22 = vmul.f32 -1.442695, %v2224_v29 }
 0x3f1   :  { %v3786_v12 = vld [vmem:[%s11626_s3 + $0x148] sm:$0xff] }
 0x3f2   :  { %5495 = vst.msk [vmem:[%s11627_s4 + $0x4c8] sm:$0xff] %vm5341_vm4, %v5266_v40  ;;  %v5154_v50 = vmul.f32 %v4181_v6, %v3786_v12  ;;  %v340_v40 = vld [vmem:[%s11625_s2 + $0x2a8] sm:$0xff]  ;;  %v5997_v12 = vmul.f32 -1.442695, %v2209_v38  ;;  %v10309_v38 = vpop.f32.mrb[112].mxu0 }
 0x3f3   :  { %v1664_v17 = vadd.f32 %v11706_v54, %v340_v40 }
 0x3f4   :  { %7305 = vpow2.f32 %v5997_v12 }
 0x3f5   :  { %7307 = vpow2.f32 %v5886_v18 }
 0x3f9   :  { %v3785_v2 = vld [vmem:[%s11626_s3 + $0x140] sm:$0xff] }
 0x3fa   :  { %5494 = vst.msk [vmem:[%s11627_s4 + $0x4c0] sm:$0xff] %vm5341_vm4, %v5265_v14  ;;  %v10288_v14 = vpop.f32.mrb[110].mxu1  ;;  %v5153_v23 = vmul.f32 %v4176_v39, %v3785_v2  ;;  %v7280_v2 = vpop.eup %7279 }
 0x3fb   :  { %v10294_v3 = vpop.f32.mrb[111].mxu1  ;;  %v7282_v6 = vpop.eup %7281  ;;  %4920 = vperm.xlu1 %6666, %v7280_v2  }
 0x3fc   :  { %11704 = vst [vmem:[#allocation24_spill] sm:$0xff] %v10294_v3  ;;  %v4746_v39 = vpop.permute.xlu0 %4745  ;;  %v5885_v3 = vmul.f32 -1.442695, %v1649_v44  ;;  %v10311_v5 = vpop.eup %7283  ;;  %4915 = vperm.xlu0 %6665, %v7282_v6  }
 0x3fd   :  { %v10318_v40 = vpop.eup %7285  ;;  %v4191_v44 = vpop.permute.xlu1 %4190 }
 0x3fe   :  { %v10327_v55 = vpop.eup %7287  ;;  %7309 = vpow2.f32 %v5885_v3  ;;  %v10335_v12 = vpop.f32.mrb[112].mxu1 }
 0x3ff   :  { %v10333_v49 = vpop.eup %7289  ;;  %7311 = vpow2.f32 %v6000_v22  ;;  %4360 = vperm.xlu1 %6666, %v10311_v5  }
 0x400   :  { %7313 = vpow2.f32 %v5999_v27  ;;  %4355 = vperm.xlu0 %6665, %v10318_v40  }
 0x401   :  { %v3900_v60 = vld [vmem:[%s11626_s3 + $0x4d8] sm:$0xff] }
 0x402   :  { %5383 = vst.msk [vmem:[%s11627_s4 + $0x148] sm:$0xff] %vm5341_vm4, %v5154_v50  ;;  %v5268_v50 = vmul.f32 %v4751_v57, %v3900_v60  ;;  %v5888_v60 = vmul.f32 -1.442695, %v1664_v17  ;;  %v7292_v57 = vpop.eup %7291 }
 0x403   :  { %v7294_v18 = vpop.eup %7293  ;;  %v3140_v17 = vadd.f32 1.0, %v7292_v57  ;;  %4930 = vperm.xlu1 %6666, %v10327_v55  }
 0x404   :  { %v7296_v3 = vpop.eup %7295  ;;  %v3139_v16 = vadd.f32 1.0, %v7294_v18  ;;  %7315 = vpow2.f32 %v5888_v60  ;;  %4925 = vperm.xlu0 %6665, %v10333_v49  }
 0x405   :  { %7317 = vrcp.f32 %v3140_v17  ;;  %v11707_v17 = vld [vmem:[#allocation6_spill] sm:$0xff] }
 0x406   :  { %7319 = vrcp.f32 %v3139_v16 }
 0x409   :  { %v3899_v26 = vld [vmem:[%s11626_s3 + $0x4d0] sm:$0xff] }
 0x40a   :  { %5382 = vst.msk [vmem:[%s11627_s4 + $0x140] sm:$0xff] %vm5341_vm4, %v5153_v23  ;;  %v5267_v52 = vmul.f32 %v4746_v39, %v3899_v26  ;;  %v10316_v23 = vpop.f32.mrb[113].mxu0  ;;  %v4186_v26 = vpop.permute.xlu0 %4185 }
 0x40b   :  { %v4761_v39 = vpop.permute.xlu1 %4760 }
 0x40f   :  { %v4201_v6 = vpop.permute.xlu1 %4200 }
 0x411   :  { %v3788_v34 = vld [vmem:[%s11626_s3 + $0x158] sm:$0xff] }
 0x412   :  { %5497 = vst.msk [vmem:[%s11627_s4 + $0x4d8] sm:$0xff] %vm5341_vm4, %v5268_v50  ;;  %v5156_v29 = vmul.f32 %v4191_v44, %v3788_v34  ;;  %v10340_v50 = vpop.f32.mrb[113].mxu1  ;;  %v3254_v34 = vadd.f32 1.0, %v7296_v3  ;;  %v339_v44 = vld [vmem:[%s11625_s2 + $0x2a0] sm:$0xff]  ;;  %v454_v3 = vld [vmem:[%s11625_s2 + $0x638] sm:$0xff] }
 0x414   :  { %7321 = vrcp.f32 %v3254_v34 }
 0x419   :  { %v3787_v59 = vld [vmem:[%s11626_s3 + $0x150] sm:$0xff] }
 0x41a   :  { %5496 = vst.msk [vmem:[%s11627_s4 + $0x4d0] sm:$0xff] %vm5341_vm4, %v5267_v52  ;;  %v5155_v51 = vmul.f32 %v4186_v26, %v3787_v59  ;;  %v7298_v52 = vpop.eup %7297  ;;  %v4756_v59 = vpop.permute.xlu0 %4755 }
 0x41b   :  { %v7300_v27 = vpop.eup %7299 }
 0x41c   :  { %v7302_v60 = vpop.eup %7301 }
 0x41d   :  { %v3141_v18 = vadd.f32 1.0, %v7302_v60  ;;  %v2234_v60 = vadd.f32 %v9560_v58, %v454_v3  ;;  %v456_v58 = vld [vmem:[%s11625_s2 + $0x648] sm:$0xff] }
 0x41e   :  { %v4196_v34 = vpop.permute.xlu0 %4195 }
 0x421   :  { %v3902_v54 = vld [vmem:[%s11626_s3 + $0x4e8] sm:$0xff] }
 0x422   :  { %5385 = vst.msk [vmem:[%s11627_s4 + $0x158] sm:$0xff] %vm5341_vm4, %v5156_v29  ;;  %v5270_v22 = vmul.f32 %v4761_v39, %v3902_v54  ;;  %v3253_v29 = vadd.f32 1.0, %v7298_v52  ;;  %v7304_v54 = vpop.eup %7303 }
 0x423   :  { %v7306_v16 = vpop.eup %7305  ;;  %v3256_v39 = vadd.f32 1.0, %v7304_v54 }
 0x424   :  { %7323 = vrcp.f32 %v3253_v29 }
 0x429   :  { %v3901_v36 = vld [vmem:[%s11626_s3 + $0x4e0] sm:$0xff] }
 0x42a   :  { %5384 = vst.msk [vmem:[%s11627_s4 + $0x150] sm:$0xff] %vm5341_vm4, %v5155_v51  ;;  %v5269_v26 = vmul.f32 %v4756_v59, %v3901_v36  ;;  %v3142_v51 = vadd.f32 1.0, %v7300_v27  ;;  %v1659_v36 = vadd.f32 %v11707_v17, %v339_v44  ;;  %v7308_v59 = vpop.eup %7307  ;;  %v3255_v27 = vadd.f32 1.0, %v7306_v16 }
 0x42b   :  { %v3144_v5 = vadd.f32 1.0, %v7308_v59 }
 0x42c   :  { %7325 = vrcp.f32 %v3142_v51  ;;  %v341_v51 = vld [vmem:[%s11625_s2 + $0x2b0] sm:$0xff] }
 0x42d   :  { %7327 = vrcp.f32 %v3141_v18  ;;  %v5887_v18 = vmul.f32 -1.442695, %v1659_v36  ;;  %v455_v36 = vld [vmem:[%s11625_s2 + $0x640] sm:$0xff] }
 0x42e   :  { %7329 = vrcp.f32 %v3256_v39 }
 0x42f   :  { %7331 = vrcp.f32 %v3255_v27 }
 0x430   :  { %7333 = vrcp.f32 %v3144_v5 }
 0x431   :  { %v3790_v57 = vld [vmem:[%s11626_s3 + $0x168] sm:$0xff] }
 0x432   :  { %5499 = vst.msk [vmem:[%s11627_s4 + $0x4e8] sm:$0xff] %vm5341_vm4, %v5270_v22  ;;  %v5158_v52 = vmul.f32 %v4201_v6, %v3790_v57  ;;  %v453_v22 = vld [vmem:[%s11625_s2 + $0x630] sm:$0xff]  ;;  %v7310_v57 = vpop.eup %7309  ;;  %v4771_v6 = vpop.permute.xlu1 %4770 }
 0x433   :  { %v3143_v54 = vadd.f32 1.0, %v7310_v57  ;;  %v2229_v17 = vadd.f32 %v9566_v9, %v453_v22  ;;  %v2244_v57 = vadd.f32 %v9611_v53, %v456_v58 }
 0x435   :  { %7335 = vrcp.f32 %v3143_v54 }
 0x439   :  { %v3789_v2 = vld [vmem:[%s11626_s3 + $0x160] sm:$0xff] }
 0x43a   :  { %5498 = vst.msk [vmem:[%s11627_s4 + $0x4e0] sm:$0xff] %vm5341_vm4, %v5269_v26  ;;  %v5157_v29 = vmul.f32 %v4196_v34, %v3789_v2  ;;  %v342_v26 = vld [vmem:[%s11625_s2 + $0x2b8] sm:$0xff]  ;;  %v7312_v2 = vpop.eup %7311 }
 0x43b   :  { %v7314_v3 = vpop.eup %7313  ;;  %v3258_v16 = vadd.f32 1.0, %v7312_v2  ;;  %v1674_v34 = vadd.f32 %v9585_v46, %v342_v26  ;;  %v344_v46 = vld [vmem:[%s11625_s2 + $0x2c8] sm:$0xff]  ;;  %v6002_v26 = vmul.f32 -1.442695, %v2234_v60  ;;  %v2239_v60 = vadd.f32 %v9616_v11, %v455_v36  ;;  %v458_v2 = vld [vmem:[%s11625_s2 + $0x658] sm:$0xff] }
 0x43c   :  { %v7316_v59 = vpop.eup %7315  ;;  %v3257_v9 = vadd.f32 1.0, %v7314_v3  ;;  %v1684_v3 = vadd.f32 %v9632_v31, %v344_v46  ;;  %v11708_v36 = vld [vmem:[#allocation7_spill] sm:$0xff] }
 0x43d   :  { %v7318_v55 = vpop.eup %7317  ;;  %7337 = vrcp.f32 %v3258_v16  ;;  %v5890_v58 = vmul.f32 -1.442695, %v1674_v34  ;;  %v457_v16 = vld [vmem:[%s11625_s2 + $0x650] sm:$0xff]  ;;  %v346_v34 = vld [vmem:[%s11625_s2 + $0x2d8] sm:$0xff] }
 0x43e   :  { %v7320_v5 = vpop.eup %7319  ;;  %7339 = vrcp.f32 %v3257_v9  ;;  %4370 = vperm.xlu1 %6666, %v7318_v55   ;;  %v6004_v9 = vmul.f32 -1.442695, %v2244_v57 }
 0x43f   :  { %v7322_v53 = vpop.eup %7321  ;;  %4365 = vperm.xlu0 %6665, %v7320_v5  }
 0x441   :  { %v3904_v44 = vld [vmem:[%s11626_s3 + $0x4f8] sm:$0xff] }
 0x442   :  { %5387 = vst.msk [vmem:[%s11627_s4 + $0x168] sm:$0xff] %vm5341_vm4, %v5158_v52  ;;  %v5272_v39 = vmul.f32 %v4771_v6, %v3904_v44  ;;  %v4766_v52 = vpop.permute.xlu0 %4765  ;;  %v3146_v44 = vadd.f32 1.0, %v7316_v59  ;;  %4940 = vperm.xlu1 %6666, %v7322_v53  }
 0x444   :  { %7341 = vrcp.f32 %v3146_v44  ;;  %v6003_v44 = vmul.f32 -1.442695, %v2239_v60  ;;  %v11712_v60 = vld [vmem:[#allocation10_spill] sm:$0xff] }
 0x445   :  { %7343 = vpow2.f32 %v5887_v18 }
 0x446   :  { %v4206_v6 = vpop.permute.xlu0 %4205  ;;  %7345 = vpow2.f32 %v6002_v26  ;;  %v11710_v26 = vld [vmem:[#allocation9_spill] sm:$0xff] }
 0x449   :  { %v3903_v40 = vld [vmem:[%s11626_s3 + $0x4f0] sm:$0xff] }
 0x44a   :  { %5386 = vst.msk [vmem:[%s11627_s4 + $0x160] sm:$0xff] %vm5341_vm4, %v5157_v29  ;;  %v5271_v22 = vmul.f32 %v4766_v52, %v3903_v40  ;;  %v1669_v29 = vadd.f32 %v9592_v63, %v341_v51  ;;  %v343_v63 = vld [vmem:[%s11625_s2 + $0x2c0] sm:$0xff]  ;;  %v6001_v40 = vmul.f32 -1.442695, %v2229_v17  ;;  %v4211_v51 = vpop.permute.xlu1 %4210  ;;  %v7324_v17 = vpop.eup %7323 }
 0x44b   :  { %v1679_v59 = vadd.f32 %v11708_v36, %v343_v63  ;;  %v7326_v31 = vpop.eup %7325  ;;  %v4776_v5 = vpop.permute.xlu0 %4775  ;;  %4935 = vperm.xlu0 %6665, %v7324_v17  }
 0x44c   :  { %v5889_v11 = vmul.f32 -1.442695, %v1669_v29  ;;  %v345_v29 = vld [vmem:[%s11625_s2 + $0x2d0] sm:$0xff]  ;;  %v7328_v46 = vpop.eup %7327  ;;  %7347 = vpow2.f32 %v6001_v40  ;;  %4380 = vperm.xlu1 %6666, %v7326_v31  }
 0x44d   :  { %v7330_v63 = vpop.eup %7329  ;;  %7349 = vpow2.f32 %v5890_v58  ;;  %v5891_v36 = vmul.f32 -1.442695, %v1679_v59 }
 0x44e   :  { %v4781_v55 = vpop.permute.xlu1 %4780  ;;  %7351 = vpow2.f32 %v5889_v11 }
 0x44f   :  { %7353 = vpow2.f32 %v6004_v9  ;;  %4375 = vperm.xlu0 %6665, %v7328_v46  }
 0x450   :  { %7355 = vpow2.f32 %v6003_v44  ;;  %4950 = vperm.xlu1 %6666, %v7330_v63  }
 0x451   :  { %v3792_v27 = vld [vmem:[%s11626_s3 + $0x178] sm:$0xff] }
 0x452   :  { %5501 = vst.msk [vmem:[%s11627_s4 + $0x4f8] sm:$0xff] %vm5341_vm4, %v5272_v39  ;;  %v5160_v54 = vmul.f32 %v4211_v51, %v3792_v27  ;;  %v5892_v51 = vmul.f32 -1.442695, %v1684_v3  ;;  %v4221_v17 = vpop.permute.xlu1 %4220 }
 0x454   :  { %7357 = vpow2.f32 %v5892_v51 }
 0x455   :  { %7359 = vpow2.f32 %v5891_v36 }
 0x456   :  { %v4791_v46 = vpop.permute.xlu1 %4790 }
 0x459   :  { %v3791_v49 = vld [vmem:[%s11626_s3 + $0x170] sm:$0xff] }
 0x45a   :  { %5500 = vst.msk [vmem:[%s11627_s4 + $0x4f0] sm:$0xff] %vm5341_vm4, %v5271_v22  ;;  %v5159_v39 = vmul.f32 %v4206_v6, %v3791_v49  ;;  %v11709_v22 = vld [vmem:[#allocation8_spill] sm:$0xff]  ;;  %v2249_v49 = vadd.f32 %v11710_v26, %v457_v16  ;;  %v7332_v6 = vpop.eup %7331 }
 0x45b   :  { %v2254_v27 = vadd.f32 %v11709_v22, %v458_v2  ;;  %v11711_v2 = vld [vmem:[#allocation11_spill] sm:$0xff]  ;;  %v1689_v22 = vadd.f32 %v11712_v60, %v345_v29  ;;  %v7334_v16 = vpop.eup %7333  ;;  %4945 = vperm.xlu0 %6665, %v7332_v6  }
 0x45c   :  { %v7336_v3 = vpop.eup %7335  ;;  %v6005_v11 = vmul.f32 -1.442695, %v2249_v49  ;;  %4390 = vperm.xlu1 %6666, %v7334_v16  }
 0x45d   :  { %v6006_v58 = vmul.f32 -1.442695, %v2254_v27 }
 0x45f   :  { %7361 = vpow2.f32 %v6006_v58  ;;  %v460_v58 = vld [vmem:[%s11625_s2 + $0x668] sm:$0xff]  ;;  %4385 = vperm.xlu0 %6665, %v7336_v3  }
 0x460   :  { %7363 = vpow2.f32 %v6005_v11  ;;  %v348_v3 = vld [vmem:[%s11625_s2 + $0x2e8] sm:$0xff] }
 0x461   :  { %v3906_v52 = vld [vmem:[%s11626_s3 + $0x508] sm:$0xff] }
 0x462   :  { %5389 = vst.msk [vmem:[%s11627_s4 + $0x178] sm:$0xff] %vm5341_vm4, %v5160_v54  ;;  %v5274_v57 = vmul.f32 %v4781_v55, %v3906_v52  ;;  %v1694_v54 = vadd.f32 %v11711_v2, %v346_v34  ;;  %v10479_v52 = vpop.eup %7337  ;;  %v4216_v34 = vpop.permute.xlu0 %4215  ;;  %v5893_v55 = vmul.f32 -1.442695, %v1689_v22 }
 0x463   :  { %v10481_v9 = vpop.eup %7339  ;;  %4960 = vperm.xlu1 %6666, %v10479_v52   ;;  %v461_v52 = vld [vmem:[%s11625_s2 + $0x670] sm:$0xff] }
 0x464   :  { %v10486_v44 = vpop.eup %7341  ;;  %4955 = vperm.xlu0 %6665, %v10481_v9  }
 0x465   :  { %v7344_v26 = vpop.eup %7343 }
 0x466   :  { %v7346_v49 = vpop.eup %7345  ;;  %v4786_v51 = vpop.permute.xlu0 %4785 }
 0x467   :  { %v7348_v2 = vpop.eup %7347  ;;  %4400 = vperm.xlu1 %6666, %v10486_v44   ;;  %v463_v44 = vld [vmem:[%s11625_s2 + $0x680] sm:$0xff] }
 0x468   :  { %v7350_v36 = vpop.eup %7349  ;;  %v3259_v60 = vadd.f32 1.0, %v7348_v2 }
 0x469   :  { %v3905_v18 = vld [vmem:[%s11626_s3 + $0x500] sm:$0xff]  ;;  %v7352_v22 = vpop.eup %7351  ;;  %v3148_v6 = vadd.f32 1.0, %v7350_v36 }
 0x46a   :  { %5388 = vst.msk [vmem:[%s11627_s4 + $0x170] sm:$0xff] %vm5341_vm4, %v5159_v39  ;;  %v5273_v40 = vmul.f32 %v4776_v5, %v3905_v18  ;;  %v5894_v18 = vmul.f32 -1.442695, %v1694_v54  ;;  %v3260_v54 = vadd.f32 1.0, %v7346_v49  ;;  %v3147_v11 = vadd.f32 1.0, %v7352_v22  ;;  %v11713_v49 = vld [vmem:[#allocation12_spill] sm:$0xff] }
 0x46c   :  { %7365 = vpow2.f32 %v5894_v18  ;;  %v459_v18 = vld [vmem:[%s11625_s2 + $0x660] sm:$0xff] }
 0x46d   :  { %7367 = vpow2.f32 %v5893_v55 }
 0x471   :  { %v3794_v39 = vld [vmem:[%s11626_s3 + $0x188] sm:$0xff] }
 0x472   :  { %5503 = vst.msk [vmem:[%s11627_s4 + $0x508] sm:$0xff] %vm5341_vm4, %v5274_v57  ;;  %v5162_v59 = vmul.f32 %v4221_v17, %v3794_v39  ;;  %v3145_v57 = vadd.f32 1.0, %v7344_v26  ;;  %v7354_v17 = vpop.eup %7353 }
 0x474   :  { %7369 = vrcp.f32 %v3145_v57  ;;  %v2264_v57 = vadd.f32 %v11713_v49, %v460_v58 }
 0x475   :  { %7371 = vrcp.f32 %v3260_v54  ;;  %v11714_v54 = vld [vmem:[#allocation13_spill] sm:$0xff] }
 0x476   :  { %7373 = vrcp.f32 %v3259_v60 }
 0x477   :  { %7375 = vrcp.f32 %v3148_v6  ;;  %v462_v6 = vld [vmem:[%s11625_s2 + $0x678] sm:$0xff] }
 0x478   :  { %7377 = vrcp.f32 %v3147_v11 }
 0x479   :  { %v3793_v53 = vld [vmem:[%s11626_s3 + $0x180] sm:$0xff] }
 0x47a   :  { %5502 = vst.msk [vmem:[%s11627_s4 + $0x500] sm:$0xff] %vm5341_vm4, %v5273_v40  ;;  %v5161_v29 = vmul.f32 %v4216_v34, %v3793_v53  ;;  %v4231_v53 = vpop.permute.xlu1 %4230  ;;  %v4226_v34 = vpop.permute.xlu0 %4225 }
 0x47e   :  { %v4801_v2 = vpop.permute.xlu1 %4800  ;;  %v4796_v22 = vpop.permute.xlu0 %4795 }
 0x481   :  { %v3908_v27 = vld [vmem:[%s11626_s3 + $0x518] sm:$0xff] }
 0x482   :  { %5391 = vst.msk [vmem:[%s11627_s4 + $0x188] sm:$0xff] %vm5341_vm4, %v5162_v59  ;;  %v5276_v5 = vmul.f32 %v4791_v46, %v3908_v27  ;;  %v3262_v27 = vadd.f32 1.0, %v7354_v17 }
 0x484   :  { %7379 = vrcp.f32 %v3262_v27 }
 0x489   :  { %v3907_v31 = vld [vmem:[%s11626_s3 + $0x510] sm:$0xff] }
 0x48a   :  { %5390 = vst.msk [vmem:[%s11627_s4 + $0x180] sm:$0xff] %vm5341_vm4, %v5161_v29  ;;  %v5275_v40 = vmul.f32 %v4786_v51, %v3907_v31  ;;  %v7356_v29 = vpop.eup %7355 }
 0x48b   :  { %v7358_v26 = vpop.eup %7357  ;;  %v3261_v46 = vadd.f32 1.0, %v7356_v29  ;;  %v6008_v29 = vmul.f32 -1.442695, %v2264_v57 }
 0x48c   :  { %v3150_v51 = vadd.f32 1.0, %v7358_v26 }
 0x48d   :  { %7381 = vrcp.f32 %v3261_v46  ;;  %v4241_v46 = vpop.permute.xlu1 %4240 }
 0x48e   :  { %7383 = vrcp.f32 %v3150_v51  ;;  %v2269_v51 = vadd.f32 %v9786_v37, %v461_v52 }
 0x491   :  { %v3796_v39 = vld [vmem:[%s11626_s3 + $0x198] sm:$0xff] }
 0x492   :  { %5505 = vst.msk [vmem:[%s11627_s4 + $0x518] sm:$0xff] %vm5341_vm4, %v5276_v5  ;;  %v5164_v59 = vmul.f32 %v4231_v53, %v3796_v39  ;;  %v7360_v5 = vpop.eup %7359  ;;  %v347_v39 = vld [vmem:[%s11625_s2 + $0x2e0] sm:$0xff] }
 0x493   :  { %v7362_v36 = vpop.eup %7361  ;;  %v3149_v60 = vadd.f32 1.0, %v7360_v5  ;;  %v1699_v27 = vadd.f32 %v9762_v62, %v347_v39  ;;  %v349_v62 = vld [vmem:[%s11625_s2 + $0x2f0] sm:$0xff]  ;;  %v4236_v5 = vpop.permute.xlu0 %4235 }
 0x494   :  { %v7364_v53 = vpop.eup %7363  ;;  %v3264_v58 = vadd.f32 1.0, %v7362_v36 }
 0x495   :  { %7385 = vrcp.f32 %v3149_v60  ;;  %v5895_v60 = vmul.f32 -1.442695, %v1699_v27 }
 0x496   :  { %7387 = vrcp.f32 %v3264_v58 }
 0x497   :  { %v4806_v52 = vpop.permute.xlu0 %4805 }
 0x499   :  { %v3795_v63 = vld [vmem:[%s11626_s3 + $0x190] sm:$0xff] }
 0x49a   :  { %5504 = vst.msk [vmem:[%s11627_s4 + $0x510] sm:$0xff] %vm5341_vm4, %v5275_v40  ;;  %v5163_v55 = vmul.f32 %v4226_v34, %v3795_v63  ;;  %v2259_v40 = vadd.f32 %v11714_v54, %v459_v18  ;;  %v7366_v34 = vpop.eup %7365  ;;  %v3263_v18 = vadd.f32 1.0, %v7364_v53  ;;  %v4811_v53 = vpop.permute.xlu1 %4810 }
 0x49c   :  { %v6007_v26 = vmul.f32 -1.442695, %v2259_v40  ;;  %7389 = vrcp.f32 %v3263_v18  ;;  %v2279_v18 = vadd.f32 %v9831_v30, %v463_v44 }
 0x4a1   :  { %v3910_v31 = vld [vmem:[%s11626_s3 + $0x528] sm:$0xff] }
 0x4a2   :  { %5393 = vst.msk [vmem:[%s11627_s4 + $0x198] sm:$0xff] %vm5341_vm4, %v5164_v59  ;;  %v5278_v63 = vmul.f32 %v4801_v2, %v3910_v31  ;;  %v1704_v59 = vadd.f32 %v9756_v0, %v348_v3  ;;  %v350_v0 = vld [vmem:[%s11625_s2 + $0x2f8] sm:$0xff]  ;;  %v3152_v31 = vadd.f32 1.0, %v7366_v34  ;;  %v464_v2 = vld [vmem:[%s11625_s2 + $0x688] sm:$0xff]  ;;  %v6009_v34 = vmul.f32 -1.442695, %v2269_v51  ;;  %v4246_v51 = vpop.permute.xlu0 %4245 }
 0x4a3   :  { %v1714_v36 = vadd.f32 %v9801_v35, %v350_v0  ;;  %v352_v35 = vld [vmem:[%s11625_s2 + $0x308] sm:$0xff] }
 0x4a4   :  { %7391 = vrcp.f32 %v3152_v31  ;;  %v5896_v40 = vmul.f32 -1.442695, %v1704_v59 }
 0x4a5   :  { %v5898_v0 = vmul.f32 -1.442695, %v1714_v36 }
 0x4a9   :  { %v3909_v16 = vld [vmem:[%s11626_s3 + $0x520] sm:$0xff] }
 0x4aa   :  { %5392 = vst.msk [vmem:[%s11627_s4 + $0x190] sm:$0xff] %vm5341_vm4, %v5163_v55  ;;  %v5277_v17 = vmul.f32 %v4796_v22, %v3909_v16  ;;  %v7368_v55 = vpop.eup %7367  ;;  %v2274_v16 = vadd.f32 %v9779_v25, %v462_v6  ;;  %v1709_v22 = vadd.f32 %v9806_v41, %v349_v62 }
 0x4ab   :  { %v7370_v49 = vpop.eup %7369  ;;  %v3151_v57 = vadd.f32 1.0, %v7368_v55  ;;  %v1724_v55 = vadd.f32 %v9856_v43, %v352_v35  ;;  %v4251_v43 = vpop.permute.xlu1 %4250 }
 0x4ac   :  { %v7372_v54 = vpop.eup %7371  ;;  %4395 = vperm.xlu0 %6665, %v7370_v49   ;;  %v6010_v58 = vmul.f32 -1.442695, %v2274_v16 }
 0x4ad   :  { %v7374_v37 = vpop.eup %7373  ;;  %7393 = vrcp.f32 %v3151_v57  ;;  %4970 = vperm.xlu1 %6666, %v7372_v54  }
 0x4ae   :  { %v7376_v6 = vpop.eup %7375  ;;  %7395 = vpow2.f32 %v6008_v29  ;;  %v466_v29 = vld [vmem:[%s11625_s2 + $0x698] sm:$0xff] }
 0x4af   :  { %v7378_v41 = vpop.eup %7377  ;;  %7397 = vpow2.f32 %v6007_v26  ;;  %v5897_v26 = vmul.f32 -1.442695, %v1709_v22  ;;  %v2294_v57 = vadd.f32 %v9892_v4, %v466_v29 }
 0x4b0   :  { %7399 = vpow2.f32 %v5896_v40  ;;  %4965 = vperm.xlu0 %6665, %v7374_v37  }
 0x4b1   :  { %v3798_v11 = vld [vmem:[%s11626_s3 + $0x1a8] sm:$0xff]  ;;  %7401 = vpow2.f32 %v5895_v60  ;;  %4410 = vperm.xlu1 %6666, %v7376_v6   ;;  %v4821_v60 = vpop.permute.xlu1 %4820  ;;  %v4816_v6 = vpop.permute.xlu0 %4815 }
 0x4b2   :  { %5507 = vst.msk [vmem:[%s11627_s4 + $0x528] sm:$0xff] %vm5341_vm4, %v5278_v63  ;;  %v5166_v3 = vmul.f32 %v4241_v46, %v3798_v11  ;;  %v351_v11 = vld [vmem:[%s11625_s2 + $0x300] sm:$0xff]  ;;  %7403 = vpow2.f32 %v6010_v58 }
 0x4b3   :  { %v11715_v46 = vld [vmem:[#allocation14_spill] sm:$0xff]  ;;  %7405 = vpow2.f32 %v6009_v34 }
 0x4b4   :  { %v1719_v16 = vadd.f32 %v11715_v46, %v351_v11  ;;  %4405 = vperm.xlu0 %6665, %v7378_v41   ;;  %7407 = vpow2.f32 %v5898_v0  ;;  %v465_v0 = vld [vmem:[%s11625_s2 + $0x690] sm:$0xff] }
 0x4b5   :  { %7409 = vpow2.f32 %v5897_v26 }
 0x4b6   :  { %v5899_v44 = vmul.f32 -1.442695, %v1719_v16 }
 0x4b9   :  { %v3797_v9 = vld [vmem:[%s11626_s3 + $0x1a0] sm:$0xff] }
 0x4ba   :  { %5506 = vst.msk [vmem:[%s11627_s4 + $0x520] sm:$0xff] %vm5341_vm4, %v5277_v17  ;;  %v5165_v25 = vmul.f32 %v4236_v5, %v3797_v9  ;;  %v2284_v17 = vadd.f32 %v9825_v1, %v464_v2  ;;  %v7380_v9 = vpop.eup %7379  ;;  %v6011_v2 = vmul.f32 -1.442695, %v2279_v18  ;;  %v4261_v18 = vpop.permute.xlu1 %4260 }
 0x4bb   :  { %v7382_v31 = vpop.eup %7381  ;;  %4980 = vperm.xlu1 %6666, %v7380_v9  }
 0x4bc   :  { %v7384_v62 = vpop.eup %7383  ;;  %v6012_v49 = vmul.f32 -1.442695, %v2284_v17  ;;  %4975 = vperm.xlu0 %6665, %v7382_v31  }
 0x4be   :  { %7411 = vpow2.f32 %v6012_v49 }
 0x4bf   :  { %7413 = vpow2.f32 %v6011_v2  ;;  %4420 = vperm.xlu1 %6666, %v7384_v62  }
 0x4c1   :  { %v3912_v39 = vld [vmem:[%s11626_s3 + $0x538] sm:$0xff] }
 0x4c2   :  { %5395 = vst.msk [vmem:[%s11627_s4 + $0x1a8] sm:$0xff] %vm5341_vm4, %v5166_v3  ;;  %v5280_v59 = vmul.f32 %v4811_v53, %v3912_v39  ;;  %v7386_v3 = vpop.eup %7385  ;;  %v5900_v39 = vmul.f32 -1.442695, %v1724_v55 }
 0x4c3   :  { %v10624_v54 = vpop.eup %7387  ;;  %4415 = vperm.xlu0 %6665, %v7386_v3   ;;  %v2289_v3 = vadd.f32 %v9901_v20, %v465_v0 }
 0x4c4   :  { %v10629_v36 = vpop.eup %7389  ;;  %7415 = vpow2.f32 %v5900_v39  ;;  %4990 = vperm.xlu1 %6666, %v10624_v54   ;;  %v353_v39 = vld [vmem:[%s11625_s2 + $0x310] sm:$0xff] }
 0x4c5   :  { %v10638_v37 = vpop.eup %7391  ;;  %7417 = vpow2.f32 %v5899_v44 }
 0x4c6   :  { %v10644_v22 = vpop.eup %7393 }
 0x4c7   :  { %v7396_v53 = vpop.eup %7395  ;;  %4985 = vperm.xlu0 %6665, %v10629_v36  }
 0x4c8   :  { %v7398_v11 = vpop.eup %7397  ;;  %v3266_v41 = vadd.f32 1.0, %v7396_v53  ;;  %v467_v53 = vld [vmem:[%s11625_s2 + $0x6a0] sm:$0xff]  ;;  %4430 = vperm.xlu1 %6666, %v10638_v37  }
 0x4c9   :  { %v3911_v63 = vld [vmem:[%s11626_s3 + $0x530] sm:$0xff]  ;;  %v3265_v34 = vadd.f32 1.0, %v7398_v11  ;;  %v6013_v11 = vmul.f32 -1.442695, %v2289_v3 }
 0x4ca   :  { %5394 = vst.msk [vmem:[%s11627_s4 + $0x1a0] sm:$0xff] %vm5341_vm4, %v5165_v25  ;;  %v5279_v27 = vmul.f32 %v4806_v52, %v3911_v63  ;;  %v6014_v63 = vmul.f32 -1.442695, %v2294_v57  ;;  %v7400_v52 = vpop.eup %7399  ;;  %v4831_v57 = vpop.permute.xlu1 %4830 }
 0x4cb   :  { %v7402_v29 = vpop.eup %7401  ;;  %v3154_v9 = vadd.f32 1.0, %v7400_v52  ;;  %4425 = vperm.xlu0 %6665, %v10644_v22  }
 0x4cc   :  { %7419 = vpow2.f32 %v6014_v63  ;;  %v7404_v55 = vpop.eup %7403  ;;  %v3153_v31 = vadd.f32 1.0, %v7402_v29  ;;  %v468_v63 = vld [vmem:[%s11625_s2 + $0x6a8] sm:$0xff] }
 0x4cd   :  { %7421 = vrcp.f32 %v3266_v41  ;;  %v7406_v46 = vpop.eup %7405  ;;  %v3268_v16 = vadd.f32 1.0, %v7404_v55 }
 0x4ce   :  { %7423 = vrcp.f32 %v3265_v34  ;;  %v3267_v49 = vadd.f32 1.0, %v7406_v46  ;;  %v4271_v41 = vpop.permute.xlu1 %4270 }
 0x4cf   :  { %7425 = vrcp.f32 %v3154_v9  ;;  %v2304_v9 = vadd.f32 %v9947_v24, %v468_v63  ;;  %v470_v24 = vld [vmem:[%s11625_s2 + $0x6b8] sm:$0xff] }
 0x4d0   :  { %7427 = vrcp.f32 %v3153_v31  ;;  %v2299_v31 = vadd.f32 %v9954_v8, %v467_v53  ;;  %v469_v8 = vld [vmem:[%s11625_s2 + $0x6b0] sm:$0xff] }
 0x4d1   :  { %v3800_v1 = vld [vmem:[%s11626_s3 + $0x1b8] sm:$0xff]  ;;  %7429 = vrcp.f32 %v3268_v16 }
 0x4d2   :  { %5509 = vst.msk [vmem:[%s11627_s4 + $0x538] sm:$0xff] %vm5341_vm4, %v5280_v59  ;;  %v5168_v5 = vmul.f32 %v4251_v43, %v3800_v1  ;;  %v4256_v1 = vpop.permute.xlu0 %4255  ;;  %v7408_v43 = vpop.eup %7407  ;;  %7431 = vrcp.f32 %v3267_v49 }
 0x4d3   :  { %v3156_v2 = vadd.f32 1.0, %v7408_v43  ;;  %v4841_v43 = vpop.permute.xlu1 %4840 }
 0x4d5   :  { %7433 = vrcp.f32 %v3156_v2  ;;  %v2314_v2 = vadd.f32 %v9994_v61, %v470_v24 }
 0x4d9   :  { %v3799_v30 = vld [vmem:[%s11626_s3 + $0x1b0] sm:$0xff] }
 0x4da   :  { %5508 = vst.msk [vmem:[%s11627_s4 + $0x530] sm:$0xff] %vm5341_vm4, %v5279_v27  ;;  %v5167_v25 = vmul.f32 %v4246_v51, %v3799_v30  ;;  %v7410_v51 = vpop.eup %7409 }
 0x4db   :  { %v3155_v44 = vadd.f32 1.0, %v7410_v51  ;;  %v6016_v51 = vmul.f32 -1.442695, %v2304_v9 }
 0x4dd   :  { %7435 = vrcp.f32 %v3155_v44  ;;  %v11716_v44 = vld [vmem:[#allocation15_spill] sm:$0xff] }
 0x4e1   :  { %v3914_v40 = vld [vmem:[%s11626_s3 + $0x548] sm:$0xff] }
 0x4e2   :  { %5397 = vst.msk [vmem:[%s11627_s4 + $0x1b8] sm:$0xff] %vm5341_vm4, %v5168_v5  ;;  %v5282_v35 = vmul.f32 %v4821_v60, %v3914_v40  ;;  %v354_v5 = vld [vmem:[%s11625_s2 + $0x318] sm:$0xff]  ;;  %v4826_v40 = vpop.permute.xlu0 %4825 }
 0x4e6   :  { %v4266_v29 = vpop.permute.xlu0 %4265 }
 0x4e9   :  { %v3913_v4 = vld [vmem:[%s11626_s3 + $0x540] sm:$0xff] }
 0x4ea   :  { %5396 = vst.msk [vmem:[%s11627_s4 + $0x1b0] sm:$0xff] %vm5341_vm4, %v5167_v25  ;;  %v5281_v58 = vmul.f32 %v4816_v6, %v3913_v4  ;;  %v7412_v4 = vpop.eup %7411  ;;  %v1734_v6 = vadd.f32 %v9926_v19, %v354_v5  ;;  %v356_v19 = vld [vmem:[%s11625_s2 + $0x328] sm:$0xff]  ;;  %v4836_v5 = vpop.permute.xlu0 %4835 }
 0x4eb   :  { %v3270_v54 = vadd.f32 1.0, %v7412_v4  ;;  %v1744_v46 = vadd.f32 %v9973_v42, %v356_v19 }
 0x4ed   :  { %7437 = vrcp.f32 %v3270_v54  ;;  %v11717_v54 = vld [vmem:[#allocation16_spill] sm:$0xff] }
 0x4f1   :  { %v3802_v17 = vld [vmem:[%s11626_s3 + $0x1c8] sm:$0xff] }
 0x4f2   :  { %5511 = vst.msk [vmem:[%s11627_s4 + $0x548] sm:$0xff] %vm5341_vm4, %v5282_v35  ;;  %v5170_v27 = vmul.f32 %v4261_v18, %v3802_v17  ;;  %v7414_v35 = vpop.eup %7413 }
 0x4f3   :  { %v3269_v17 = vadd.f32 1.0, %v7414_v35  ;;  %v5904_v35 = vmul.f32 -1.442695, %v1744_v46 }
 0x4f5   :  { %7439 = vrcp.f32 %v3269_v17 }
 0x4f9   :  { %v3801_v59 = vld [vmem:[%s11626_s3 + $0x1c0] sm:$0xff] }
 0x4fa   :  { %5510 = vst.msk [vmem:[%s11627_s4 + $0x540] sm:$0xff] %vm5341_vm4, %v5281_v58  ;;  %v5169_v30 = vmul.f32 %v4256_v1, %v3801_v59  ;;  %v7416_v58 = vpop.eup %7415  ;;  %v1729_v59 = vadd.f32 %v9932_v21, %v353_v39 }
 0x4fb   :  { %v7418_v52 = vpop.eup %7417  ;;  %v3158_v34 = vadd.f32 1.0, %v7416_v58  ;;  %v4281_v58 = vpop.permute.xlu1 %4280 }
 0x4fc   :  { %v7420_v1 = vpop.eup %7419  ;;  %v3157_v21 = vadd.f32 1.0, %v7418_v52  ;;  %v4276_v52 = vpop.permute.xlu0 %4275 }
 0x4fd   :  { %v7422_v37 = vpop.eup %7421  ;;  %7441 = vrcp.f32 %v3158_v34  ;;  %v6018_v34 = vmul.f32 -1.442695, %v2314_v2 }
 0x4fe   :  { %v7424_v16 = vpop.eup %7423  ;;  %7443 = vrcp.f32 %v3157_v21  ;;  %5000 = vperm.xlu1 %6666, %v7422_v37  }
 0x4ff   :  { %v7426_v42 = vpop.eup %7425  ;;  %4995 = vperm.xlu0 %6665, %v7424_v16  }
 0x500   :  { %v4846_v16 = vpop.permute.xlu0 %4845 }
 0x501   :  { %v3916_v26 = vld [vmem:[%s11626_s3 + $0x558] sm:$0xff] }
 0x502   :  { %5399 = vst.msk [vmem:[%s11627_s4 + $0x1c8] sm:$0xff] %vm5341_vm4, %v5170_v27  ;;  %v5284_v25 = vmul.f32 %v4831_v57, %v3916_v26  ;;  %v355_v27 = vld [vmem:[%s11625_s2 + $0x320] sm:$0xff]  ;;  %v5902_v26 = vmul.f32 -1.442695, %v1734_v6  ;;  %v358_v57 = vld [vmem:[%s11625_s2 + $0x338] sm:$0xff]  ;;  %4440 = vperm.xlu1 %6666, %v7426_v42  }
 0x503   :  { %v1739_v49 = vadd.f32 %v9978_v13, %v355_v27  ;;  %v6015_v13 = vmul.f32 -1.442695, %v2299_v31  ;;  %v471_v6 = vld [vmem:[%s11625_s2 + $0x6c0] sm:$0xff] }
 0x505   :  { %v5903_v17 = vmul.f32 -1.442695, %v1739_v49 }
 0x509   :  { %v3915_v62 = vld [vmem:[%s11626_s3 + $0x550] sm:$0xff] }
 0x50a   :  { %5398 = vst.msk [vmem:[%s11627_s4 + $0x1c0] sm:$0xff] %vm5341_vm4, %v5169_v30  ;;  %v5283_v60 = vmul.f32 %v4826_v40, %v3915_v62  ;;  %v3272_v30 = vadd.f32 1.0, %v7420_v1  ;;  %v5901_v62 = vmul.f32 -1.442695, %v1729_v59  ;;  %v7428_v40 = vpop.eup %7427 }
 0x50b   :  { %v7430_v61 = vpop.eup %7429  ;;  %4435 = vperm.xlu0 %6665, %v7428_v40  }
 0x50c   :  { %7445 = vrcp.f32 %v3272_v30  ;;  %v7432_v53 = vpop.eup %7431  ;;  %5010 = vperm.xlu1 %6666, %v7430_v61  }
 0x50d   :  { %7447 = vpow2.f32 %v6013_v11  ;;  %v11718_v11 = vld [vmem:[#allocation17_spill] sm:$0xff]  ;;  %v7434_v59 = vpop.eup %7433 }
 0x50e   :  { %7449 = vpow2.f32 %v5902_v26  ;;  %v7436_v9 = vpop.eup %7435  ;;  %v4851_v26 = vpop.permute.xlu1 %4850 }
 0x50f   :  { %7451 = vpow2.f32 %v5901_v62  ;;  %v7438_v31 = vpop.eup %7437  ;;  %5005 = vperm.xlu0 %6665, %v7432_v53   ;;  %v360_v53 = vld [vmem:[%s11625_s2 + $0x348] sm:$0xff] }
 0x510   :  { %7453 = vpow2.f32 %v6016_v51  ;;  %v7440_v30 = vpop.eup %7439  ;;  %4450 = vperm.xlu1 %6666, %v7434_v59   ;;  %v359_v59 = vld [vmem:[%s11625_s2 + $0x340] sm:$0xff] }
 0x511   :  { %v3804_v20 = vld [vmem:[%s11626_s3 + $0x1d8] sm:$0xff]  ;;  %7455 = vpow2.f32 %v6015_v13  ;;  %v10786_v46 = vpop.eup %7441  ;;  %v4286_v13 = vpop.permute.xlu0 %4285 }
 0x512   :  { %5513 = vst.msk [vmem:[%s11627_s4 + $0x558] sm:$0xff] %vm5341_vm4, %v5284_v25  ;;  %v5172_v18 = vmul.f32 %v4271_v41, %v3804_v20  ;;  %v357_v25 = vld [vmem:[%s11625_s2 + $0x330] sm:$0xff]  ;;  %v472_v20 = vld [vmem:[%s11625_s2 + $0x6c8] sm:$0xff]  ;;  %7457 = vpow2.f32 %v5904_v35  ;;  %v4291_v2 = vpop.permute.xlu1 %4290 }
 0x513   :  { %v1749_v41 = vadd.f32 %v11718_v11, %v357_v25  ;;  %7459 = vpow2.f32 %v5903_v17  ;;  %4445 = vperm.xlu0 %6665, %v7436_v9  }
 0x514   :  { %7461 = vpow2.f32 %v6018_v34  ;;  %5020 = vperm.xlu1 %6666, %v7438_v31  }
 0x517   :  { %5015 = vperm.xlu0 %6665, %v7440_v30  }
 0x518   :  { %4460 = vperm.xlu1 %6666, %v10786_v46   ;;  %v361_v46 = vld [vmem:[%s11625_s2 + $0x350] sm:$0xff] }
 0x519   :  { %v3803_v36 = vld [vmem:[%s11626_s3 + $0x1d0] sm:$0xff] }
 0x51a   :  { %5512 = vst.msk [vmem:[%s11627_s4 + $0x550] sm:$0xff] %vm5341_vm4, %v5283_v60  ;;  %v5171_v0 = vmul.f32 %v4266_v29, %v3803_v36  ;;  %v2309_v60 = vadd.f32 %v11716_v44, %v469_v8  ;;  %v1754_v36 = vadd.f32 %v11717_v54, %v358_v57 }
 0x51c   :  { %v6017_v21 = vmul.f32 -1.442695, %v2309_v60  ;;  %v5906_v37 = vmul.f32 -1.442695, %v1754_v36 }
 0x51e   :  { %7463 = vpow2.f32 %v6017_v21 }
 0x51f   :  { %7465 = vpow2.f32 %v5906_v37  ;;  %v11722_v37 = vld [vmem:[#allocation21_spill] sm:$0xff] }
 0x520   :  { %v1759_v30 = vadd.f32 %v11722_v37, %v359_v59 }
 0x521   :  { %v3918_v55 = vld [vmem:[%s11626_s3 + $0x568] sm:$0xff] }
 0x522   :  { %5401 = vst.msk [vmem:[%s11627_s4 + $0x1d8] sm:$0xff] %vm5341_vm4, %v5172_v18  ;;  %v5286_v3 = vmul.f32 %v4841_v43, %v3918_v55  ;;  %v11719_v18 = vld [vmem:[#allocation18_spill] sm:$0xff]  ;;  %v10788_v43 = vpop.eup %7443 }
 0x523   :  { %v2324_v29 = vadd.f32 %v11719_v18, %v472_v20  ;;  %4455 = vperm.xlu0 %6665, %v10788_v43  }
 0x525   :  { %v6020_v62 = vmul.f32 -1.442695, %v2324_v29 }
 0x529   :  { %v3917_v22 = vld [vmem:[%s11626_s3 + $0x560] sm:$0xff] }
 0x52a   :  { %5400 = vst.msk [vmem:[%s11627_s4 + $0x1d0] sm:$0xff] %vm5341_vm4, %v5171_v0  ;;  %v5285_v39 = vmul.f32 %v4836_v5, %v3917_v22  ;;  %v11720_v0 = vld [vmem:[#allocation19_spill] sm:$0xff]  ;;  %v5905_v22 = vmul.f32 -1.442695, %v1749_v41  ;;  %v4856_v41 = vpop.permute.xlu0 %4855 }
 0x52b   :  { %v2319_v55 = vadd.f32 %v11720_v0, %v471_v6  ;;  %v4861_v6 = vpop.permute.xlu1 %4860  ;;  %v474_v0 = vld [vmem:[%s11625_s2 + $0x6d8] sm:$0xff] }
 0x52c   :  { %7467 = vpow2.f32 %v5905_v22 }
 0x52d   :  { %v6019_v42 = vmul.f32 -1.442695, %v2319_v55  ;;  %7469 = vpow2.f32 %v6020_v62 }
 0x52e   :  { %v4296_v62 = vpop.permute.xlu0 %4295 }
 0x52f   :  { %7471 = vpow2.f32 %v6019_v42 }
 0x531   :  { %v3806_v4 = vld [vmem:[%s11626_s3 + $0x1e8] sm:$0xff] }
 0x532   :  { %5515 = vst.msk [vmem:[%s11627_s4 + $0x568] sm:$0xff] %vm5341_vm4, %v5286_v3  ;;  %v5174_v19 = vmul.f32 %v4281_v58, %v3806_v4  ;;  %v10793_v3 = vpop.eup %7445 }
 0x533   :  { %v7448_v51 = vpop.eup %7447  ;;  %5030 = vperm.xlu1 %6666, %v10793_v3   ;;  %v363_v3 = vld [vmem:[%s11625_s2 + $0x360] sm:$0xff] }
 0x534   :  { %v7450_v25 = vpop.eup %7449  ;;  %v3271_v40 = vadd.f32 1.0, %v7448_v51 }
 0x535   :  { %v7452_v4 = vpop.eup %7451  ;;  %v3160_v44 = vadd.f32 1.0, %v7450_v25 }
 0x536   :  { %v7454_v61 = vpop.eup %7453  ;;  %7473 = vrcp.f32 %v3271_v40 }
 0x537   :  { %v7456_v54 = vpop.eup %7455  ;;  %7475 = vrcp.f32 %v3160_v44  ;;  %v3274_v36 = vadd.f32 1.0, %v7454_v61 }
 0x538   :  { %v7458_v58 = vpop.eup %7457  ;;  %v3273_v17 = vadd.f32 1.0, %v7456_v54 }
 0x539   :  { %v3805_v63 = vld [vmem:[%s11626_s3 + $0x1e0] sm:$0xff] }
 0x53a   :  { %5514 = vst.msk [vmem:[%s11627_s4 + $0x560] sm:$0xff] %vm5341_vm4, %v5285_v39  ;;  %v5173_v27 = vmul.f32 %v4276_v52, %v3805_v63  ;;  %v3159_v63 = vadd.f32 1.0, %v7452_v4  ;;  %v3162_v52 = vadd.f32 1.0, %v7458_v58 }
 0x53c   :  { %7477 = vrcp.f32 %v3159_v63 }
 0x53d   :  { %7479 = vrcp.f32 %v3274_v36  ;;  %v4866_v36 = vpop.permute.xlu0 %4865 }
 0x53e   :  { %7481 = vrcp.f32 %v3273_v17 }
 0x53f   :  { %7483 = vrcp.f32 %v3162_v52 }
 0x541   :  { %v3920_v1 = vld [vmem:[%s11626_s3 + $0x578] sm:$0xff] }
 0x542   :  { %5403 = vst.msk [vmem:[%s11627_s4 + $0x1e8] sm:$0xff] %vm5341_vm4, %v5174_v19  ;;  %v5288_v8 = vmul.f32 %v4851_v26, %v3920_v1  ;;  %v7460_v19 = vpop.eup %7459  ;;  %v11721_v1 = vld [vmem:[#allocation20_spill] sm:$0xff] }
 0x543   :  { %v7462_v29 = vpop.eup %7461  ;;  %v3161_v9 = vadd.f32 1.0, %v7460_v19  ;;  %v1764_v21 = vadd.f32 %v11721_v1, %v360_v53  ;;  %v473_v26 = vld [vmem:[%s11625_s2 + $0x6d0] sm:$0xff]  ;;  %v364_v53 = vld [vmem:[%s11625_s2 + $0x368] sm:$0xff] }
 0x544   :  { %v7464_v55 = vpop.eup %7463  ;;  %v3276_v31 = vadd.f32 1.0, %v7462_v29 }
 0x545   :  { %v7466_v22 = vpop.eup %7465  ;;  %7485 = vrcp.f32 %v3161_v9  ;;  %v1784_v9 = vadd.f32 %v10187_v10, %v364_v53 }
 0x546   :  { %7487 = vrcp.f32 %v3276_v31  ;;  %v3164_v42 = vadd.f32 1.0, %v7466_v22 }
 0x549   :  { %v3919_v24 = vld [vmem:[%s11626_s3 + $0x570] sm:$0xff] }
 0x54a   :  { %5402 = vst.msk [vmem:[%s11627_s4 + $0x1e0] sm:$0xff] %vm5341_vm4, %v5173_v27  ;;  %v5287_v49 = vmul.f32 %v4846_v16, %v3919_v24  ;;  %v4301_v24 = vpop.permute.xlu1 %4300 }
 0x551   :  { %v3808_v57 = vld [vmem:[%s11626_s3 + $0x1f8] sm:$0xff] }
 0x552   :  { %5517 = vst.msk [vmem:[%s11627_s4 + $0x578] sm:$0xff] %vm5341_vm4, %v5288_v8  ;;  %v5176_v39 = vmul.f32 %v4291_v2, %v3808_v57  ;;  %v3275_v8 = vadd.f32 1.0, %v7464_v55  ;;  %v7468_v57 = vpop.eup %7467  ;;  %v2334_v2 = vadd.f32 %v10118_v33, %v474_v0  ;;  %v476_v33 = vld [vmem:[%s11625_s2 + $0x6e8] sm:$0xff]  ;;  %v1779_v0 = vadd.f32 %v10193_v48, %v363_v3 }
 0x553   :  { %v7470_v25 = vpop.eup %7469  ;;  %v3163_v40 = vadd.f32 1.0, %v7468_v57 }
 0x554   :  { %7489 = vrcp.f32 %v3275_v8  ;;  %v7472_v4 = vpop.eup %7471  ;;  %v3278_v44 = vadd.f32 1.0, %v7470_v25  ;;  %v6022_v17 = vmul.f32 -1.442695, %v2334_v2 }
 0x555   :  { %7491 = vrcp.f32 %v3164_v42  ;;  %v7474_v63 = vpop.eup %7473 }
 0x556   :  { %7493 = vrcp.f32 %v3163_v40  ;;  %v7476_v58 = vpop.eup %7475  ;;  %5025 = vperm.xlu0 %6665, %v7474_v63  }
 0x557   :  { %7495 = vrcp.f32 %v3278_v44  ;;  %4470 = vperm.xlu1 %6666, %v7476_v58  }
 0x559   :  { %v3807_v5 = vld [vmem:[%s11626_s3 + $0x1f0] sm:$0xff] }
 0x55a   :  { %5516 = vst.msk [vmem:[%s11627_s4 + $0x570] sm:$0xff] %vm5341_vm4, %v5287_v49  ;;  %v5175_v60 = vmul.f32 %v4286_v13, %v3807_v5  ;;  %v362_v49 = vld [vmem:[%s11625_s2 + $0x358] sm:$0xff]  ;;  %v2329_v13 = vadd.f32 %v10124_v45, %v473_v26  ;;  %v475_v45 = vld [vmem:[%s11625_s2 + $0x6e0] sm:$0xff] }
 0x55b   :  { %v1774_v61 = vadd.f32 %v10141_v56, %v362_v49  ;;  %v2339_v52 = vadd.f32 %v10168_v28, %v475_v45  ;;  %v477_v49 = vld [vmem:[%s11625_s2 + $0x6f0] sm:$0xff] }
 0x55c   :  { %v6021_v59 = vmul.f32 -1.442695, %v2329_v13  ;;  %v11724_v13 = vld [vmem:[#allocation23_spill] sm:$0xff] }
 0x55d   :  { %v5910_v29 = vmul.f32 -1.442695, %v1774_v61  ;;  %v6023_v22 = vmul.f32 -1.442695, %v2339_v52 }
 0x561   :  { %v3922_v20 = vld [vmem:[%s11626_s3 + $0x588] sm:$0xff] }
 0x562   :  { %5405 = vst.msk [vmem:[%s11627_s4 + $0x1f8] sm:$0xff] %vm5341_vm4, %v5176_v39  ;;  %v5290_v11 = vmul.f32 %v4861_v6, %v3922_v20  ;;  %v5908_v39 = vmul.f32 -1.442695, %v1764_v21  ;;  %v4871_v20 = vpop.permute.xlu1 %4870  ;;  %v1769_v6 = vadd.f32 %v10148_v47, %v361_v46  ;;  %v7478_v47 = vpop.eup %7477 }
 0x563   :  { %v4306_v21 = vpop.permute.xlu0 %4305  ;;  %4465 = vperm.xlu0 %6665, %v7478_v47  }
 0x564   :  { %v5909_v28 = vmul.f32 -1.442695, %v1769_v6 }
 0x569   :  { %v3921_v35 = vld [vmem:[%s11626_s3 + $0x580] sm:$0xff] }
 0x56a   :  { %5404 = vst.msk [vmem:[%s11627_s4 + $0x1f0] sm:$0xff] %vm5341_vm4, %v5175_v60  ;;  %v5289_v34 = vmul.f32 %v4856_v41, %v3921_v35  ;;  %v5907_v60 = vmul.f32 -1.442695, %v1759_v30  ;;  %v3277_v35 = vadd.f32 1.0, %v7472_v4  ;;  %v2344_v41 = vadd.f32 %v10163_v7, %v476_v33  ;;  %v478_v7 = vld [vmem:[%s11625_s2 + $0x6f8] sm:$0xff]  ;;  %v11723_v30 = vld [vmem:[#allocation22_spill] sm:$0xff] }
 0x56b   :  { %v2354_v26 = vadd.f32 %v11723_v30, %v478_v7  ;;  %v2349_v33 = vadd.f32 %v11724_v13, %v477_v49  ;;  %v366_v4 = vld [vmem:[%s11625_s2 + $0x378] sm:$0xff] }
 0x56c   :  { %7497 = vrcp.f32 %v3277_v35  ;;  %v6024_v37 = vmul.f32 -1.442695, %v2344_v41 }
 0x56d   :  { %7499 = vpow2.f32 %v5908_v39  ;;  %v6026_v40 = vmul.f32 -1.442695, %v2354_v26  ;;  %v479_v26 = vld [vmem:[%s11625_s2 + $0x700] sm:$0xff] }
 0x56e   :  { %7501 = vpow2.f32 %v5907_v60 }
 0x56f   :  { %7503 = vpow2.f32 %v6022_v17 }
 0x570   :  { %7505 = vpow2.f32 %v6021_v59 }
 0x571   :  { %v3810_v18 = vld [vmem:[%s11626_s3 + $0x208] sm:$0xff]  ;;  %7507 = vpow2.f32 %v5910_v29 }
 0x572   :  { %5519 = vst.msk [vmem:[%s11627_s4 + $0x588] sm:$0xff] %vm5341_vm4, %v5290_v11  ;;  %v5178_v16 = vmul.f32 %v4301_v24, %v3810_v18  ;;  %v4311_v18 = vpop.permute.xlu1 %4310  ;;  %7509 = vpow2.f32 %v5909_v28 }
 0x579   :  { %v3809_v27 = vld [vmem:[%s11626_s3 + $0x200] sm:$0xff] }
 0x57a   :  { %5518 = vst.msk [vmem:[%s11627_s4 + $0x580] sm:$0xff] %vm5341_vm4, %v5289_v34  ;;  %v5177_v5 = vmul.f32 %v4296_v62, %v3809_v27  ;;  %v7480_v34 = vpop.eup %7479  ;;  %v5912_v62 = vmul.f32 -1.442695, %v1784_v9  ;;  %7511 = vpow2.f32 %v6024_v37 }
 0x57b   :  { %v7482_v27 = vpop.eup %7481  ;;  %5040 = vperm.xlu1 %6666, %v7480_v34   ;;  %7513 = vpow2.f32 %v6023_v22 }
 0x57c   :  { %v7484_v55 = vpop.eup %7483  ;;  %5035 = vperm.xlu0 %6665, %v7482_v27   ;;  %7515 = vpow2.f32 %v5912_v62  ;;  %v368_v62 = vld [vmem:[%s11625_s2 + $0x388] sm:$0xff] }
 0x57d   :  { %v7486_v10 = vpop.eup %7485 }
 0x57e   :  { %v7488_v8 = vpop.eup %7487 }
 0x57f   :  { %v7490_v57 = vpop.eup %7489  ;;  %4480 = vperm.xlu1 %6666, %v7484_v55   ;;  %v480_v55 = vld [vmem:[%s11625_s2 + $0x708] sm:$0xff] }
 0x580   :  { %v10926_v2 = vpop.eup %7491  ;;  %4475 = vperm.xlu0 %6665, %v7486_v10  }
 0x581   :  { %v3924_v51 = vld [vmem:[%s11626_s3 + $0x598] sm:$0xff]  ;;  %v10931_v39 = vpop.eup %7493 }
 0x582   :  { %5407 = vst.msk [vmem:[%s11627_s4 + $0x208] sm:$0xff] %vm5341_vm4, %v5178_v16  ;;  %v5292_v54 = vmul.f32 %v4871_v20, %v3924_v51  ;;  %v4881_v16 = vpop.permute.xlu1 %4880  ;;  %v5911_v51 = vmul.f32 -1.442695, %v1779_v0  ;;  %v10944_v44 = vpop.eup %7495 }
 0x583   :  { %v10950_v20 = vpop.eup %7497  ;;  %5050 = vperm.xlu1 %6666, %v7488_v8  }
 0x584   :  { %7517 = vpow2.f32 %v5911_v51  ;;  %v7500_v63 = vpop.eup %7499  ;;  %5045 = vperm.xlu0 %6665, %v7490_v57  }
 0x585   :  { %7519 = vpow2.f32 %v6026_v40  ;;  %v7502_v6 = vpop.eup %7501  ;;  %v3166_v53 = vadd.f32 1.0, %v7500_v63 }
 0x586   :  { %v4321_v60 = vpop.permute.xlu1 %4320  ;;  %v7504_v17 = vpop.eup %7503 }
 0x587   :  { %v7506_v41 = vpop.eup %7505  ;;  %7521 = vrcp.f32 %v3166_v53  ;;  %v3280_v3 = vadd.f32 1.0, %v7504_v17  ;;  %4490 = vperm.xlu1 %6666, %v10926_v2  }
 0x588   :  { %v3279_v52 = vadd.f32 1.0, %v7506_v41  ;;  %4485 = vperm.xlu0 %6665, %v10931_v39   ;;  %v482_v39 = vld [vmem:[%s11625_s2 + $0x718] sm:$0xff] }
 0x589   :  { %v3923_v43 = vld [vmem:[%s11626_s3 + $0x590] sm:$0xff] }
 0x58a   :  { %5406 = vst.msk [vmem:[%s11627_s4 + $0x200] sm:$0xff] %vm5341_vm4, %v5177_v5  ;;  %v5291_v56 = vmul.f32 %v4866_v36, %v3923_v43  ;;  %v4876_v5 = vpop.permute.xlu0 %4875  ;;  %v1794_v36 = vadd.f32 %v10254_v15, %v366_v4  ;;  %v4891_v15 = vpop.permute.xlu1 %4890  ;;  %v481_v4 = vld [vmem:[%s11625_s2 + $0x710] sm:$0xff] }
 0x58b   :  { %5060 = vperm.xlu1 %6666, %v10944_v44  }
 0x58c   :  { %5055 = vperm.xlu0 %6665, %v10950_v20   ;;  %v2374_v20 = vadd.f32 %v10335_v12, %v482_v39 }
 0x58e   :  { %v4316_v45 = vpop.permute.xlu0 %4315  ;;  %v4331_v0 = vpop.permute.xlu1 %4330 }
 0x591   :  { %v3812_v11 = vld [vmem:[%s11626_s3 + $0x218] sm:$0xff] }
 0x592   :  { %5521 = vst.msk [vmem:[%s11627_s4 + $0x598] sm:$0xff] %vm5341_vm4, %v5292_v54  ;;  %v5180_v1 = vmul.f32 %v4311_v18, %v3812_v11  ;;  %v3165_v11 = vadd.f32 1.0, %v7502_v6  ;;  %v4886_v59 = vpop.permute.xlu0 %4885  ;;  %v5914_v18 = vmul.f32 -1.442695, %v1794_v36  ;;  %v2369_v6 = vadd.f32 %v10340_v50, %v481_v4 }
 0x594   :  { %7523 = vrcp.f32 %v3165_v11 }
 0x596   :  { %v4326_v30 = vpop.permute.xlu0 %4325 }
 0x599   :  { %v3811_v19 = vld [vmem:[%s11626_s3 + $0x210] sm:$0xff] }
 0x59a   :  { %5520 = vst.msk [vmem:[%s11627_s4 + $0x590] sm:$0xff] %vm5341_vm4, %v5291_v56  ;;  %v5179_v31 = vmul.f32 %v4306_v21, %v3811_v19  ;;  %v6025_v56 = vmul.f32 -1.442695, %v2349_v33  ;;  %v7508_v19 = vpop.eup %7507  ;;  %v4896_v13 = vpop.permute.xlu0 %4895  ;;  %v1804_v33 = vadd.f32 %v10309_v38, %v368_v62 }
 0x59b   :  { %v7510_v29 = vpop.eup %7509  ;;  %v3168_v9 = vadd.f32 1.0, %v7508_v19 }
 0x59c   :  { %7525 = vpow2.f32 %v6025_v56  ;;  %v7512_v21 = vpop.eup %7511  ;;  %v3167_v28 = vadd.f32 1.0, %v7510_v29  ;;  %v5916_v17 = vmul.f32 -1.442695, %v1804_v33 }
 0x59d   :  { %7527 = vrcp.f32 %v3280_v3 }
 0x59e   :  { %7529 = vrcp.f32 %v3279_v52  ;;  %v4336_v56 = vpop.permute.xlu0 %4335  ;;  %v6029_v52 = vmul.f32 -1.442695, %v2369_v6 }
 0x59f   :  { %7531 = vpow2.f32 %v5914_v18 }
 0x5a0   :  { %7533 = vrcp.f32 %v3168_v9 }
 0x5a1   :  { %v3926_v24 = vld [vmem:[%s11626_s3 + $0x5a8] sm:$0xff]  ;;  %7535 = vrcp.f32 %v3167_v28 }
 0x5a2   :  { %5409 = vst.msk [vmem:[%s11627_s4 + $0x218] sm:$0xff] %vm5341_vm4, %v5180_v1  ;;  %v5294_v42 = vmul.f32 %v4881_v16, %v3926_v24  ;;  %v365_v1 = vld [vmem:[%s11625_s2 + $0x370] sm:$0xff]  ;;  %v3282_v24 = vadd.f32 1.0, %v7512_v21  ;;  %v4906_v29 = vpop.permute.xlu0 %4905 }
 0x5a3   :  { %v1789_v8 = vadd.f32 %v10263_v32, %v365_v1 }
 0x5a4   :  { %7537 = vrcp.f32 %v3282_v24 }
 0x5a9   :  { %v3925_v48 = vld [vmem:[%s11626_s3 + $0x5a0] sm:$0xff] }
 0x5aa   :  { %5408 = vst.msk [vmem:[%s11627_s4 + $0x210] sm:$0xff] %vm5341_vm4, %v5179_v31  ;;  %v5293_v46 = vmul.f32 %v4876_v5, %v3925_v48  ;;  %v7514_v31 = vpop.eup %7513  ;;  %v367_v5 = vld [vmem:[%s11625_s2 + $0x380] sm:$0xff] }
 0x5ab   :  { %v7516_v10 = vpop.eup %7515  ;;  %v3281_v48 = vadd.f32 1.0, %v7514_v31  ;;  %v1799_v63 = vadd.f32 %v10316_v23, %v367_v5 }
 0x5ac   :  { %v7518_v49 = vpop.eup %7517  ;;  %v3170_v57 = vadd.f32 1.0, %v7516_v10 }
 0x5ad   :  { %v7520_v51 = vpop.eup %7519  ;;  %v3169_v2 = vadd.f32 1.0, %v7518_v49  ;;  %7539 = vrcp.f32 %v3281_v48 }
 0x5ae   :  { %7541 = vrcp.f32 %v3170_v57 }
 0x5af   :  { %7543 = vrcp.f32 %v3169_v2 }
 0x5b1   :  { %v3814_v25 = vld [vmem:[%s11626_s3 + $0x228] sm:$0xff] }
 0x5b2   :  { %5523 = vst.msk [vmem:[%s11627_s4 + $0x5a8] sm:$0xff] %vm5341_vm4, %v5294_v42  ;;  %v5182_v61 = vmul.f32 %v4321_v60, %v3814_v25  ;;  %v2364_v42 = vadd.f32 %v10288_v14, %v480_v55  ;;  %v11725_v25 = vld [vmem:[#allocation24_spill] sm:$0xff]  ;;  %v3284_v14 = vadd.f32 1.0, %v7520_v51  ;;  %v5913_v60 = vmul.f32 -1.442695, %v1789_v8 }
 0x5b3   :  { %v2359_v40 = vadd.f32 %v11725_v25, %v479_v26 }
 0x5b4   :  { %v6028_v38 = vmul.f32 -1.442695, %v2364_v42  ;;  %7545 = vrcp.f32 %v3284_v14 }
 0x5b5   :  { %v6027_v23 = vmul.f32 -1.442695, %v2359_v40  ;;  %7547 = vpow2.f32 %v5913_v60 }
 0x5b6   :  { %7549 = vpow2.f32 %v6028_v38 }
 0x5b7   :  { %7551 = vpow2.f32 %v6027_v23 }
 0x5b9   :  { %v3813_v43 = vld [vmem:[%s11626_s3 + $0x220] sm:$0xff] }
 0x5ba   :  { %5522 = vst.msk [vmem:[%s11627_s4 + $0x5a0] sm:$0xff] %vm5341_vm4, %v5293_v46  ;;  %v5181_v35 = vmul.f32 %v4316_v45, %v3813_v43  ;;  %v4901_v46 = vpop.permute.xlu1 %4900 }
 0x5be   :  { %v4341_v36 = vpop.permute.xlu1 %4340 }
 0x5c1   :  { %v3928_v54 = vld [vmem:[%s11626_s3 + $0x5b8] sm:$0xff] }
 0x5c2   :  { %5411 = vst.msk [vmem:[%s11627_s4 + $0x228] sm:$0xff] %vm5341_vm4, %v5182_v61  ;;  %v5296_v47 = vmul.f32 %v4891_v15, %v3928_v54  ;;  %v5915_v15 = vmul.f32 -1.442695, %v1799_v63  ;;  %v4911_v19 = vpop.permute.xlu1 %4910 }
 0x5c6   :  { %v4351_v31 = vpop.permute.xlu1 %4350 }
 0x5c9   :  { %v3927_v58 = vld [vmem:[%s11626_s3 + $0x5b0] sm:$0xff] }
 0x5ca   :  { %5410 = vst.msk [vmem:[%s11627_s4 + $0x220] sm:$0xff] %vm5341_vm4, %v5181_v35  ;;  %v5295_v7 = vmul.f32 %v4886_v59, %v3927_v58  ;;  %v7522_v35 = vpop.eup %7521  ;;  %7553 = vpow2.f32 %v5916_v17  ;;  %v4921_v62 = vpop.permute.xlu1 %4920 }
 0x5cb   :  { %v7524_v54 = vpop.eup %7523  ;;  %4500 = vperm.xlu1 %6666, %v7522_v35   ;;  %7555 = vpow2.f32 %v5915_v15 }
 0x5cc   :  { %v7526_v53 = vpop.eup %7525  ;;  %4495 = vperm.xlu0 %6665, %v7524_v54  }
 0x5cd   :  { %v7528_v11 = vpop.eup %7527 }
 0x5ce   :  { %v7530_v3 = vpop.eup %7529 }
 0x5cf   :  { %v7532_v59 = vpop.eup %7531  ;;  %5070 = vperm.xlu1 %6666, %v7528_v11  }
 0x5d0   :  { %5065 = vperm.xlu0 %6665, %v7530_v3   ;;  %v3172_v55 = vadd.f32 1.0, %v7532_v59 }
 0x5d1   :  { %v3816_v34 = vld [vmem:[%s11626_s3 + $0x238] sm:$0xff] }
 0x5d2   :  { %5525 = vst.msk [vmem:[%s11627_s4 + $0x5b8] sm:$0xff] %vm5341_vm4, %v5296_v47  ;;  %v5184_v37 = vmul.f32 %v4331_v0, %v3816_v34  ;;  %v6030_v47 = vmul.f32 -1.442695, %v2374_v20  ;;  %v3283_v34 = vadd.f32 1.0, %v7526_v53 }
 0x5d4   :  { %7557 = vpow2.f32 %v6030_v47 }
 0x5d5   :  { %7559 = vpow2.f32 %v6029_v52 }
 0x5d6   :  { %7561 = vrcp.f32 %v3283_v34 }
 0x5d7   :  { %7563 = vrcp.f32 %v3172_v55 }
 0x5d9   :  { %v3815_v27 = vld [vmem:[%s11626_s3 + $0x230] sm:$0xff] }
 0x5da   :  { %5524 = vst.msk [vmem:[%s11627_s4 + $0x5b0] sm:$0xff] %vm5341_vm4, %v5295_v7  ;;  %v5183_v22 = vmul.f32 %v4326_v30, %v3815_v27  ;;  %v7534_v7 = vpop.eup %7533  ;;  %v4346_v30 = vpop.permute.xlu0 %4345 }
 0x5db   :  { %v7536_v9 = vpop.eup %7535  ;;  %4510 = vperm.xlu1 %6666, %v7534_v7  }
 0x5dc   :  { %v7538_v21 = vpop.eup %7537  ;;  %4505 = vperm.xlu0 %6665, %v7536_v9  }
 0x5dd   :  { %v7540_v0 = vpop.eup %7539 }
 0x5de   :  { %v7542_v24 = vpop.eup %7541  ;;  %v4916_v42 = vpop.permute.xlu0 %4915 }
 0x5df   :  { %v7544_v26 = vpop.eup %7543  ;;  %5080 = vperm.xlu1 %6666, %v7538_v21  }
 0x5e0   :  { %5075 = vperm.xlu0 %6665, %v7540_v0  }
 0x5e1   :  { %v3930_v16 = vld [vmem:[%s11626_s3 + $0x5c8] sm:$0xff] }
 0x5e2   :  { %5413 = vst.msk [vmem:[%s11627_s4 + $0x238] sm:$0xff] %vm5341_vm4, %v5184_v37  ;;  %v5298_v43 = vmul.f32 %v4901_v46, %v3930_v16 }
 0x5e3   :  { %4520 = vperm.xlu1 %6666, %v7542_v24  }
 0x5e4   :  { %4515 = vperm.xlu0 %6665, %v7544_v26  }
 0x5e9   :  { %v3929_v32 = vld [vmem:[%s11626_s3 + $0x5c0] sm:$0xff] }
 0x5ea   :  { %5412 = vst.msk [vmem:[%s11627_s4 + $0x230] sm:$0xff] %vm5341_vm4, %v5183_v22  ;;  %v5297_v61 = vmul.f32 %v4896_v13, %v3929_v32  ;;  %v7546_v22 = vpop.eup %7545  ;;  %v4361_v13 = vpop.permute.xlu1 %4360 }
 0x5eb   :  { %v7548_v16 = vpop.eup %7547  ;;  %5090 = vperm.xlu1 %6666, %v7546_v22  }
 0x5ec   :  { %v7550_v49 = vpop.eup %7549  ;;  %v3171_v57 = vadd.f32 1.0, %v7548_v16 }
 0x5ed   :  { %v7552_v5 = vpop.eup %7551  ;;  %v3286_v51 = vadd.f32 1.0, %v7550_v49 }
 0x5ee   :  { %v7554_v25 = vpop.eup %7553  ;;  %7565 = vrcp.f32 %v3171_v57  ;;  %v3285_v40 = vadd.f32 1.0, %v7552_v5  ;;  %v4931_v54 = vpop.permute.xlu1 %4930 }
 0x5ef   :  { %v7556_v14 = vpop.eup %7555  ;;  %7567 = vrcp.f32 %v3286_v51 }
 0x5f0   :  { %v7558_v33 = vpop.eup %7557  ;;  %7569 = vrcp.f32 %v3285_v40  ;;  %v3173_v4 = vadd.f32 1.0, %v7556_v14 }
 0x5f1   :  { %v3818_v45 = vld [vmem:[%s11626_s3 + $0x248] sm:$0xff]  ;;  %v3288_v20 = vadd.f32 1.0, %v7558_v33 }
 0x5f2   :  { %5527 = vst.msk [vmem:[%s11627_s4 + $0x5c8] sm:$0xff] %vm5341_vm4, %v5298_v43  ;;  %v5186_v58 = vmul.f32 %v4341_v36, %v3818_v45  ;;  %v3174_v43 = vadd.f32 1.0, %v7554_v25  ;;  %v7560_v45 = vpop.eup %7559  ;;  %v4371_v11 = vpop.permute.xlu1 %4370 }
 0x5f3   :  { %v7562_v38 = vpop.eup %7561  ;;  %v3287_v23 = vadd.f32 1.0, %v7560_v45 }
 0x5f4   :  { %7571 = vrcp.f32 %v3174_v43  ;;  %v7564_v53 = vpop.eup %7563  ;;  %5085 = vperm.xlu0 %6665, %v7562_v38  }
 0x5f5   :  { %7573 = vrcp.f32 %v3173_v4  ;;  %4530 = vperm.xlu1 %6666, %v7564_v53  }
 0x5f6   :  { %7575 = vrcp.f32 %v3288_v20  ;;  %v4941_v52 = vpop.permute.xlu1 %4940 }
 0x5f7   :  { %7577 = vrcp.f32 %v3287_v23 }
 0x5f9   :  { %v3817_v44 = vld [vmem:[%s11626_s3 + $0x240] sm:$0xff] }
 0x5fa   :  { %5526 = vst.msk [vmem:[%s11627_s4 + $0x5c0] sm:$0xff] %vm5341_vm4, %v5297_v61  ;;  %v5185_v12 = vmul.f32 %v4336_v56, %v3817_v44  ;;  %v4356_v61 = vpop.permute.xlu0 %4355  ;;  %v4381_v21 = vpop.permute.xlu1 %4380 }
 0x5fe   :  { %v4926_v6 = vpop.permute.xlu0 %4925  ;;  %v4951_v26 = vpop.permute.xlu1 %4950 }
 0x601   :  { %v3932_v41 = vld [vmem:[%s11626_s3 + $0x5d8] sm:$0xff] }
 0x602   :  { %5415 = vst.msk [vmem:[%s11627_s4 + $0x248] sm:$0xff] %vm5341_vm4, %v5186_v58  ;;  %v5300_v18 = vmul.f32 %v4911_v19, %v3932_v41  ;;  %v4366_v41 = vpop.permute.xlu0 %4365 }
 0x606   :  { %v4936_v34 = vpop.permute.xlu0 %4935 }
 0x609   :  { %v3931_v50 = vld [vmem:[%s11626_s3 + $0x5d0] sm:$0xff] }
 0x60a   :  { %5414 = vst.msk [vmem:[%s11627_s4 + $0x240] sm:$0xff] %vm5341_vm4, %v5185_v12  ;;  %v5299_v27 = vmul.f32 %v4906_v29, %v3931_v50  ;;  %v7566_v12 = vpop.eup %7565  ;;  %v4376_v0 = vpop.permute.xlu0 %4375 }
 0x60b   :  { %v7568_v3 = vpop.eup %7567  ;;  %4525 = vperm.xlu0 %6665, %v7566_v12  }
 0x60c   :  { %v7570_v59 = vpop.eup %7569  ;;  %5100 = vperm.xlu1 %6666, %v7568_v3  }
 0x60f   :  { %5095 = vperm.xlu0 %6665, %v7570_v59  }
 0x611   :  { %v3820_v1 = vld [vmem:[%s11626_s3 + $0x258] sm:$0xff] }
 0x612   :  { %5529 = vst.msk [vmem:[%s11627_s4 + $0x5d8] sm:$0xff] %vm5341_vm4, %v5300_v18  ;;  %v5188_v37 = vmul.f32 %v4351_v31, %v3820_v1  ;;  %v7572_v18 = vpop.eup %7571 }
 0x613   :  { %4540 = vperm.xlu1 %6666, %v7572_v18  }
 0x619   :  { %v3819_v28 = vld [vmem:[%s11626_s3 + $0x250] sm:$0xff] }
 0x61a   :  { %5528 = vst.msk [vmem:[%s11627_s4 + $0x5d0] sm:$0xff] %vm5341_vm4, %v5299_v27  ;;  %v5187_v10 = vmul.f32 %v4346_v30, %v3819_v28  ;;  %v7574_v27 = vpop.eup %7573 }
 0x61b   :  { %v7576_v55 = vpop.eup %7575  ;;  %4535 = vperm.xlu0 %6665, %v7574_v27  }
 0x61c   :  { %5110 = vperm.xlu1 %6666, %v7576_v55  }
 0x621   :  { %v3934_v48 = vld [vmem:[%s11626_s3 + $0x5e8] sm:$0xff] }
 0x622   :  { %5417 = vst.msk [vmem:[%s11627_s4 + $0x258] sm:$0xff] %vm5341_vm4, %v5188_v37  ;;  %v5302_v32 = vmul.f32 %v4921_v62, %v3934_v48  ;;  %v7578_v37 = vpop.eup %7577  ;;  %v4946_v48 = vpop.permute.xlu0 %4945 }
 0x623   :  { %5105 = vperm.xlu0 %6665, %v7578_v37   ;;  %v4391_v62 = vpop.permute.xlu1 %4390 }
 0x626   :  { %v4386_v57 = vpop.permute.xlu0 %4385 }
 0x627   :  { %v4961_v51 = vpop.permute.xlu1 %4960 }
 0x629   :  { %v3933_v8 = vld [vmem:[%s11626_s3 + $0x5e0] sm:$0xff] }
 0x62a   :  { %5416 = vst.msk [vmem:[%s11627_s4 + $0x250] sm:$0xff] %vm5341_vm4, %v5187_v10  ;;  %v5301_v2 = vmul.f32 %v4916_v42, %v3933_v8 }
 0x62b   :  { %v4401_v14 = vpop.permute.xlu1 %4400 }
 0x631   :  { %v3822_v46 = vld [vmem:[%s11626_s3 + $0x268] sm:$0xff] }
 0x632   :  { %5531 = vst.msk [vmem:[%s11627_s4 + $0x5e8] sm:$0xff] %vm5341_vm4, %v5302_v32  ;;  %v5190_v60 = vmul.f32 %v4361_v13, %v3822_v46  ;;  %v4956_v46 = vpop.permute.xlu0 %4955 }
 0x636   :  { %v4396_v13 = vpop.permute.xlu0 %4395 }
 0x639   :  { %v3821_v39 = vld [vmem:[%s11626_s3 + $0x260] sm:$0xff] }
 0x63a   :  { %5530 = vst.msk [vmem:[%s11627_s4 + $0x5e0] sm:$0xff] %vm5341_vm4, %v5301_v2  ;;  %v5189_v63 = vmul.f32 %v4356_v61, %v3821_v39  ;;  %v4971_v61 = vpop.permute.xlu1 %4970 }
 0x63e   :  { %v4411_v20 = vpop.permute.xlu1 %4410 }
 0x641   :  { %v3936_v35 = vld [vmem:[%s11626_s3 + $0x5f8] sm:$0xff] }
 0x642   :  { %5419 = vst.msk [vmem:[%s11627_s4 + $0x268] sm:$0xff] %vm5341_vm4, %v5190_v60  ;;  %v5304_v36 = vmul.f32 %v4931_v54, %v3936_v35 }
 0x649   :  { %v3935_v44 = vld [vmem:[%s11626_s3 + $0x5f0] sm:$0xff] }
 0x64a   :  { %5418 = vst.msk [vmem:[%s11627_s4 + $0x260] sm:$0xff] %vm5341_vm4, %v5189_v63  ;;  %v5303_v58 = vmul.f32 %v4926_v6, %v3935_v44  ;;  %v4966_v63 = vpop.permute.xlu0 %4965 }
 0x64e   :  { %v4406_v23 = vpop.permute.xlu0 %4405 }
 0x651   :  { %v3824_v56 = vld [vmem:[%s11626_s3 + $0x278] sm:$0xff] }
 0x652   :  { %5533 = vst.msk [vmem:[%s11627_s4 + $0x5f8] sm:$0xff] %vm5341_vm4, %v5304_v36  ;;  %v5192_v15 = vmul.f32 %v4371_v11, %v3824_v56 }
 0x659   :  { %v3823_v17 = vld [vmem:[%s11626_s3 + $0x270] sm:$0xff] }
 0x65a   :  { %5532 = vst.msk [vmem:[%s11627_s4 + $0x5f0] sm:$0xff] %vm5341_vm4, %v5303_v58  ;;  %v5191_v50 = vmul.f32 %v4366_v41, %v3823_v17  ;;  %v4981_v58 = vpop.permute.xlu1 %4980  ;;  %v4976_v17 = vpop.permute.xlu0 %4975 }
 0x65e   :  { %v4421_v41 = vpop.permute.xlu1 %4420 }
 0x661   :  { %v3938_v47 = vld [vmem:[%s11626_s3 + $0x608] sm:$0xff] }
 0x662   :  { %5421 = vst.msk [vmem:[%s11627_s4 + $0x278] sm:$0xff] %vm5341_vm4, %v5192_v15  ;;  %v5306_v7 = vmul.f32 %v4941_v52, %v3938_v47  ;;  %v4991_v52 = vpop.permute.xlu1 %4990 }
 0x666   :  { %v4431_v27 = vpop.permute.xlu1 %4430 }
 0x669   :  { %v3937_v19 = vld [vmem:[%s11626_s3 + $0x600] sm:$0xff] }
 0x66a   :  { %5420 = vst.msk [vmem:[%s11627_s4 + $0x270] sm:$0xff] %vm5341_vm4, %v5191_v50  ;;  %v5305_v29 = vmul.f32 %v4936_v34, %v3937_v19  ;;  %v4416_v50 = vpop.permute.xlu0 %4415 }
 0x66e   :  { %v4986_v34 = vpop.permute.xlu0 %4985 }
 0x671   :  { %v3826_v9 = vld [vmem:[%s11626_s3 + $0x288] sm:$0xff] }
 0x672   :  { %5535 = vst.msk [vmem:[%s11627_s4 + $0x608] sm:$0xff] %vm5341_vm4, %v5306_v7  ;;  %v5194_v28 = vmul.f32 %v4381_v21, %v3826_v9  ;;  %v4426_v21 = vpop.permute.xlu0 %4425 }
 0x676   :  { %v4996_v37 = vpop.permute.xlu0 %4995 }
 0x679   :  { %v3825_v1 = vld [vmem:[%s11626_s3 + $0x280] sm:$0xff] }
 0x67a   :  { %5534 = vst.msk [vmem:[%s11627_s4 + $0x600] sm:$0xff] %vm5341_vm4, %v5305_v29  ;;  %v5193_v31 = vmul.f32 %v4376_v0, %v3825_v1 }
 0x681   :  { %v3940_v24 = vld [vmem:[%s11626_s3 + $0x618] sm:$0xff] }
 0x682   :  { %5423 = vst.msk [vmem:[%s11627_s4 + $0x288] sm:$0xff] %vm5341_vm4, %v5194_v28  ;;  %v5308_v10 = vmul.f32 %v4951_v26, %v3940_v24 }
 0x689   :  { %v3939_v30 = vld [vmem:[%s11626_s3 + $0x610] sm:$0xff] }
 0x68a   :  { %5422 = vst.msk [vmem:[%s11627_s4 + $0x280] sm:$0xff] %vm5341_vm4, %v5193_v31  ;;  %v5307_v22 = vmul.f32 %v4946_v48, %v3939_v30  ;;  %v5001_v31 = vpop.permute.xlu1 %5000 }
 0x68e   :  { %v4441_v48 = vpop.permute.xlu1 %4440 }
 0x691   :  { %v3828_v8 = vld [vmem:[%s11626_s3 + $0x298] sm:$0xff] }
 0x692   :  { %5537 = vst.msk [vmem:[%s11627_s4 + $0x618] sm:$0xff] %vm5341_vm4, %v5308_v10  ;;  %v5196_v49 = vmul.f32 %v4391_v62, %v3828_v8  ;;  %v4436_v8 = vpop.permute.xlu0 %4435 }
 0x699   :  { %v3827_v16 = vld [vmem:[%s11626_s3 + $0x290] sm:$0xff] }
 0x69a   :  { %5536 = vst.msk [vmem:[%s11627_s4 + $0x610] sm:$0xff] %vm5341_vm4, %v5307_v22  ;;  %v5195_v32 = vmul.f32 %v4386_v57, %v3827_v16  ;;  %v5011_v57 = vpop.permute.xlu1 %5010 }
 0x6a1   :  { %v3942_v42 = vld [vmem:[%s11626_s3 + $0x628] sm:$0xff] }
 0x6a2   :  { %5425 = vst.msk [vmem:[%s11627_s4 + $0x298] sm:$0xff] %vm5341_vm4, %v5196_v49  ;;  %v5310_v2 = vmul.f32 %v4961_v51, %v3942_v42  ;;  %v5006_v42 = vpop.permute.xlu0 %5005 }
 0x6a9   :  { %v3941_v5 = vld [vmem:[%s11626_s3 + $0x620] sm:$0xff] }
 0x6aa   :  { %5424 = vst.msk [vmem:[%s11627_s4 + $0x290] sm:$0xff] %vm5341_vm4, %v5195_v32  ;;  %v5309_v25 = vmul.f32 %v4956_v46, %v3941_v5  ;;  %v4451_v46 = vpop.permute.xlu1 %4450 }
 0x6b1   :  { %v3830_v40 = vld [vmem:[%s11626_s3 + $0x2a8] sm:$0xff] }
 0x6b2   :  { %5539 = vst.msk [vmem:[%s11627_s4 + $0x628] sm:$0xff] %vm5341_vm4, %v5310_v2  ;;  %v5198_v43 = vmul.f32 %v4401_v14, %v3830_v40  ;;  %v4446_v40 = vpop.permute.xlu0 %4445 }
 0x6b9   :  { %v3829_v39 = vld [vmem:[%s11626_s3 + $0x2a0] sm:$0xff] }
 0x6ba   :  { %5538 = vst.msk [vmem:[%s11627_s4 + $0x620] sm:$0xff] %vm5341_vm4, %v5309_v25  ;;  %v5197_v33 = vmul.f32 %v4396_v13, %v3829_v39  ;;  %v5021_v13 = vpop.permute.xlu1 %5020 }
 0x6c1   :  { %v3944_v4 = vld [vmem:[%s11626_s3 + $0x638] sm:$0xff] }
 0x6c2   :  { %5427 = vst.msk [vmem:[%s11627_s4 + $0x2a8] sm:$0xff] %vm5341_vm4, %v5198_v43  ;;  %v5312_v45 = vmul.f32 %v4971_v61, %v3944_v4  ;;  %v5016_v4 = vpop.permute.xlu0 %5015 }
 0x6c9   :  { %v3943_v60 = vld [vmem:[%s11626_s3 + $0x630] sm:$0xff] }
 0x6ca   :  { %5426 = vst.msk [vmem:[%s11627_s4 + $0x2a0] sm:$0xff] %vm5341_vm4, %v5197_v33  ;;  %v5311_v35 = vmul.f32 %v4966_v63, %v3943_v60  ;;  %v4461_v63 = vpop.permute.xlu1 %4460 }
 0x6d1   :  { %v3832_v38 = vld [vmem:[%s11626_s3 + $0x2b8] sm:$0xff] }
 0x6d2   :  { %5541 = vst.msk [vmem:[%s11627_s4 + $0x638] sm:$0xff] %vm5341_vm4, %v5312_v45  ;;  %v5200_v54 = vmul.f32 %v4411_v20, %v3832_v38  ;;  %v4456_v38 = vpop.permute.xlu0 %4455 }
 0x6d9   :  { %v3831_v44 = vld [vmem:[%s11626_s3 + $0x2b0] sm:$0xff] }
 0x6da   :  { %5540 = vst.msk [vmem:[%s11627_s4 + $0x630] sm:$0xff] %vm5341_vm4, %v5311_v35  ;;  %v5199_v36 = vmul.f32 %v4406_v23, %v3831_v44  ;;  %v5031_v23 = vpop.permute.xlu1 %5030 }
 0x6e1   :  { %v3946_v6 = vld [vmem:[%s11626_s3 + $0x648] sm:$0xff] }
 0x6e2   :  { %5429 = vst.msk [vmem:[%s11627_s4 + $0x2b8] sm:$0xff] %vm5341_vm4, %v5200_v54  ;;  %v5314_v56 = vmul.f32 %v4981_v58, %v3946_v6  ;;  %v5026_v6 = vpop.permute.xlu0 %5025 }
 0x6e9   :  { %v3945_v53 = vld [vmem:[%s11626_s3 + $0x640] sm:$0xff] }
 0x6ea   :  { %5428 = vst.msk [vmem:[%s11627_s4 + $0x2b0] sm:$0xff] %vm5341_vm4, %v5199_v36  ;;  %v5313_v11 = vmul.f32 %v4976_v17, %v3945_v53  ;;  %v4471_v17 = vpop.permute.xlu1 %4470 }
 0x6f1   :  { %v3834_v12 = vld [vmem:[%s11626_s3 + $0x2c8] sm:$0xff] }
 0x6f2   :  { %5543 = vst.msk [vmem:[%s11627_s4 + $0x648] sm:$0xff] %vm5341_vm4, %v5314_v56  ;;  %v5202_v3 = vmul.f32 %v4421_v41, %v3834_v12  ;;  %v4466_v12 = vpop.permute.xlu0 %4465 }
 0x6f9   :  { %v3833_v15 = vld [vmem:[%s11626_s3 + $0x2c0] sm:$0xff] }
 0x6fa   :  { %5542 = vst.msk [vmem:[%s11627_s4 + $0x640] sm:$0xff] %vm5341_vm4, %v5313_v11  ;;  %v5201_v47 = vmul.f32 %v4416_v50, %v3833_v15  ;;  %v5041_v50 = vpop.permute.xlu1 %5040 }
 0x701   :  { %v3948_v59 = vld [vmem:[%s11626_s3 + $0x658] sm:$0xff] }
 0x702   :  { %5431 = vst.msk [vmem:[%s11627_s4 + $0x2c8] sm:$0xff] %vm5341_vm4, %v5202_v3  ;;  %v5316_v7 = vmul.f32 %v4991_v52, %v3948_v59  ;;  %v5036_v59 = vpop.permute.xlu0 %5035 }
 0x709   :  { %v3947_v19 = vld [vmem:[%s11626_s3 + $0x650] sm:$0xff] }
 0x70a   :  { %5430 = vst.msk [vmem:[%s11627_s4 + $0x2c0] sm:$0xff] %vm5341_vm4, %v5201_v47  ;;  %v5315_v18 = vmul.f32 %v4986_v34, %v3947_v19  ;;  %v4481_v34 = vpop.permute.xlu1 %4480 }
 0x711   :  { %v3836_v29 = vld [vmem:[%s11626_s3 + $0x2d8] sm:$0xff] }
 0x712   :  { %5545 = vst.msk [vmem:[%s11627_s4 + $0x658] sm:$0xff] %vm5341_vm4, %v5316_v7  ;;  %v5204_v1 = vmul.f32 %v4431_v27, %v3836_v29  ;;  %v4476_v29 = vpop.permute.xlu0 %4475 }
 0x719   :  { %v3835_v9 = vld [vmem:[%s11626_s3 + $0x2d0] sm:$0xff] }
 0x71a   :  { %5544 = vst.msk [vmem:[%s11627_s4 + $0x650] sm:$0xff] %vm5341_vm4, %v5315_v18  ;;  %v5203_v28 = vmul.f32 %v4426_v21, %v3835_v9  ;;  %v5051_v21 = vpop.permute.xlu1 %5050 }
 0x721   :  { %v3950_v0 = vld [vmem:[%s11626_s3 + $0x668] sm:$0xff] }
 0x722   :  { %5433 = vst.msk [vmem:[%s11627_s4 + $0x2d8] sm:$0xff] %vm5341_vm4, %v5204_v1  ;;  %v5318_v24 = vmul.f32 %v5001_v31, %v3950_v0  ;;  %v5046_v0 = vpop.permute.xlu0 %5045 }
 0x729   :  { %v3949_v55 = vld [vmem:[%s11626_s3 + $0x660] sm:$0xff] }
 0x72a   :  { %5432 = vst.msk [vmem:[%s11627_s4 + $0x2d0] sm:$0xff] %vm5341_vm4, %v5203_v28  ;;  %v5317_v30 = vmul.f32 %v4996_v37, %v3949_v55  ;;  %v4491_v37 = vpop.permute.xlu1 %4490 }
 0x731   :  { %v3838_v26 = vld [vmem:[%s11626_s3 + $0x2e8] sm:$0xff] }
 0x732   :  { %5547 = vst.msk [vmem:[%s11627_s4 + $0x668] sm:$0xff] %vm5341_vm4, %v5318_v24  ;;  %v5206_v22 = vmul.f32 %v4441_v48, %v3838_v26  ;;  %v4486_v26 = vpop.permute.xlu0 %4485 }
 0x739   :  { %v3837_v10 = vld [vmem:[%s11626_s3 + $0x2e0] sm:$0xff] }
 0x73a   :  { %5546 = vst.msk [vmem:[%s11627_s4 + $0x660] sm:$0xff] %vm5341_vm4, %v5317_v30  ;;  %v5205_v16 = vmul.f32 %v4436_v8, %v3837_v10  ;;  %v5061_v8 = vpop.permute.xlu1 %5060 }
 0x741   :  { %v3952_v62 = vld [vmem:[%s11626_s3 + $0x678] sm:$0xff] }
 0x742   :  { %5435 = vst.msk [vmem:[%s11627_s4 + $0x2e8] sm:$0xff] %vm5341_vm4, %v5206_v22  ;;  %v5320_v32 = vmul.f32 %v5011_v57, %v3952_v62  ;;  %v5056_v62 = vpop.permute.xlu0 %5055 }
 0x749   :  { %v3951_v49 = vld [vmem:[%s11626_s3 + $0x670] sm:$0xff] }
 0x74a   :  { %5434 = vst.msk [vmem:[%s11627_s4 + $0x2e0] sm:$0xff] %vm5341_vm4, %v5205_v16  ;;  %v5319_v5 = vmul.f32 %v5006_v42, %v3951_v49  ;;  %v4501_v42 = vpop.permute.xlu1 %4500 }
 0x751   :  { %v3840_v51 = vld [vmem:[%s11626_s3 + $0x2f8] sm:$0xff] }
 0x752   :  { %5549 = vst.msk [vmem:[%s11627_s4 + $0x678] sm:$0xff] %vm5341_vm4, %v5320_v32  ;;  %v5208_v25 = vmul.f32 %v4451_v46, %v3840_v51  ;;  %v4496_v51 = vpop.permute.xlu0 %4495 }
 0x759   :  { %v3839_v2 = vld [vmem:[%s11626_s3 + $0x2f0] sm:$0xff] }
 0x75a   :  { %5548 = vst.msk [vmem:[%s11627_s4 + $0x670] sm:$0xff] %vm5341_vm4, %v5319_v5  ;;  %v5207_v39 = vmul.f32 %v4446_v40, %v3839_v2  ;;  %v5071_v40 = vpop.permute.xlu1 %5070 }
 0x761   :  { %v3954_v14 = vld [vmem:[%s11626_s3 + $0x688] sm:$0xff] }
 0x762   :  { %5437 = vst.msk [vmem:[%s11627_s4 + $0x2f8] sm:$0xff] %vm5341_vm4, %v5208_v25  ;;  %v5322_v33 = vmul.f32 %v5021_v13, %v3954_v14  ;;  %v5066_v14 = vpop.permute.xlu0 %5065 }
 0x769   :  { %v3953_v43 = vld [vmem:[%s11626_s3 + $0x680] sm:$0xff] }
 0x76a   :  { %5436 = vst.msk [vmem:[%s11627_s4 + $0x2f0] sm:$0xff] %vm5341_vm4, %v5207_v39  ;;  %v5321_v60 = vmul.f32 %v5016_v4, %v3953_v43  ;;  %v4511_v4 = vpop.permute.xlu1 %4510 }
 0x771   :  { %v3842_v61 = vld [vmem:[%s11626_s3 + $0x308] sm:$0xff] }
 0x772   :  { %5551 = vst.msk [vmem:[%s11627_s4 + $0x688] sm:$0xff] %vm5341_vm4, %v5322_v33  ;;  %v5210_v35 = vmul.f32 %v4461_v63, %v3842_v61  ;;  %v4506_v61 = vpop.permute.xlu0 %4505 }
 0x779   :  { %v3841_v45 = vld [vmem:[%s11626_s3 + $0x300] sm:$0xff] }
 0x77a   :  { %5550 = vst.msk [vmem:[%s11627_s4 + $0x680] sm:$0xff] %vm5341_vm4, %v5321_v60  ;;  %v5209_v44 = vmul.f32 %v4456_v38, %v3841_v45  ;;  %v5081_v38 = vpop.permute.xlu1 %5080 }
 0x781   :  { %v3956_v20 = vld [vmem:[%s11626_s3 + $0x698] sm:$0xff] }
 0x782   :  { %5439 = vst.msk [vmem:[%s11627_s4 + $0x308] sm:$0xff] %vm5341_vm4, %v5210_v35  ;;  %v5324_v36 = vmul.f32 %v5031_v23, %v3956_v20  ;;  %v5076_v20 = vpop.permute.xlu0 %5075 }
 0x789   :  { %v3955_v54 = vld [vmem:[%s11626_s3 + $0x690] sm:$0xff] }
 0x78a   :  { %5438 = vst.msk [vmem:[%s11627_s4 + $0x300] sm:$0xff] %vm5341_vm4, %v5209_v44  ;;  %v5323_v53 = vmul.f32 %v5026_v6, %v3955_v54  ;;  %v4521_v6 = vpop.permute.xlu1 %4520 }
 0x791   :  { %v3844_v58 = vld [vmem:[%s11626_s3 + $0x318] sm:$0xff] }
 0x792   :  { %5553 = vst.msk [vmem:[%s11627_s4 + $0x698] sm:$0xff] %vm5341_vm4, %v5324_v36  ;;  %v5212_v11 = vmul.f32 %v4471_v17, %v3844_v58  ;;  %v4516_v58 = vpop.permute.xlu0 %4515 }
 0x799   :  { %v3843_v56 = vld [vmem:[%s11626_s3 + $0x310] sm:$0xff] }
 0x79a   :  { %5552 = vst.msk [vmem:[%s11627_s4 + $0x690] sm:$0xff] %vm5341_vm4, %v5323_v53  ;;  %v5211_v15 = vmul.f32 %v4466_v12, %v3843_v56  ;;  %v5091_v12 = vpop.permute.xlu1 %5090 }
 0x7a1   :  { %v3958_v41 = vld [vmem:[%s11626_s3 + $0x6a8] sm:$0xff] }
 0x7a2   :  { %5441 = vst.msk [vmem:[%s11627_s4 + $0x318] sm:$0xff] %vm5341_vm4, %v5212_v11  ;;  %v5326_v47 = vmul.f32 %v5041_v50, %v3958_v41  ;;  %v5086_v41 = vpop.permute.xlu0 %5085 }
 0x7a9   :  { %v3957_v3 = vld [vmem:[%s11626_s3 + $0x6a0] sm:$0xff] }
 0x7aa   :  { %5440 = vst.msk [vmem:[%s11627_s4 + $0x310] sm:$0xff] %vm5341_vm4, %v5211_v15  ;;  %v5325_v19 = vmul.f32 %v5036_v59, %v3957_v3  ;;  %v4531_v59 = vpop.permute.xlu1 %4530 }
 0x7b1   :  { %v3846_v52 = vld [vmem:[%s11626_s3 + $0x328] sm:$0xff] }
 0x7b2   :  { %5555 = vst.msk [vmem:[%s11627_s4 + $0x6a8] sm:$0xff] %vm5341_vm4, %v5326_v47  ;;  %v5214_v18 = vmul.f32 %v4481_v34, %v3846_v52  ;;  %v4526_v52 = vpop.permute.xlu0 %4525 }
 0x7b9   :  { %v3845_v7 = vld [vmem:[%s11626_s3 + $0x320] sm:$0xff] }
 0x7ba   :  { %5554 = vst.msk [vmem:[%s11627_s4 + $0x6a0] sm:$0xff] %vm5341_vm4, %v5325_v19  ;;  %v5213_v9 = vmul.f32 %v4476_v29, %v3845_v7  ;;  %v5101_v29 = vpop.permute.xlu1 %5100 }
 0x7c1   :  { %v3960_v27 = vld [vmem:[%s11626_s3 + $0x6b8] sm:$0xff] }
 0x7c2   :  { %5443 = vst.msk [vmem:[%s11627_s4 + $0x328] sm:$0xff] %vm5341_vm4, %v5214_v18  ;;  %v5328_v28 = vmul.f32 %v5051_v21, %v3960_v27  ;;  %v5096_v27 = vpop.permute.xlu0 %5095 }
 0x7c9   :  { %v3959_v1 = vld [vmem:[%s11626_s3 + $0x6b0] sm:$0xff] }
 0x7ca   :  { %5442 = vst.msk [vmem:[%s11627_s4 + $0x320] sm:$0xff] %vm5341_vm4, %v5213_v9  ;;  %v5327_v55 = vmul.f32 %v5046_v0, %v3959_v1  ;;  %v4541_v0 = vpop.permute.xlu1 %4540 }
 0x7d1   :  { %v3848_v31 = vld [vmem:[%s11626_s3 + $0x338] sm:$0xff] }
 0x7d2   :  { %5557 = vst.msk [vmem:[%s11627_s4 + $0x6b8] sm:$0xff] %vm5341_vm4, %v5328_v28  ;;  %v5216_v30 = vmul.f32 %v4491_v37, %v3848_v31  ;;  %v4536_v31 = vpop.permute.xlu0 %4535 }
 0x7d9   :  { %v3847_v24 = vld [vmem:[%s11626_s3 + $0x330] sm:$0xff] }
 0x7da   :  { %5556 = vst.msk [vmem:[%s11627_s4 + $0x6b0] sm:$0xff] %vm5341_vm4, %v5327_v55  ;;  %v5215_v10 = vmul.f32 %v4486_v26, %v3847_v24  ;;  %v5111_v26 = vpop.permute.xlu1 %5110 }
 0x7e1   :  { %v3962_v48 = vld [vmem:[%s11626_s3 + $0x6c8] sm:$0xff] }
 0x7e2   :  { %5445 = vst.msk [vmem:[%s11627_s4 + $0x338] sm:$0xff] %vm5341_vm4, %v5216_v30  ;;  %v5330_v16 = vmul.f32 %v5061_v8, %v3962_v48  ;;  %v5106_v48 = vpop.permute.xlu0 %5105 }
 0x7e9   :  { %v3961_v22 = vld [vmem:[%s11626_s3 + $0x6c0] sm:$0xff] }
 0x7ea   :  { %5444 = vst.msk [vmem:[%s11627_s4 + $0x330] sm:$0xff] %vm5341_vm4, %v5215_v10  ;;  %v5329_v49 = vmul.f32 %v5056_v62, %v3961_v22 }
 0x7f1   :  { %v3850_v57 = vld [vmem:[%s11626_s3 + $0x348] sm:$0xff] }
 0x7f2   :  { %5559 = vst.msk [vmem:[%s11627_s4 + $0x6c8] sm:$0xff] %vm5341_vm4, %v5330_v16  ;;  %v5218_v5 = vmul.f32 %v4501_v42, %v3850_v57 }
 0x7f9   :  { %v3849_v32 = vld [vmem:[%s11626_s3 + $0x340] sm:$0xff] }
 0x7fa   :  { %5558 = vst.msk [vmem:[%s11627_s4 + $0x6c0] sm:$0xff] %vm5341_vm4, %v5329_v49  ;;  %v5217_v2 = vmul.f32 %v4496_v51, %v3849_v32 }
 0x801   :  { %v3964_v46 = vld [vmem:[%s11626_s3 + $0x6d8] sm:$0xff] }
 0x802   :  { %5447 = vst.msk [vmem:[%s11627_s4 + $0x348] sm:$0xff] %vm5341_vm4, %v5218_v5  ;;  %v5332_v39 = vmul.f32 %v5071_v40, %v3964_v46 }
 0x809   :  { %v3963_v25 = vld [vmem:[%s11626_s3 + $0x6d0] sm:$0xff] }
 0x80a   :  { %5446 = vst.msk [vmem:[%s11627_s4 + $0x340] sm:$0xff] %vm5341_vm4, %v5217_v2  ;;  %v5331_v43 = vmul.f32 %v5066_v14, %v3963_v25 }
 0x811   :  { %v3852_v13 = vld [vmem:[%s11626_s3 + $0x358] sm:$0xff] }
 0x812   :  { %5561 = vst.msk [vmem:[%s11627_s4 + $0x6d8] sm:$0xff] %vm5341_vm4, %v5332_v39  ;;  %v5220_v60 = vmul.f32 %v4511_v4, %v3852_v13 }
 0x819   :  { %v3851_v33 = vld [vmem:[%s11626_s3 + $0x350] sm:$0xff] }
 0x81a   :  { %5560 = vst.msk [vmem:[%s11627_s4 + $0x6d0] sm:$0xff] %vm5341_vm4, %v5331_v43  ;;  %v5219_v45 = vmul.f32 %v4506_v61, %v3851_v33 }
 0x821   :  { %v3966_v63 = vld [vmem:[%s11626_s3 + $0x6e8] sm:$0xff] }
 0x822   :  { %5449 = vst.msk [vmem:[%s11627_s4 + $0x358] sm:$0xff] %vm5341_vm4, %v5220_v60  ;;  %v5334_v44 = vmul.f32 %v5081_v38, %v3966_v63 }
 0x829   :  { %v3965_v35 = vld [vmem:[%s11626_s3 + $0x6e0] sm:$0xff] }
 0x82a   :  { %5448 = vst.msk [vmem:[%s11627_s4 + $0x350] sm:$0xff] %vm5341_vm4, %v5219_v45  ;;  %v5333_v54 = vmul.f32 %v5076_v20, %v3965_v35 }
 0x831   :  { %v3854_v23 = vld [vmem:[%s11626_s3 + $0x368] sm:$0xff] }
 0x832   :  { %5563 = vst.msk [vmem:[%s11627_s4 + $0x6e8] sm:$0xff] %vm5341_vm4, %v5334_v44  ;;  %v5222_v53 = vmul.f32 %v4521_v6, %v3854_v23 }
 0x839   :  { %v3853_v36 = vld [vmem:[%s11626_s3 + $0x360] sm:$0xff] }
 0x83a   :  { %5562 = vst.msk [vmem:[%s11627_s4 + $0x6e0] sm:$0xff] %vm5341_vm4, %v5333_v54  ;;  %v5221_v56 = vmul.f32 %v4516_v58, %v3853_v36 }
 0x841   :  { %v3968_v17 = vld [vmem:[%s11626_s3 + $0x6f8] sm:$0xff] }
 0x842   :  { %5451 = vst.msk [vmem:[%s11627_s4 + $0x368] sm:$0xff] %vm5341_vm4, %v5222_v53  ;;  %v5336_v15 = vmul.f32 %v5091_v12, %v3968_v17 }
 0x849   :  { %v3967_v11 = vld [vmem:[%s11626_s3 + $0x6f0] sm:$0xff] }
 0x84a   :  { %5450 = vst.msk [vmem:[%s11627_s4 + $0x360] sm:$0xff] %vm5341_vm4, %v5221_v56  ;;  %v5335_v3 = vmul.f32 %v5086_v41, %v3967_v11 }
 0x851   :  { %v3856_v50 = vld [vmem:[%s11626_s3 + $0x378] sm:$0xff] }
 0x852   :  { %5565 = vst.msk [vmem:[%s11627_s4 + $0x6f8] sm:$0xff] %vm5341_vm4, %v5336_v15  ;;  %v5224_v19 = vmul.f32 %v4531_v59, %v3856_v50 }
 0x859   :  { %v3855_v47 = vld [vmem:[%s11626_s3 + $0x370] sm:$0xff] }
 0x85a   :  { %5564 = vst.msk [vmem:[%s11627_s4 + $0x6f0] sm:$0xff] %vm5341_vm4, %v5335_v3  ;;  %v5223_v7 = vmul.f32 %v4526_v52, %v3855_v47 }
 0x861   :  { %v3970_v34 = vld [vmem:[%s11626_s3 + $0x708] sm:$0xff] }
 0x862   :  { %5453 = vst.msk [vmem:[%s11627_s4 + $0x378] sm:$0xff] %vm5341_vm4, %v5224_v19  ;;  %v5338_v9 = vmul.f32 %v5101_v29, %v3970_v34 }
 0x869   :  { %v3969_v18 = vld [vmem:[%s11626_s3 + $0x700] sm:$0xff] }
 0x86a   :  { %5452 = vst.msk [vmem:[%s11627_s4 + $0x370] sm:$0xff] %vm5341_vm4, %v5223_v7  ;;  %v5337_v1 = vmul.f32 %v5096_v27, %v3969_v18 }
 0x871   :  { %v3858_v21 = vld [vmem:[%s11626_s3 + $0x388] sm:$0xff] }
 0x872   :  { %5567 = vst.msk [vmem:[%s11627_s4 + $0x708] sm:$0xff] %vm5341_vm4, %v5338_v9  ;;  %v5226_v55 = vmul.f32 %v4541_v0, %v3858_v21 }
 0x879   :  { %v3857_v28 = vld [vmem:[%s11626_s3 + $0x380] sm:$0xff] }
 0x87a   :  { %5566 = vst.msk [vmem:[%s11627_s4 + $0x700] sm:$0xff] %vm5341_vm4, %v5337_v1  ;;  %v5225_v24 = vmul.f32 %v4536_v31, %v3857_v28 }
 0x881   :  { %v3972_v37 = vld [vmem:[%s11626_s3 + $0x718] sm:$0xff] }
 0x882   :  { %5455 = vst.msk [vmem:[%s11627_s4 + $0x388] sm:$0xff] %vm5341_vm4, %v5226_v55  ;;  %v5340_v10 = vmul.f32 %v5111_v26, %v3972_v37 }
 0x889   :  { %v3971_v30 = vld [vmem:[%s11626_s3 + $0x710] sm:$0xff] }
 0x88a   :  { %5454 = vst.msk [vmem:[%s11627_s4 + $0x380] sm:$0xff] %vm5341_vm4, %v5225_v24  ;;  %v5339_v22 = vmul.f32 %v5106_v48, %v3971_v30  ;;  %5569 = vst.msk [vmem:[%s11627_s4 + $0x718] sm:$0xff] %vm5341_vm4, %v5340_v10 }
 0x88c   :  { %5568 = vst.msk [vmem:[%s11627_s4 + $0x710] sm:$0xff] %vm5341_vm4, %v5339_v22 }

</bundles_post_ra>
